<compile_context>
chip_gen: v7x
topology: tpu7x:2x2x1
jax: 0.10.0
libtpu: 0.0.40
codegen_flags: <defaults>
</compile_context>

<pallas_src>
import functools
from math import ceil, floor

import jax
import jax.numpy as jnp
from jax.experimental import pallas as pl
from jax.experimental.pallas import tpu as pltpu

_EPS = 1e-5  # F.instance_norm default eps


# ---------------------------------------------------------------------------
# Helpers
# ---------------------------------------------------------------------------
def _reflect_pad_hw(x, pt, pb, pleft, pright):
    """Reflect-pad a (C, H, W) value along H (pt/pb) and W (pleft/pright).

    Built from static slices + concatenate so the whole padded slab is formed
    in registers and written with a single wide store by the caller (no
    per-row / per-column masked single-lane stores).
    W is padded first, then H, which reproduces full 2-D reflect semantics
    (corners reflect in both dimensions).
    """
    _, H_, W_ = x.shape
    if pleft or pright:
        left = [x[:, :, pleft - j:pleft - j + 1] for j in range(pleft)]
        right = [x[:, :, W_ - 2 - j:W_ - 1 - j] for j in range(pright)]
        x = jnp.concatenate(left + [x] + right, axis=2)
    if pt or pb:
        top = [x[:, pt - i:pt - i + 1, :] for i in range(pt)]
        bot = [x[:, H_ - 2 - i:H_ - 1 - i, :] for i in range(pb)]
        x = jnp.concatenate(top + [x] + bot, axis=1)
    return x


# ---------------------------------------------------------------------------
# Fused kernel (one batch sample per grid step)
# ---------------------------------------------------------------------------
def _fused_adaconv_kernel(
    x_ref, ws_ref, wp_ref, ab_ref, cw_ref, cb_ref,       # inputs
    o_ref,                                               # output
    xpad_ref, ypad_ref, p1_ref, p2_ref,                  # VMEM scratch
    *, n_groups, C, H, W, K, Kc, pads1, pads2,
):
    # x_ref  : (1, C, H*W)                    lane-dense activations
    # ws_ref : (1, G, Cog, K*K*Cg)            adaptive spatial weights (im2col order)
    # wp_ref : (1, G, Cog, Cog)               adaptive pointwise weights
    # ab_ref : (1, G, Cog, 1)                 adaptive pointwise bias
    # cw_ref : (C_out, Kc*Kc*C)               shared conv weights (im2col order)
    # cb_ref : (C_out, 1)                     shared conv bias
    # o_ref  : (1, C_out, Ho*Wo)              lane-dense output
    # xpad_ref: (C, Hp1, Wp1)    ypad_ref: (C, Hp2, Wp2)
    # p1_ref : (Cg*K*K, H*W)     p2_ref : (C*Kc*Kc, Ho*Wo)
    Cg = C // n_groups
    Cog = C // n_groups
    pt1, pb1, pl1, pr1 = pads1
    ph2, pw2 = pads2
    HW = H * W
    Ho = H + 2 * ph2 - (Kc - 1)
    Wo = W + 2 * pw2 - (Kc - 1)
    HoWo = Ho * Wo

    # ---- 1) instance norm: one batched reduce / rsqrt over all channels ----
    xc = x_ref[0].astype(jnp.float32)                     # (C, H*W) lane-dense
    m = jnp.mean(xc, axis=-1, keepdims=True)
    d = xc - m
    v = jnp.mean(d * d, axis=-1, keepdims=True)           # biased variance
    xn = d * jax.lax.rsqrt(v + _EPS)                       # (C, H*W)

    # ---- 2) reflect pad for the adaptive conv -> one wide scratch store ----
    xpad_ref[...] = _reflect_pad_hw(xn.reshape(C, H, W), pt1, pb1, pl1, pr1)

    # ---- 3) per group: im2col + MXU spatial conv, then pointwise + bias ----
    for g in range(n_groups):
        c0 = g * Cg
        for kh in range(K):
            for kw in range(K):
                r0 = (kh * K + kw) * Cg
                shifted = xpad_ref[c0:c0 + Cg, kh:kh + H, kw:kw + W]   # (Cg,H,W)
                p1_ref[r0:r0 + Cg, :] = shifted.reshape(Cg, HW)
        # (Cog, K*K*Cg) @ (K*K*Cg, H*W) on the MXU, f32 accumulate
        sp = jnp.dot(ws_ref[0, g], p1_ref[...],
                     preferred_element_type=jnp.float32)               # (Cog, HW)
        # pointwise (1x1) conv + bias: (Cog, Cog) @ (Cog, H*W)
        yg = jnp.dot(wp_ref[0, g], sp,
                     preferred_element_type=jnp.float32) + ab_ref[0, g]
        # ---- 4) reflect pad this group's output straight into scratch ----
        ypad_ref[g * Cog:(g + 1) * Cog, :, :] = _reflect_pad_hw(
            yg.reshape(Cog, H, W), ph2, ph2, pw2, pw2)

    # ---- 5) shared KcxKc conv: im2col + single MXU matmul + bias ----
    for kh in range(Kc):
        for kw in range(Kc):
            r0 = (kh * Kc + kw) * C
            shifted = ypad_ref[:, kh:kh + Ho, kw:kw + Wo]              # (C,Ho,Wo)
            p2_ref[r0:r0 + C, :] = shifted.reshape(C, HoWo)
    out = jnp.dot(cw_ref[...], p2_ref[...],
                  preferred_element_type=jnp.float32) + cb_ref[...]    # (C_out, HoWo)
    o_ref[0] = out.astype(o_ref.dtype)                                 # lane-dense store


# ---------------------------------------------------------------------------
# Wrapper
# ---------------------------------------------------------------------------
def ada_conv2d_forward(x, w_spatial, w_pointwise, bias, conv_w, conv_b, n_groups):
    # x: (B, C, H, W); w_spatial: (B, C, C//n_groups, K, K)
    # w_pointwise: (B, C, C//n_groups, 1, 1); bias: (B, C)
    # conv_w: (C_out, C, Kc, Kc); conv_b: (C_out,)
    B, C, H, W = x.shape
    K = w_spatial.shape[-1]
    Kc = conv_w.shape[-1]
    C_out = conv_w.shape[0]
    assert C % n_groups == 0
    Cg = C // n_groups
    Cog = C // n_groups
    assert w_spatial.shape == (B, C, Cg, K, K)
    assert w_pointwise.shape[:3] == (B, C, Cog)
    assert bias.shape == (B, C)

    # Adaptive conv: F.pad(pad=(ceil, floor, ceil, floor)) = (left, right, top, bottom).
    pt1, pb1 = ceil((K - 1) / 2), floor((K - 1) / 2)
    pl1, pr1 = pt1, pb1
    # Final conv: nn.Conv2d(padding=(ceil, floor), padding_mode='reflect')
    #   -> H padded by ceil on both sides, W padded by floor on both sides.
    ph2, pw2 = ceil((Kc - 1) / 2), floor((Kc - 1) / 2)
    # Reflect padding requires pad < spatial extent.
    assert max(pt1, pb1, ph2) < H and max(pl1, pr1, pw2) < W
    Hp1, Wp1 = H + pt1 + pb1, W + pl1 + pr1
    Hp2, Wp2 = H + 2 * ph2, W + 2 * pw2
    Ho, Wo = Hp2 - (Kc - 1), Wp2 - (Kc - 1)
    HW, HoWo = H * W, Ho * Wo

    f32 = jnp.float32
    # Lane-dense activation layouts (wrapper-side reshapes are free XLA glue).
    x_flat = x.reshape(B, C, HW)
    # Adaptive weights: per-sample VMEM blocks, columns reordered to the
    # im2col row order (kh, kw, ic).
    ws = (w_spatial.astype(f32)
          .reshape(B, n_groups, Cog, Cg, K, K)
          .transpose(0, 1, 2, 4, 5, 3)
          .reshape(B, n_groups, Cog, K * K * Cg))
    wp = w_pointwise.astype(f32).reshape(B, n_groups, Cog, Cog)
    ab = bias.astype(f32).reshape(B, n_groups, Cog, 1)
    # Shared conv weights: columns reordered to im2col row order (kh, kw, c).
    cw = conv_w.astype(f32).transpose(0, 2, 3, 1).reshape(C_out, Kc * Kc * C)
    cb = conv_b.astype(f32).reshape(C_out, 1)

    # VMEM budget: scratch + (double-buffered) I/O, with headroom; clamp so it
    # stays sane on every generation (v7x physical VMEM is 64 MiB).
    scratch_bytes = 4 * (C * Hp1 * Wp1 + C * Hp2 * Wp2
                         + Cg * K * K * HW + C * Kc * Kc * HoWo)
    io_bytes = 2 * 4 * (C * HW + C_out * HoWo
                        + n_groups * Cog * (K * K * Cg + Cog + 1)
                        + C_out * (Kc * Kc * C + 1))
    vmem_limit = max(32 * 1024 * 1024,
                     min(int(2 * (scratch_bytes + io_bytes)), 96 * 1024 * 1024))

    kernel = functools.partial(
        _fused_adaconv_kernel,
        n_groups=n_groups, C=C, H=H, W=W, K=K, Kc=Kc,
        pads1=(pt1, pb1, pl1, pr1), pads2=(ph2, pw2),
    )
    out_flat = pl.pallas_call(
        kernel,
        out_shape=jax.ShapeDtypeStruct((B, C_out, HoWo), x.dtype),
        grid=(B,),
        in_specs=[
            pl.BlockSpec((1, C, HW), lambda b: (b, 0, 0)),                    # x
            pl.BlockSpec((1, n_groups, Cog, K * K * Cg), lambda b: (b, 0, 0, 0)),
            pl.BlockSpec((1, n_groups, Cog, Cog), lambda b: (b, 0, 0, 0)),
            pl.BlockSpec((1, n_groups, Cog, 1), lambda b: (b, 0, 0, 0)),
            pl.BlockSpec((C_out, Kc * Kc * C), lambda b: (0, 0)),             # shared w
            pl.BlockSpec((C_out, 1), lambda b: (0, 0)),                       # shared b
        ],
        out_specs=pl.BlockSpec((1, C_out, HoWo), lambda b: (b, 0, 0)),
        scratch_shapes=[
            pltpu.VMEM((C, Hp1, Wp1), jnp.float32),        # reflect-padded xn
            pltpu.VMEM((C, Hp2, Wp2), jnp.float32),        # reflect-padded adaptive out
            pltpu.VMEM((Cg * K * K, HW), jnp.float32),     # im2col patches (per group)
            pltpu.VMEM((C * Kc * Kc, HoWo), jnp.float32),  # im2col patches (shared conv)
        ],
        compiler_params=pltpu.CompilerParams(
            dimension_semantics=("parallel",),
            vmem_limit_bytes=vmem_limit,
        ),
    )(x_flat, ws, wp, ab, cw, cb)
    return out_flat.reshape(B, C_out, Ho, Wo)


# ---------------------------------------------------------------------------
# Pure-JAX reference (for correctness check)
# ---------------------------------------------------------------------------
def reference_forward(x, w_spatial, w_pointwise, bias, conv_w, conv_b, n_groups):
    prec = jax.lax.Precision.HIGHEST
    mean = x.mean(axis=(2, 3), keepdims=True)
    var = ((x - mean) ** 2).mean(axis=(2, 3), keepdims=True)
    xn = (x - mean) / jnp.sqrt(var + _EPS)

    K = w_spatial.shape[-1]
    ph, pl_ = ceil((K - 1) / 2), floor((K - 1) / 2)
    dn = ("NCHW", "OIHW", "NCHW")
    ys = []
    for i in range(x.shape[0]):
        xi = jnp.pad(xn[i:i + 1], ((0, 0), (0, 0), (ph, pl_), (ph, pl_)), mode="reflect")
        yi = jax.lax.conv_general_dilated(xi, w_spatial[i], (1, 1), "VALID",
                                          feature_group_count=n_groups,
                                          dimension_numbers=dn, precision=prec)
        yi = jax.lax.conv_general_dilated(yi, w_pointwise[i], (1, 1), "VALID",
                                          feature_group_count=n_groups,
                                          dimension_numbers=dn, precision=prec)
        yi = yi + bias[i][None, :, None, None]
        ys.append(yi)
    y = jnp.concatenate(ys, axis=0)

    Kc = conv_w.shape[-1]
    pad_h, pad_w = ceil((Kc - 1) / 2), floor((Kc - 1) / 2)
    y = jnp.pad(y, ((0, 0), (0, 0), (pad_h, pad_h), (pad_w, pad_w)), mode="reflect")
    y = jax.lax.conv_general_dilated(y, conv_w, (1, 1), "VALID",
                                     dimension_numbers=dn, precision=prec)
    return y + conv_b[None, :, None, None]


# ---------------------------------------------------------------------------
if __name__ == "__main__":
    B, C_in, C_out, H, W, K, n_groups = 2, 4, 6, 16, 16, 3, 2
    Cg = C_in // n_groups

    key = jax.random.PRNGKey(0)
    ks = jax.random.split(key, 6)
    x = jax.random.normal(ks[0], (B, C_in, H, W), jnp.float32)
    w_spatial = jax.random.normal(ks[1], (B, C_in, Cg, K, K), jnp.float32) * 0.2
    w_pointwise = jax.random.normal(ks[2], (B, C_in, Cg, 1, 1), jnp.float32) * 0.2
    bias = jax.random.normal(ks[3], (B, C_in), jnp.float32) * 0.1
    conv_w = jax.random.normal(ks[4], (C_out, C_in, K, K), jnp.float32) * 0.1
    conv_b = jax.random.normal(ks[5], (C_out,), jnp.float32) * 0.1

    out = ada_conv2d_forward(x, w_spatial, w_pointwise, bias, conv_w, conv_b, n_groups)
    out = jax.block_until_ready(out)

    ref = reference_forward(x, w_spatial, w_pointwise, bias, conv_w, conv_b, n_groups)
    err = float(jnp.max(jnp.abs(out - ref)))
    assert out.shape == (B, C_out, H, W), out.shape
    # Tolerance leaves headroom for MXU pass decomposition of f32 matmuls;
    # any structural bug (index/ordering) produces errors orders of magnitude larger.
    assert err < 5e-3, f"mismatch vs reference, max abs err = {err}"
    print("KERNEL_OK")
</pallas_src>

<mosaic_0001>
module attributes {stable_mosaic.version = 11 : i64} {
  func.func @_fused_adaconv_kernel(%arg0: i32, %arg1: memref<1x4x256xf32, #tpu.memory_space<vmem>>, %arg2: memref<1x2x2x18xf32, #tpu.memory_space<vmem>>, %arg3: memref<1x2x2x2xf32, #tpu.memory_space<vmem>>, %arg4: memref<1x2x2x1xf32, #tpu.memory_space<vmem>>, %arg5: memref<6x36xf32, #tpu.memory_space<vmem>>, %arg6: memref<6x1xf32, #tpu.memory_space<vmem>>, %arg7: memref<1x6x256xf32, #tpu.memory_space<vmem>>, %arg8: memref<4x18x18xf32, #tpu.memory_space<vmem>>, %arg9: memref<4x18x18xf32, #tpu.memory_space<vmem>>, %arg10: memref<18x256xf32, #tpu.memory_space<vmem>>, %arg11: memref<36x256xf32, #tpu.memory_space<vmem>>) attributes {dimension_semantics = [#tpu.dimension_semantics<parallel>], iteration_bounds = array<i64: 2>, scalar_prefetch = 0 : i64, scratch_operands = 4 : i64, tpu.core_type = #tpu.core_type<tc>, window_params = [{transform_indices = @transform_0, window_bounds = array<i64: 1, 4, 256>}, {transform_indices = @transform_1, window_bounds = array<i64: 1, 2, 2, 18>}, {transform_indices = @transform_2, window_bounds = array<i64: 1, 2, 2, 2>}, {transform_indices = @transform_3, window_bounds = array<i64: 1, 2, 2, 1>}, {pipeline_mode = #tpu.pipeline_mode<synchronous>, transform_indices = @transform_4, window_bounds = array<i64: 6, 36>}, {pipeline_mode = #tpu.pipeline_mode<synchronous>, transform_indices = @transform_5, window_bounds = array<i64: 6, 1>}, {transform_indices = @transform_6, window_bounds = array<i64: 1, 6, 256>}]} {
    %c0 = arith.constant 0 : index
    %c0_0 = arith.constant 0 : index
    %c0_1 = arith.constant 0 : index
    %0 = vector.load %arg1[%c0, %c0_0, %c0_1] : memref<1x4x256xf32, #tpu.memory_space<vmem>>, vector<1x4x256xf32>
    %1 = vector.shape_cast %0 : vector<1x4x256xf32> to vector<4x256xf32>
    %cst = arith.constant dense<0.000000e+00> : vector<4xf32>
    %2 = vector.multi_reduction <add>, %1, %cst [1] : vector<4x256xf32> to vector<4xf32>
    %3 = vector.shape_cast %2 : vector<4xf32> to vector<4x1xf32>
    %cst_2 = arith.constant 2.560000e+02 : f32
    %4 = vector.broadcast %cst_2 : f32 to vector<4x1xf32>
    %5 = arith.divf %3, %4 : vector<4x1xf32>
    %6 = vector.broadcast %5 : vector<4x1xf32> to vector<4x256xf32>
    %7 = arith.subf %1, %6 : vector<4x256xf32>
    %8 = arith.mulf %7, %7 : vector<4x256xf32>
    %cst_3 = arith.constant dense<0.000000e+00> : vector<4xf32>
    %9 = vector.multi_reduction <add>, %8, %cst_3 [1] : vector<4x256xf32> to vector<4xf32>
    %10 = vector.shape_cast %9 : vector<4xf32> to vector<4x1xf32>
    %cst_4 = arith.constant 2.560000e+02 : f32
    %11 = vector.broadcast %cst_4 : f32 to vector<4x1xf32>
    %12 = arith.divf %10, %11 : vector<4x1xf32>
    %cst_5 = arith.constant 9.99999974E-6 : f32
    %13 = vector.broadcast %cst_5 : f32 to vector<4x1xf32>
    %14 = arith.addf %12, %13 : vector<4x1xf32>
    %15 = math.rsqrt %14 : vector<4x1xf32>
    %16 = vector.broadcast %15 : vector<4x1xf32> to vector<4x256xf32>
    %17 = arith.mulf %7, %16 : vector<4x256xf32>
    %18 = vector.shape_cast %17 : vector<4x256xf32> to vector<4x16x16xf32>
    %19 = vector.extract_strided_slice %18 {offsets = [0, 0, 1], sizes = [4, 16, 1], strides = [1, 1, 1]} : vector<4x16x16xf32> to vector<4x16x1xf32>
    %20 = vector.extract_strided_slice %18 {offsets = [0, 0, 14], sizes = [4, 16, 1], strides = [1, 1, 1]} : vector<4x16x16xf32> to vector<4x16x1xf32>
    %21 = tpu.concatenate %19, %18, %20 in 2 : vector<4x16x1xf32>, vector<4x16x16xf32>, vector<4x16x1xf32> -> vector<4x16x18xf32>
    %22 = vector.extract_strided_slice %21 {offsets = [0, 1, 0], sizes = [4, 1, 18], strides = [1, 1, 1]} : vector<4x16x18xf32> to vector<4x1x18xf32>
    %23 = vector.extract_strided_slice %21 {offsets = [0, 14, 0], sizes = [4, 1, 18], strides = [1, 1, 1]} : vector<4x16x18xf32> to vector<4x1x18xf32>
    %24 = tpu.concatenate %22, %21, %23 in 1 : vector<4x1x18xf32>, vector<4x16x18xf32>, vector<4x1x18xf32> -> vector<4x18x18xf32>
    %c0_6 = arith.constant 0 : index
    %c0_7 = arith.constant 0 : index
    %c0_8 = arith.constant 0 : index
    %25 = vector.load %arg8[%c0_6, %c0_7, %c0_8] : memref<4x18x18xf32, #tpu.memory_space<vmem>>, vector<4x18x18xf32>
    tpu.vector_store %arg8[%c0_6, %c0_7, %c0_8], %24 {strides = array<i32>} : memref<4x18x18xf32, #tpu.memory_space<vmem>>, vector<4x18x18xf32>,
    %c0_9 = arith.constant 0 : index
    %c0_10 = arith.constant 0 : index
    %c0_11 = arith.constant 0 : index
    %26 = vector.load %arg8[%c0_9, %c0_10, %c0_11] : memref<4x18x18xf32, #tpu.memory_space<vmem>>, vector<2x16x16xf32>
    %27 = vector.shape_cast %26 : vector<2x16x16xf32> to vector<2x256xf32>
    %c0_12 = arith.constant 0 : index
    %c0_13 = arith.constant 0 : index
    %28 = vector.load %arg10[%c0_12, %c0_13] : memref<18x256xf32, #tpu.memory_space<vmem>>, vector<2x256xf32>
    tpu.vector_store %arg10[%c0_12, %c0_13], %27 {strides = array<i32>} : memref<18x256xf32, #tpu.memory_space<vmem>>, vector<2x256xf32>,
    %c0_14 = arith.constant 0 : index
    %c0_15 = arith.constant 0 : index
    %c1 = arith.constant 1 : index
    %29 = vector.load %arg8[%c0_14, %c0_15, %c1] : memref<4x18x18xf32, #tpu.memory_space<vmem>>, vector<2x16x16xf32>
    %30 = vector.shape_cast %29 : vector<2x16x16xf32> to vector<2x256xf32>
    %c2 = arith.constant 2 : index
    %c0_16 = arith.constant 0 : index
    %31 = vector.load %arg10[%c2, %c0_16] : memref<18x256xf32, #tpu.memory_space<vmem>>, vector<2x256xf32>
    tpu.vector_store %arg10[%c2, %c0_16], %30 {strides = array<i32>} : memref<18x256xf32, #tpu.memory_space<vmem>>, vector<2x256xf32>,
    %c0_17 = arith.constant 0 : index
    %c0_18 = arith.constant 0 : index
    %c2_19 = arith.constant 2 : index
    %32 = vector.load %arg8[%c0_17, %c0_18, %c2_19] : memref<4x18x18xf32, #tpu.memory_space<vmem>>, vector<2x16x16xf32>
    %33 = vector.shape_cast %32 : vector<2x16x16xf32> to vector<2x256xf32>
    %c4 = arith.constant 4 : index
    %c0_20 = arith.constant 0 : index
    %34 = vector.load %arg10[%c4, %c0_20] : memref<18x256xf32, #tpu.memory_space<vmem>>, vector<2x256xf32>
    tpu.vector_store %arg10[%c4, %c0_20], %33 {strides = array<i32>} : memref<18x256xf32, #tpu.memory_space<vmem>>, vector<2x256xf32>,
    %c0_21 = arith.constant 0 : index
    %c1_22 = arith.constant 1 : index
    %c0_23 = arith.constant 0 : index
    %35 = vector.load %arg8[%c0_21, %c1_22, %c0_23] : memref<4x18x18xf32, #tpu.memory_space<vmem>>, vector<2x16x16xf32>
    %36 = vector.shape_cast %35 : vector<2x16x16xf32> to vector<2x256xf32>
    %c6 = arith.constant 6 : index
    %c0_24 = arith.constant 0 : index
    %37 = vector.load %arg10[%c6, %c0_24] : memref<18x256xf32, #tpu.memory_space<vmem>>, vector<2x256xf32>
    tpu.vector_store %arg10[%c6, %c0_24], %36 {strides = array<i32>} : memref<18x256xf32, #tpu.memory_space<vmem>>, vector<2x256xf32>,
    %c0_25 = arith.constant 0 : index
    %c1_26 = arith.constant 1 : index
    %c1_27 = arith.constant 1 : index
    %38 = vector.load %arg8[%c0_25, %c1_26, %c1_27] : memref<4x18x18xf32, #tpu.memory_space<vmem>>, vector<2x16x16xf32>
    %39 = vector.shape_cast %38 : vector<2x16x16xf32> to vector<2x256xf32>
    %c8 = arith.constant 8 : index
    %c0_28 = arith.constant 0 : index
    %40 = vector.load %arg10[%c8, %c0_28] : memref<18x256xf32, #tpu.memory_space<vmem>>, vector<2x256xf32>
    tpu.vector_store %arg10[%c8, %c0_28], %39 {strides = array<i32>} : memref<18x256xf32, #tpu.memory_space<vmem>>, vector<2x256xf32>,
    %c0_29 = arith.constant 0 : index
    %c1_30 = arith.constant 1 : index
    %c2_31 = arith.constant 2 : index
    %41 = vector.load %arg8[%c0_29, %c1_30, %c2_31] : memref<4x18x18xf32, #tpu.memory_space<vmem>>, vector<2x16x16xf32>
    %42 = vector.shape_cast %41 : vector<2x16x16xf32> to vector<2x256xf32>
    %c10 = arith.constant 10 : index
    %c0_32 = arith.constant 0 : index
    %43 = vector.load %arg10[%c10, %c0_32] : memref<18x256xf32, #tpu.memory_space<vmem>>, vector<2x256xf32>
    tpu.vector_store %arg10[%c10, %c0_32], %42 {strides = array<i32>} : memref<18x256xf32, #tpu.memory_space<vmem>>, vector<2x256xf32>,
    %c0_33 = arith.constant 0 : index
    %c2_34 = arith.constant 2 : index
    %c0_35 = arith.constant 0 : index
    %44 = vector.load %arg8[%c0_33, %c2_34, %c0_35] : memref<4x18x18xf32, #tpu.memory_space<vmem>>, vector<2x16x16xf32>
    %45 = vector.shape_cast %44 : vector<2x16x16xf32> to vector<2x256xf32>
    %c12 = arith.constant 12 : index
    %c0_36 = arith.constant 0 : index
    %46 = vector.load %arg10[%c12, %c0_36] : memref<18x256xf32, #tpu.memory_space<vmem>>, vector<2x256xf32>
    tpu.vector_store %arg10[%c12, %c0_36], %45 {strides = array<i32>} : memref<18x256xf32, #tpu.memory_space<vmem>>, vector<2x256xf32>,
    %c0_37 = arith.constant 0 : index
    %c2_38 = arith.constant 2 : index
    %c1_39 = arith.constant 1 : index
    %47 = vector.load %arg8[%c0_37, %c2_38, %c1_39] : memref<4x18x18xf32, #tpu.memory_space<vmem>>, vector<2x16x16xf32>
    %48 = vector.shape_cast %47 : vector<2x16x16xf32> to vector<2x256xf32>
    %c14 = arith.constant 14 : index
    %c0_40 = arith.constant 0 : index
    %49 = vector.load %arg10[%c14, %c0_40] : memref<18x256xf32, #tpu.memory_space<vmem>>, vector<2x256xf32>
    tpu.vector_store %arg10[%c14, %c0_40], %48 {strides = array<i32>} : memref<18x256xf32, #tpu.memory_space<vmem>>, vector<2x256xf32>,
    %c0_41 = arith.constant 0 : index
    %c2_42 = arith.constant 2 : index
    %c2_43 = arith.constant 2 : index
    %50 = vector.load %arg8[%c0_41, %c2_42, %c2_43] : memref<4x18x18xf32, #tpu.memory_space<vmem>>, vector<2x16x16xf32>
    %51 = vector.shape_cast %50 : vector<2x16x16xf32> to vector<2x256xf32>
    %c16 = arith.constant 16 : index
    %c0_44 = arith.constant 0 : index
    %52 = vector.load %arg10[%c16, %c0_44] : memref<18x256xf32, #tpu.memory_space<vmem>>, vector<2x256xf32>
    tpu.vector_store %arg10[%c16, %c0_44], %51 {strides = array<i32>} : memref<18x256xf32, #tpu.memory_space<vmem>>, vector<2x256xf32>,
    %c0_45 = arith.constant 0 : index
    %c0_46 = arith.constant 0 : index
    %c0_47 = arith.constant 0 : index
    %c0_48 = arith.constant 0 : index
    %53 = vector.load %arg2[%c0_45, %c0_46, %c0_47, %c0_48] : memref<1x2x2x18xf32, #tpu.memory_space<vmem>>, vector<1x1x2x18xf32>
    %54 = vector.shape_cast %53 : vector<1x1x2x18xf32> to vector<2x18xf32>
    %c0_49 = arith.constant 0 : index
    %c0_50 = arith.constant 0 : index
    %55 = vector.load %arg10[%c0_49, %c0_50] : memref<18x256xf32, #tpu.memory_space<vmem>>, vector<18x256xf32>
    %cst_51 = arith.constant dense<0.000000e+00> : vector<2x256xf32>
    %56 = tpu.matmul %54, %55, %cst_51 {dimension_numbers = #tpu.dot_dimension_numbers<[1], [0], [0], [1], [0, 0, 1, 1], [], []>} : vector<2x18xf32>, vector<18x256xf32>, vector<2x256xf32> -> vector<2x256xf32>
    %c0_52 = arith.constant 0 : index
    %c0_53 = arith.constant 0 : index
    %c0_54 = arith.constant 0 : index
    %c0_55 = arith.constant 0 : index
    %57 = vector.load %arg3[%c0_52, %c0_53, %c0_54, %c0_55] : memref<1x2x2x2xf32, #tpu.memory_space<vmem>>, vector<1x1x2x2xf32>
    %58 = vector.shape_cast %57 : vector<1x1x2x2xf32> to vector<2x2xf32>
    %cst_56 = arith.constant dense<0.000000e+00> : vector<2x256xf32>
    %59 = tpu.matmul %58, %56, %cst_56 {dimension_numbers = #tpu.dot_dimension_numbers<[1], [0], [0], [1], [0, 0, 1, 1], [], []>} : vector<2x2xf32>, vector<2x256xf32>, vector<2x256xf32> -> vector<2x256xf32>
    %c0_57 = arith.constant 0 : index
    %c0_58 = arith.constant 0 : index
    %c0_59 = arith.constant 0 : index
    %c0_60 = arith.constant 0 : index
    %60 = vector.load %arg4[%c0_57, %c0_58, %c0_59, %c0_60] : memref<1x2x2x1xf32, #tpu.memory_space<vmem>>, vector<1x1x2x1xf32>
    %61 = vector.shape_cast %60 : vector<1x1x2x1xf32> to vector<2x1xf32>
    %62 = vector.broadcast %61 : vector<2x1xf32> to vector<2x256xf32>
    %63 = arith.addf %59, %62 : vector<2x256xf32>
    %64 = vector.shape_cast %63 : vector<2x256xf32> to vector<2x16x16xf32>
    %65 = vector.extract_strided_slice %64 {offsets = [0, 0, 1], sizes = [2, 16, 1], strides = [1, 1, 1]} : vector<2x16x16xf32> to vector<2x16x1xf32>
    %66 = vector.extract_strided_slice %64 {offsets = [0, 0, 14], sizes = [2, 16, 1], strides = [1, 1, 1]} : vector<2x16x16xf32> to vector<2x16x1xf32>
    %67 = tpu.concatenate %65, %64, %66 in 2 : vector<2x16x1xf32>, vector<2x16x16xf32>, vector<2x16x1xf32> -> vector<2x16x18xf32>
    %68 = vector.extract_strided_slice %67 {offsets = [0, 1, 0], sizes = [2, 1, 18], strides = [1, 1, 1]} : vector<2x16x18xf32> to vector<2x1x18xf32>
    %69 = vector.extract_strided_slice %67 {offsets = [0, 14, 0], sizes = [2, 1, 18], strides = [1, 1, 1]} : vector<2x16x18xf32> to vector<2x1x18xf32>
    %70 = tpu.concatenate %68, %67, %69 in 1 : vector<2x1x18xf32>, vector<2x16x18xf32>, vector<2x1x18xf32> -> vector<2x18x18xf32>
    %c0_61 = arith.constant 0 : index
    %c0_62 = arith.constant 0 : index
    %c0_63 = arith.constant 0 : index
    %71 = vector.load %arg9[%c0_61, %c0_62, %c0_63] : memref<4x18x18xf32, #tpu.memory_space<vmem>>, vector<2x18x18xf32>
    tpu.vector_store %arg9[%c0_61, %c0_62, %c0_63], %70 {strides = array<i32>} : memref<4x18x18xf32, #tpu.memory_space<vmem>>, vector<2x18x18xf32>,
    %c2_64 = arith.constant 2 : index
    %c0_65 = arith.constant 0 : index
    %c0_66 = arith.constant 0 : index
    %72 = vector.load %arg8[%c2_64, %c0_65, %c0_66] : memref<4x18x18xf32, #tpu.memory_space<vmem>>, vector<2x16x16xf32>
    %73 = vector.shape_cast %72 : vector<2x16x16xf32> to vector<2x256xf32>
    %c0_67 = arith.constant 0 : index
    %c0_68 = arith.constant 0 : index
    %74 = vector.load %arg10[%c0_67, %c0_68] : memref<18x256xf32, #tpu.memory_space<vmem>>, vector<2x256xf32>
    tpu.vector_store %arg10[%c0_67, %c0_68], %73 {strides = array<i32>} : memref<18x256xf32, #tpu.memory_space<vmem>>, vector<2x256xf32>,
    %c2_69 = arith.constant 2 : index
    %c0_70 = arith.constant 0 : index
    %c1_71 = arith.constant 1 : index
    %75 = vector.load %arg8[%c2_69, %c0_70, %c1_71] : memref<4x18x18xf32, #tpu.memory_space<vmem>>, vector<2x16x16xf32>
    %76 = vector.shape_cast %75 : vector<2x16x16xf32> to vector<2x256xf32>
    %c2_72 = arith.constant 2 : index
    %c0_73 = arith.constant 0 : index
    %77 = vector.load %arg10[%c2_72, %c0_73] : memref<18x256xf32, #tpu.memory_space<vmem>>, vector<2x256xf32>
    tpu.vector_store %arg10[%c2_72, %c0_73], %76 {strides = array<i32>} : memref<18x256xf32, #tpu.memory_space<vmem>>, vector<2x256xf32>,
    %c2_74 = arith.constant 2 : index
    %c0_75 = arith.constant 0 : index
    %c2_76 = arith.constant 2 : index
    %78 = vector.load %arg8[%c2_74, %c0_75, %c2_76] : memref<4x18x18xf32, #tpu.memory_space<vmem>>, vector<2x16x16xf32>
    %79 = vector.shape_cast %78 : vector<2x16x16xf32> to vector<2x256xf32>
    %c4_77 = arith.constant 4 : index
    %c0_78 = arith.constant 0 : index
    %80 = vector.load %arg10[%c4_77, %c0_78] : memref<18x256xf32, #tpu.memory_space<vmem>>, vector<2x256xf32>
    tpu.vector_store %arg10[%c4_77, %c0_78], %79 {strides = array<i32>} : memref<18x256xf32, #tpu.memory_space<vmem>>, vector<2x256xf32>,
    %c2_79 = arith.constant 2 : index
    %c1_80 = arith.constant 1 : index
    %c0_81 = arith.constant 0 : index
    %81 = vector.load %arg8[%c2_79, %c1_80, %c0_81] : memref<4x18x18xf32, #tpu.memory_space<vmem>>, vector<2x16x16xf32>
    %82 = vector.shape_cast %81 : vector<2x16x16xf32> to vector<2x256xf32>
    %c6_82 = arith.constant 6 : index
    %c0_83 = arith.constant 0 : index
    %83 = vector.load %arg10[%c6_82, %c0_83] : memref<18x256xf32, #tpu.memory_space<vmem>>, vector<2x256xf32>
    tpu.vector_store %arg10[%c6_82, %c0_83], %82 {strides = array<i32>} : memref<18x256xf32, #tpu.memory_space<vmem>>, vector<2x256xf32>,
    %c2_84 = arith.constant 2 : index
    %c1_85 = arith.constant 1 : index
    %c1_86 = arith.constant 1 : index
    %84 = vector.load %arg8[%c2_84, %c1_85, %c1_86] : memref<4x18x18xf32, #tpu.memory_space<vmem>>, vector<2x16x16xf32>
    %85 = vector.shape_cast %84 : vector<2x16x16xf32> to vector<2x256xf32>
    %c8_87 = arith.constant 8 : index
    %c0_88 = arith.constant 0 : index
    %86 = vector.load %arg10[%c8_87, %c0_88] : memref<18x256xf32, #tpu.memory_space<vmem>>, vector<2x256xf32>
    tpu.vector_store %arg10[%c8_87, %c0_88], %85 {strides = array<i32>} : memref<18x256xf32, #tpu.memory_space<vmem>>, vector<2x256xf32>,
    %c2_89 = arith.constant 2 : index
    %c1_90 = arith.constant 1 : index
    %c2_91 = arith.constant 2 : index
    %87 = vector.load %arg8[%c2_89, %c1_90, %c2_91] : memref<4x18x18xf32, #tpu.memory_space<vmem>>, vector<2x16x16xf32>
    %88 = vector.shape_cast %87 : vector<2x16x16xf32> to vector<2x256xf32>
    %c10_92 = arith.constant 10 : index
    %c0_93 = arith.constant 0 : index
    %89 = vector.load %arg10[%c10_92, %c0_93] : memref<18x256xf32, #tpu.memory_space<vmem>>, vector<2x256xf32>
    tpu.vector_store %arg10[%c10_92, %c0_93], %88 {strides = array<i32>} : memref<18x256xf32, #tpu.memory_space<vmem>>, vector<2x256xf32>,
    %c2_94 = arith.constant 2 : index
    %c2_95 = arith.constant 2 : index
    %c0_96 = arith.constant 0 : index
    %90 = vector.load %arg8[%c2_94, %c2_95, %c0_96] : memref<4x18x18xf32, #tpu.memory_space<vmem>>, vector<2x16x16xf32>
    %91 = vector.shape_cast %90 : vector<2x16x16xf32> to vector<2x256xf32>
    %c12_97 = arith.constant 12 : index
    %c0_98 = arith.constant 0 : index
    %92 = vector.load %arg10[%c12_97, %c0_98] : memref<18x256xf32, #tpu.memory_space<vmem>>, vector<2x256xf32>
    tpu.vector_store %arg10[%c12_97, %c0_98], %91 {strides = array<i32>} : memref<18x256xf32, #tpu.memory_space<vmem>>, vector<2x256xf32>,
    %c2_99 = arith.constant 2 : index
    %c2_100 = arith.constant 2 : index
    %c1_101 = arith.constant 1 : index
    %93 = vector.load %arg8[%c2_99, %c2_100, %c1_101] : memref<4x18x18xf32, #tpu.memory_space<vmem>>, vector<2x16x16xf32>
    %94 = vector.shape_cast %93 : vector<2x16x16xf32> to vector<2x256xf32>
    %c14_102 = arith.constant 14 : index
    %c0_103 = arith.constant 0 : index
    %95 = vector.load %arg10[%c14_102, %c0_103] : memref<18x256xf32, #tpu.memory_space<vmem>>, vector<2x256xf32>
    tpu.vector_store %arg10[%c14_102, %c0_103], %94 {strides = array<i32>} : memref<18x256xf32, #tpu.memory_space<vmem>>, vector<2x256xf32>,
    %c2_104 = arith.constant 2 : index
    %c2_105 = arith.constant 2 : index
    %c2_106 = arith.constant 2 : index
    %96 = vector.load %arg8[%c2_104, %c2_105, %c2_106] : memref<4x18x18xf32, #tpu.memory_space<vmem>>, vector<2x16x16xf32>
    %97 = vector.shape_cast %96 : vector<2x16x16xf32> to vector<2x256xf32>
    %c16_107 = arith.constant 16 : index
    %c0_108 = arith.constant 0 : index
    %98 = vector.load %arg10[%c16_107, %c0_108] : memref<18x256xf32, #tpu.memory_space<vmem>>, vector<2x256xf32>
    tpu.vector_store %arg10[%c16_107, %c0_108], %97 {strides = array<i32>} : memref<18x256xf32, #tpu.memory_space<vmem>>, vector<2x256xf32>,
    %c0_109 = arith.constant 0 : index
    %c1_110 = arith.constant 1 : index
    %c0_111 = arith.constant 0 : index
    %c0_112 = arith.constant 0 : index
    %99 = vector.load %arg2[%c0_109, %c1_110, %c0_111, %c0_112] : memref<1x2x2x18xf32, #tpu.memory_space<vmem>>, vector<1x1x2x18xf32>
    %100 = vector.shape_cast %99 : vector<1x1x2x18xf32> to vector<2x18xf32>
    %c0_113 = arith.constant 0 : index
    %c0_114 = arith.constant 0 : index
    %101 = vector.load %arg10[%c0_113, %c0_114] : memref<18x256xf32, #tpu.memory_space<vmem>>, vector<18x256xf32>
    %cst_115 = arith.constant dense<0.000000e+00> : vector<2x256xf32>
    %102 = tpu.matmul %100, %101, %cst_115 {dimension_numbers = #tpu.dot_dimension_numbers<[1], [0], [0], [1], [0, 0, 1, 1], [], []>} : vector<2x18xf32>, vector<18x256xf32>, vector<2x256xf32> -> vector<2x256xf32>
    %c0_116 = arith.constant 0 : index
    %c1_117 = arith.constant 1 : index
    %c0_118 = arith.constant 0 : index
    %c0_119 = arith.constant 0 : index
    %103 = vector.load %arg3[%c0_116, %c1_117, %c0_118, %c0_119] : memref<1x2x2x2xf32, #tpu.memory_space<vmem>>, vector<1x1x2x2xf32>
    %104 = vector.shape_cast %103 : vector<1x1x2x2xf32> to vector<2x2xf32>
    %cst_120 = arith.constant dense<0.000000e+00> : vector<2x256xf32>
    %105 = tpu.matmul %104, %102, %cst_120 {dimension_numbers = #tpu.dot_dimension_numbers<[1], [0], [0], [1], [0, 0, 1, 1], [], []>} : vector<2x2xf32>, vector<2x256xf32>, vector<2x256xf32> -> vector<2x256xf32>
    %c0_121 = arith.constant 0 : index
    %c1_122 = arith.constant 1 : index
    %c0_123 = arith.constant 0 : index
    %c0_124 = arith.constant 0 : index
    %106 = vector.load %arg4[%c0_121, %c1_122, %c0_123, %c0_124] : memref<1x2x2x1xf32, #tpu.memory_space<vmem>>, vector<1x1x2x1xf32>
    %107 = vector.shape_cast %106 : vector<1x1x2x1xf32> to vector<2x1xf32>
    %108 = vector.broadcast %107 : vector<2x1xf32> to vector<2x256xf32>
    %109 = arith.addf %105, %108 : vector<2x256xf32>
    %110 = vector.shape_cast %109 : vector<2x256xf32> to vector<2x16x16xf32>
    %111 = vector.extract_strided_slice %110 {offsets = [0, 0, 1], sizes = [2, 16, 1], strides = [1, 1, 1]} : vector<2x16x16xf32> to vector<2x16x1xf32>
    %112 = vector.extract_strided_slice %110 {offsets = [0, 0, 14], sizes = [2, 16, 1], strides = [1, 1, 1]} : vector<2x16x16xf32> to vector<2x16x1xf32>
    %113 = tpu.concatenate %111, %110, %112 in 2 : vector<2x16x1xf32>, vector<2x16x16xf32>, vector<2x16x1xf32> -> vector<2x16x18xf32>
    %114 = vector.extract_strided_slice %113 {offsets = [0, 1, 0], sizes = [2, 1, 18], strides = [1, 1, 1]} : vector<2x16x18xf32> to vector<2x1x18xf32>
    %115 = vector.extract_strided_slice %113 {offsets = [0, 14, 0], sizes = [2, 1, 18], strides = [1, 1, 1]} : vector<2x16x18xf32> to vector<2x1x18xf32>
    %116 = tpu.concatenate %114, %113, %115 in 1 : vector<2x1x18xf32>, vector<2x16x18xf32>, vector<2x1x18xf32> -> vector<2x18x18xf32>
    %c2_125 = arith.constant 2 : index
    %c0_126 = arith.constant 0 : index
    %c0_127 = arith.constant 0 : index
    %117 = vector.load %arg9[%c2_125, %c0_126, %c0_127] : memref<4x18x18xf32, #tpu.memory_space<vmem>>, vector<2x18x18xf32>
    tpu.vector_store %arg9[%c2_125, %c0_126, %c0_127], %116 {strides = array<i32>} : memref<4x18x18xf32, #tpu.memory_space<vmem>>, vector<2x18x18xf32>,
    %c0_128 = arith.constant 0 : index
    %c0_129 = arith.constant 0 : index
    %c0_130 = arith.constant 0 : index
    %118 = vector.load %arg9[%c0_128, %c0_129, %c0_130] : memref<4x18x18xf32, #tpu.memory_space<vmem>>, vector<4x16x16xf32>
    %119 = vector.shape_cast %118 : vector<4x16x16xf32> to vector<4x256xf32>
    %c0_131 = arith.constant 0 : index
    %c0_132 = arith.constant 0 : index
    %120 = vector.load %arg11[%c0_131, %c0_132] : memref<36x256xf32, #tpu.memory_space<vmem>>, vector<4x256xf32>
    tpu.vector_store %arg11[%c0_131, %c0_132], %119 {strides = array<i32>} : memref<36x256xf32, #tpu.memory_space<vmem>>, vector<4x256xf32>,
    %c0_133 = arith.constant 0 : index
    %c0_134 = arith.constant 0 : index
    %c1_135 = arith.constant 1 : index
    %121 = vector.load %arg9[%c0_133, %c0_134, %c1_135] : memref<4x18x18xf32, #tpu.memory_space<vmem>>, vector<4x16x16xf32>
    %122 = vector.shape_cast %121 : vector<4x16x16xf32> to vector<4x256xf32>
    %c4_136 = arith.constant 4 : index
    %c0_137 = arith.constant 0 : index
    %123 = vector.load %arg11[%c4_136, %c0_137] : memref<36x256xf32, #tpu.memory_space<vmem>>, vector<4x256xf32>
    tpu.vector_store %arg11[%c4_136, %c0_137], %122 {strides = array<i32>} : memref<36x256xf32, #tpu.memory_space<vmem>>, vector<4x256xf32>,
    %c0_138 = arith.constant 0 : index
    %c0_139 = arith.constant 0 : index
    %c2_140 = arith.constant 2 : index
    %124 = vector.load %arg9[%c0_138, %c0_139, %c2_140] : memref<4x18x18xf32, #tpu.memory_space<vmem>>, vector<4x16x16xf32>
    %125 = vector.shape_cast %124 : vector<4x16x16xf32> to vector<4x256xf32>
    %c8_141 = arith.constant 8 : index
    %c0_142 = arith.constant 0 : index
    %126 = vector.load %arg11[%c8_141, %c0_142] : memref<36x256xf32, #tpu.memory_space<vmem>>, vector<4x256xf32>
    tpu.vector_store %arg11[%c8_141, %c0_142], %125 {strides = array<i32>} : memref<36x256xf32, #tpu.memory_space<vmem>>, vector<4x256xf32>,
    %c0_143 = arith.constant 0 : index
    %c1_144 = arith.constant 1 : index
    %c0_145 = arith.constant 0 : index
    %127 = vector.load %arg9[%c0_143, %c1_144, %c0_145] : memref<4x18x18xf32, #tpu.memory_space<vmem>>, vector<4x16x16xf32>
    %128 = vector.shape_cast %127 : vector<4x16x16xf32> to vector<4x256xf32>
    %c12_146 = arith.constant 12 : index
    %c0_147 = arith.constant 0 : index
    %129 = vector.load %arg11[%c12_146, %c0_147] : memref<36x256xf32, #tpu.memory_space<vmem>>, vector<4x256xf32>
    tpu.vector_store %arg11[%c12_146, %c0_147], %128 {strides = array<i32>} : memref<36x256xf32, #tpu.memory_space<vmem>>, vector<4x256xf32>,
    %c0_148 = arith.constant 0 : index
    %c1_149 = arith.constant 1 : index
    %c1_150 = arith.constant 1 : index
    %130 = vector.load %arg9[%c0_148, %c1_149, %c1_150] : memref<4x18x18xf32, #tpu.memory_space<vmem>>, vector<4x16x16xf32>
    %131 = vector.shape_cast %130 : vector<4x16x16xf32> to vector<4x256xf32>
    %c16_151 = arith.constant 16 : index
    %c0_152 = arith.constant 0 : index
    %132 = vector.load %arg11[%c16_151, %c0_152] : memref<36x256xf32, #tpu.memory_space<vmem>>, vector<4x256xf32>
    tpu.vector_store %arg11[%c16_151, %c0_152], %131 {strides = array<i32>} : memref<36x256xf32, #tpu.memory_space<vmem>>, vector<4x256xf32>,
    %c0_153 = arith.constant 0 : index
    %c1_154 = arith.constant 1 : index
    %c2_155 = arith.constant 2 : index
    %133 = vector.load %arg9[%c0_153, %c1_154, %c2_155] : memref<4x18x18xf32, #tpu.memory_space<vmem>>, vector<4x16x16xf32>
    %134 = vector.shape_cast %133 : vector<4x16x16xf32> to vector<4x256xf32>
    %c20 = arith.constant 20 : index
    %c0_156 = arith.constant 0 : index
    %135 = vector.load %arg11[%c20, %c0_156] : memref<36x256xf32, #tpu.memory_space<vmem>>, vector<4x256xf32>
    tpu.vector_store %arg11[%c20, %c0_156], %134 {strides = array<i32>} : memref<36x256xf32, #tpu.memory_space<vmem>>, vector<4x256xf32>,
    %c0_157 = arith.constant 0 : index
    %c2_158 = arith.constant 2 : index
    %c0_159 = arith.constant 0 : index
    %136 = vector.load %arg9[%c0_157, %c2_158, %c0_159] : memref<4x18x18xf32, #tpu.memory_space<vmem>>, vector<4x16x16xf32>
    %137 = vector.shape_cast %136 : vector<4x16x16xf32> to vector<4x256xf32>
    %c24 = arith.constant 24 : index
    %c0_160 = arith.constant 0 : index
    %138 = vector.load %arg11[%c24, %c0_160] : memref<36x256xf32, #tpu.memory_space<vmem>>, vector<4x256xf32>
    tpu.vector_store %arg11[%c24, %c0_160], %137 {strides = array<i32>} : memref<36x256xf32, #tpu.memory_space<vmem>>, vector<4x256xf32>,
    %c0_161 = arith.constant 0 : index
    %c2_162 = arith.constant 2 : index
    %c1_163 = arith.constant 1 : index
    %139 = vector.load %arg9[%c0_161, %c2_162, %c1_163] : memref<4x18x18xf32, #tpu.memory_space<vmem>>, vector<4x16x16xf32>
    %140 = vector.shape_cast %139 : vector<4x16x16xf32> to vector<4x256xf32>
    %c28 = arith.constant 28 : index
    %c0_164 = arith.constant 0 : index
    %141 = vector.load %arg11[%c28, %c0_164] : memref<36x256xf32, #tpu.memory_space<vmem>>, vector<4x256xf32>
    tpu.vector_store %arg11[%c28, %c0_164], %140 {strides = array<i32>} : memref<36x256xf32, #tpu.memory_space<vmem>>, vector<4x256xf32>,
    %c0_165 = arith.constant 0 : index
    %c2_166 = arith.constant 2 : index
    %c2_167 = arith.constant 2 : index
    %142 = vector.load %arg9[%c0_165, %c2_166, %c2_167] : memref<4x18x18xf32, #tpu.memory_space<vmem>>, vector<4x16x16xf32>
    %143 = vector.shape_cast %142 : vector<4x16x16xf32> to vector<4x256xf32>
    %c32 = arith.constant 32 : index
    %c0_168 = arith.constant 0 : index
    %144 = vector.load %arg11[%c32, %c0_168] : memref<36x256xf32, #tpu.memory_space<vmem>>, vector<4x256xf32>
    tpu.vector_store %arg11[%c32, %c0_168], %143 {strides = array<i32>} : memref<36x256xf32, #tpu.memory_space<vmem>>, vector<4x256xf32>,
    %c0_169 = arith.constant 0 : index
    %c0_170 = arith.constant 0 : index
    %145 = vector.load %arg5[%c0_169, %c0_170] : memref<6x36xf32, #tpu.memory_space<vmem>>, vector<6x36xf32>
    %c0_171 = arith.constant 0 : index
    %c0_172 = arith.constant 0 : index
    %146 = vector.load %arg11[%c0_171, %c0_172] : memref<36x256xf32, #tpu.memory_space<vmem>>, vector<36x256xf32>
    %cst_173 = arith.constant dense<0.000000e+00> : vector<6x256xf32>
    %147 = tpu.matmul %145, %146, %cst_173 {dimension_numbers = #tpu.dot_dimension_numbers<[1], [0], [0], [1], [0, 0, 1, 1], [], []>} : vector<6x36xf32>, vector<36x256xf32>, vector<6x256xf32> -> vector<6x256xf32>
    %c0_174 = arith.constant 0 : index
    %c0_175 = arith.constant 0 : index
    %148 = vector.load %arg6[%c0_174, %c0_175] : memref<6x1xf32, #tpu.memory_space<vmem>>, vector<6x1xf32>
    %149 = vector.broadcast %148 : vector<6x1xf32> to vector<6x256xf32>
    %150 = arith.addf %147, %149 : vector<6x256xf32>
    %c0_176 = arith.constant 0 : index
    %c0_177 = arith.constant 0 : index
    %c0_178 = arith.constant 0 : index
    %151 = vector.load %arg7[%c0_176, %c0_177, %c0_178] : memref<1x6x256xf32, #tpu.memory_space<vmem>>, vector<1x6x256xf32>
    %152 = vector.shape_cast %151 : vector<1x6x256xf32> to vector<6x256xf32>
    %153 = vector.shape_cast %150 : vector<6x256xf32> to vector<1x6x256xf32>
    tpu.vector_store %arg7[%c0_176, %c0_177, %c0_178], %153 {strides = array<i32>} : memref<1x6x256xf32, #tpu.memory_space<vmem>>, vector<1x6x256xf32>,
    return
  }
  func.func @transform_0(%arg0: i32) -> (i32, i32, i32) {
    %c0_i32 = arith.constant 0 : i32
    %c0_i32_0 = arith.constant 0 : i32
    %c0_i32_1 = arith.constant 0 : i32
    return %arg0, %c0_i32, %c0_i32_0 : i32, i32, i32
  }
  func.func @transform_1(%arg0: i32) -> (i32, i32, i32, i32) {
    %c0_i32 = arith.constant 0 : i32
    %c0_i32_0 = arith.constant 0 : i32
    %c0_i32_1 = arith.constant 0 : i32
    %c0_i32_2 = arith.constant 0 : i32
    return %arg0, %c0_i32, %c0_i32_0, %c0_i32_1 : i32, i32, i32, i32
  }
  func.func @transform_2(%arg0: i32) -> (i32, i32, i32, i32) {
    %c0_i32 = arith.constant 0 : i32
    %c0_i32_0 = arith.constant 0 : i32
    %c0_i32_1 = arith.constant 0 : i32
    %c0_i32_2 = arith.constant 0 : i32
    return %arg0, %c0_i32, %c0_i32_0, %c0_i32_1 : i32, i32, i32, i32
  }
  func.func @transform_3(%arg0: i32) -> (i32, i32, i32, i32) {
    %c0_i32 = arith.constant 0 : i32
    %c0_i32_0 = arith.constant 0 : i32
    %c0_i32_1 = arith.constant 0 : i32
    %c0_i32_2 = arith.constant 0 : i32
    return %arg0, %c0_i32, %c0_i32_0, %c0_i32_1 : i32, i32, i32, i32
  }
  func.func @transform_4(%arg0: i32) -> (i32, i32) {
    %c0_i32 = arith.constant 0 : i32
    %c0_i32_0 = arith.constant 0 : i32
    %c0_i32_1 = arith.constant 0 : i32
    return %c0_i32, %c0_i32_0 : i32, i32
  }
  func.func @transform_5(%arg0: i32) -> (i32, i32) {
    %c0_i32 = arith.constant 0 : i32
    %c0_i32_0 = arith.constant 0 : i32
    %c0_i32_1 = arith.constant 0 : i32
    return %c0_i32, %c0_i32_0 : i32, i32
  }
  func.func @transform_6(%arg0: i32) -> (i32, i32, i32) {
    %c0_i32 = arith.constant 0 : i32
    %c0_i32_0 = arith.constant 0 : i32
    %c0_i32_1 = arith.constant 0 : i32
    return %arg0, %c0_i32, %c0_i32_0 : i32, i32, i32
  }
}

</mosaic_0001>

<bundles_post_ra>
// kernel: tpu_custom_call.1
= control target key start
LH: loop header
LB: loop body
LE: loop exit
PB: predicated region body
PF: predicated region fallthrough
CT: control target
= control target key end

     0   :  { %11 = vsyncpa [#allocation7], 0  ;;  %s13207_s0 = inlined_call_operand.vmem [shape: f32[2,4,256], index: 0, kind: input, shape index: {}]   ;;  %s13208_s1 = inlined_call_operand.vmem [shape: f32[2,2,2,18], index: 1, kind: input, shape index: {}]   ;;  %s13209_s2 = inlined_call_operand.hbm [shape: f32[2,2,2,2], index: 2, kind: input, shape index: {}]   ;;  %s13210_s3 = inlined_call_operand.vmem [shape: f32[2,2,2,1], index: 3, kind: input, shape index: {}]   ;;  %s13211_s4 = inlined_call_operand.vmem [shape: f32[6,36], index: 4, kind: input, shape index: {}]   ;;  %s13212_s5 = inlined_call_operand.vmem [shape: f32[6,1], index: 5, kind: input, shape index: {}]   ;;  %s13213_s6 = inlined_call_operand.vmem [shape: f32[2,6,256], index: 6, kind: output, shape index: {}]  }
   0x1   :  { %13 = vsyncpa [#allocation7 + $0x1], 0  ;;  %s8169_s21 = smov 0   ;;  %s8171_s22 = smov 0  }
   0x2   :  { %s8173_s23 = smov 0   ;;  %s8175_s24 = smov 0  }
   0x3 LB: > { %s8188_s25 = sadd.s32 4294967295, %s8113_s24   ;;  %s8191_s26 = sadd.s32 1, %s8113_s24   ;;  %s8113_s24 = sphi %s8175_s24, %s14035_s24   ;;  %s8109_s23 = sphi %s8173_s23, %s14034_s23   ;;  %s8105_s22 = sphi %s8171_s22, %s14033_s22   ;;  %s8101_s21 = sphi %s8169_s21, %s14032_s21  }
   0x4   : > { %s75_s27 = ssub.s32 %s8113_s24, %s8191_s26  ;;  %s78_s28 = sadd.s32 1, %s8109_s23 }
   0x5   : > { %p76_p0 = scmp.eq.s32.totalorder %s75_s27, 0  ;;  %p85_p1 = scmp.ne.s32.totalorder %s8109_s23, %s8105_s22 }
   0x6   : > { %p86_p2 = scmp.eq.s32.totalorder %s8113_s24, 0  ;;  %p91_p3 = scmp.ne.s32.totalorder %s8105_s22, %s8101_s21 }
   0x7   : > { %s8201_s29 = scalar_select %p76_p0, %s8109_s23, %s78_s28  }
   0x8   : > { %p87_p4 = por %p86_p2, %p85_p1  ;;  %p92_p5 = scmp.eq.s32.totalorder %s8188_s25, 0 }
   0x9   : > { %p7987_p6 = scmp.lt.s32.totalorder %s8113_s24, 2  ;;  %s231_s7 = sand.u32 1, %s8109_s23  }
   0xa   : > { %p8205_p7 = por %p92_p5, %p91_p3  ;;  %s7923_s8 = sshll.u32 %s231_s7, 2 }
   0xb   : > { %s7960_s9 = sshll.u32 %s8113_s24, 6  ;;  %s235_s13 = scalar_lea.vmem [#allocation6], %s7923_s8 }
   0xc   : > { %s8214_s12 = scalar_lea.hbm %s13209_s2, %s7960_s9  ;;  %s242_s14 = sshll.u32 %s235_s13, 4  ;;  %s8216_s14 = int_to_ptr.vmem [resolvable:$true] %s242_s14 }
   0xd   : > { %p8218_p8 = pnand %p7987_p6, %p87_p4  ;;  %s8223_s16 = scalar_lea.sflag [#allocation7], %s231_s7 }
   0xe   : > { %s8049_s17 = scalar_lea.hbm %s8214_s12, 64  ;;  %s8054_s20 = scalar_lea.hbm %s13209_s2, 128 }
   0xf   : > { %p8050_p10 = scmp.ne.s32.totalorder %s8214_s12, %s8049_s17  ;;  %p8051_p11 = pneg %p8218_p8 }
  0x10   : > { %p8055_p0 = scmp.lt.u32.totalorder %s8214_s12, %s13209_s2  ;;  %p8056_p1 = scmp.lt.u32.totalorder %s8054_s20, %s8049_s17 }
  0x11   : > { %p8052_p12 = pnand %p8051_p11, %p8050_p10  ;;  %p8058_p3 = scmp.lt.u32.totalorder %s8049_s17, %s8214_s12 }
  0x12   : > { %p8057_p2 = por %p8056_p1, %p8055_p0 }
  0x13   : > { %p8053_p13 = pneg %p8052_p12 }
  0x14   : > { %p8059_p4 = por %p8058_p3, %p8057_p2 }
  0x16   : > { %p8060_p5 = pnand %p8059_p4, %p8053_p13 }
  0x18   : > { %8063 = shalt.err (!%p8060_p5)
}
  0x19   : > { %s8064_s28 = scalar_lea.vmem %s8216_s14, 64  ;;  %s8115_s7 = smov [#allocation6]  }
  0x1a   : > { %p8065_p6 = scmp.ne.s32.totalorder %s8216_s14, %s8064_s28  ;;  %s8069_s8 = sshll.u32 %s8115_s7, 4  ;;  %s8070_s8 = int_to_ptr.vmem [resolvable:$false] %s8069_s8 }
  0x1b   : > { %s8071_s9 = scalar_lea.vmem %s8070_s8, 128  ;;  %p8072_p9 = scmp.lt.s32.totalorder %s8216_s14, %s8070_s8 }
  0x1c   : > { %p8067_p10 = pnand %p8065_p6, %p8051_p11  ;;  %p8073_p0 = scmp.lt.s32.totalorder %s8071_s9, %s8064_s28 }
  0x1e   : > { %p8068_p12 = pneg %p8067_p10  ;;  %p8074_p1 = por %p8073_p0, %p8072_p9 }
  0x20   : > { %p8075_p2 = pnand %p8074_p1, %p8068_p12 }
  0x22   : > { %8078 = shalt.err (!%p8075_p2)
}
  0x23   : > { %s8116_s10 = smov 32   ;;  %s8117_s11 = smov 2  }
  0x24   : > { %7986 = dma.hbm_to_vmem [thread:$0]  (!%p8218_p8), %s8214_s12, 64, %s8216_s14, %s8223_s16, %s8116_s10, %s8116_s10, %s8117_s11  }
  0x25   : > { %p258_p11 = scmp.lt.s32.totalorder %s8113_s24, 3  ;;  %p13397_p13 = scmp.ge.s32.totalorder %s8113_s24, 1 }
  0x27   : > { %p259_p3 = pnand %p13397_p13, %p258_p11 }
  0x29   : > { %262 = sbr.rel (%p259_p3) target bundleno = 2782 (0xade), region = 44 }
  0x30   : > { %s264_s13 = sand.u32 1, %s8105_s22  }
  0x31   : > { %s8255_s17 = sshll.u32 %s264_s13, 2  ;;  %s265_s18 = scalar_lea.sflag [#allocation7], %s264_s13 }
  0x32   : > { %s268_s19 = scalar_lea.vmem [#allocation6], %s8255_s17 }
  0x33   : > { %8096 = dma.done.wait (%p8205_p7), %s265_s18, 64  }
  0x34   : > { %8098 = vsyncadd (%p8205_p7), %s265_s18, 4294967232  ;;  %p312_p8 = scmp.lt.s32.totalorder %s8188_s25, 1  ;;  %vm336_vm0 = vcmask 1043456   ;;  %v8118_v5 = vmov 839922192   ;;  %v348_v7 = vlaneseq  ;;  %s8119_s30 = smov 80  }
  0x35   : > { %v346_v6 = vunpack.c.l.s4 %v8118_v5  ;;  %s8120_s16 = smov 112   ;;  %s8121_s20 = smov 96   ;;  %v8126_v28 = vmov 1983009808   ;;  %v8127_v34 = vmov 1934713408  }
  0x36   : > { %s14037_s25 = smov (!%p312_p8, %s8188_s25), 1  ;;  %v8272_v9 = vshrl.u32 %v348_v7, 7  ;;  %s8122_s21 = smov 64   ;;  %v416_v29 = vunpack.c.l.s4 %v8126_v28  ;;  %v433_v35 = vunpack.c.l.s4 %v8127_v34  ;;  %vm646_vm1 = vcmask 7168  }
  0x37   : > { %s7961_s24 = sshll.u32 %s14037_s25, 3  ;;  %v347_v8 = vunpack.c.0.s8 %v346_v6  ;;  %s8123_s27 = smov 48   ;;  %vm655_vm2 = vcmask 138240   ;;  %vm680_vm3 = vcmask 1040384   ;;  %vm721_vm4 = vcmask 146432  }
  0x38   : > { %s316_s15 = scalar_lea.vmem %s13207_s0, %s7961_s24  ;;  %s8124_s28 = smov 32   ;;  %v417_v31 = vunpack.c.0.s8 %v416_v29  ;;  %v434_v45 = vunpack.c.0.s8 %v433_v35  ;;  %vm724_vm5 = vcmask 140288   ;;  %vm927_vm6 = vcmask 130048  }
  0x39   : > { %v332_v0 = vld [vmem:[%s316_s15] sm:$0xff]  ;;  %v350_v10 = vsub.s32 %v347_v8, %v8272_v9  ;;  %s8125_s7 = smov 16   ;;  %s8128_s8 = smov 127   ;;  %vm929_vm7 = vcmask 261120   ;;  %vm931_vm8 = vcmask 392192   ;;  %vm933_vm9 = vcmask 523264  }
  0x3a   : > { %v334_v1 = vcombine.high %v332_v0, %v332_v0  ;;  %v337_v2 = vsel %vm336_vm0, %v332_v0, 0.0  ;;  %v8285_v38 = vsub.s32 %v417_v31, %v8272_v9  ;;  %v8290_v57 = vsub.s32 %v434_v45, %v8272_v9  ;;  %s8129_s9 = smov 1   ;;  %s8130_s10 = smov 3  }
  0x3b   : > { %s8132_s11 = smov 126   ;;  %vm935_vm10 = vcmask 654336   ;;  %vm937_vm11 = vcmask 785408   ;;  %vm939_vm12 = vcmask 916480   ;;  %vm2756_vm13 = vcmask 1041408   ;;  %s7962_s13 = sshll.u32 %s14037_s25, 2 }
  0x3c   : > { %v338_v3 = vsel %vm336_vm0, %v334_v1, 0.0  ;;  %13398 = vst [vmem:[#allocation9_spill] sm:$0xff] %v8285_v38  ;;  %13399 = vst [vmem:[#allocation10_spill] sm:$0xff] %v8290_v57  ;;  %s11415_s12 = scalar_lea.vmem %s13208_s1, %s7962_s13  ;;  %s326_s18 = scalar_lea.vmem %s13210_s3, %s7962_s13  ;;  %vm2841_vm14 = vcmask 15360   ;;  %vm7734_vm15 = vcmask 293888  }
  0x3d   : > { %v339_v4 = vadd.f32 %v338_v3, %v337_v2 }
  0x3f   : > { %340 = vadd.xlane.f32.xlu0 %v339_v4 }
  0xcc   : > { %v341_v11 = vpop.xlane.xlu0 %340 }
  0xcd   : > { %v343_v12 = vmul.f32 0.00390625, %v341_v11 }
  0xcf   : > { %v351_v13 = vrot.slane %v343_v12, %v350_v10 }
  0xd1   : > { %v353_v14 = vsub.f32 %v332_v0, %v351_v13 }
  0xd3   : > { %v354_v15 = vmul.f32 %v353_v14, %v353_v14 }
  0xd5   : > { %v356_v16 = vcombine.high %v354_v15, %v354_v15  ;;  %v358_v17 = vsel %vm336_vm0, %v354_v15, 0.0  ;;  %v13214_v15 = vmov 0.0  }
  0xd6   : > { %2827 = vmatprep.mubr.f32.mxu0 %v13214_v15  ;;  %5234 = vmatprep.mubr.f32.mxu1 %v13214_v15 }
  0xd7   : > { %v359_v18 = vsel %vm336_vm0, %v356_v16, 0.0 }
  0xd8   : > { %v360_v19 = vadd.f32 %v359_v18, %v358_v17 }
  0xda   : > { %361 = vadd.xlane.f32.xlu0 %v360_v19 }
 0x167   : > { %v362_v20 = vpop.xlane.xlu0 %361 }
 0x168   : > { %v363_v21 = vmul.f32 0.00390625, %v362_v20 }
 0x16a   : > { %v364_v22 = vadd.f32 1e-05, %v363_v21 }
 0x16c   : > { %8047 = vrsqrt.f32 %v364_v22 }
 0x176   : > { %v8048_v23 = vpop.eup %8047 }
 0x177   : > { %v373_v24 = vrot.slane %v8048_v23, %v350_v10 }
 0x179   : > { %v375_v25 = vmul.f32 %v373_v24, %v353_v14 }
 0x17b   : > { %387 = vrot.lane.b32.xlu0 %v375_v25, %s8119_s30  ;;  %379 = vrot.lane.b32.xlu1 %v375_v25, %s8120_s16  ;;  %v377_v43 = vrot.slane %v375_v25, 4 }
 0x17f   : > { %383 = vrot.lane.b32.xlu1 %v375_v25, %s8121_s20 }
 0x183   : > { %391 = vrot.lane.b32.xlu1 %v375_v25, %s8122_s21 }
 0x187   : > { %395 = vrot.lane.b32.xlu1 %v375_v25, %s8123_s27 }
 0x18b   : > { %399 = vrot.lane.b32.xlu1 %v375_v25, %s8124_s28 }
 0x18f   : > { %403 = vrot.lane.b32.xlu1 %v375_v25, %s8125_s7 }
 0x1ed   : > { %v380_v26 = vpop.permute.xlu1 %379  ;;  %v388_v33 = vpop.permute.xlu0 %387 }
 0x1ee   : > { %v389_v39 = vrot.slane %v388_v33, 4  ;;  %v381_v40 = vrot.slane %v380_v26, 4  ;;  %v422_v41 = vcombine.low %v380_v26, %v388_v33 }
 0x1f0   : > { %v429_v50 = vrot.slane %v422_v41, %v8285_v38  ;;  %v490_v51 = vcombine.low %v381_v40, %v389_v39 }
 0x1f1   : > { %v384_v27 = vpop.permute.xlu1 %383 }
 0x1f2   : > { %v414_v36 = vcombine.low %v375_v25, %v384_v27  ;;  %v385_v37 = vrot.slane %v384_v27, 4  ;;  %v497_v63 = vrot.slane %v490_v51, %v8285_v38 }
 0x1f4   : > { %v421_v46 = vrot.slane %v414_v36, %v8285_v38  ;;  %v482_v47 = vcombine.low %v377_v43, %v385_v37 }
 0x1f5   : > { %v392_v30 = vpop.permute.xlu1 %391 }
 0x1f6   : > { %v393_v48 = vrot.slane %v392_v30, 4  ;;  %v430_v58 = vcombine.low %v421_v46, %v429_v50  ;;  %v489_v59 = vrot.slane %v482_v47, %v8285_v38  ;;  %v431_v14 = vcombine.high %v421_v46, %v429_v50 }
 0x1f8   : > { %v438_v3 = vrot.slane %v430_v58, %v8290_v57  ;;  %v498_v5 = vcombine.low %v489_v59, %v497_v63  ;;  %v445_v17 = vrot.slane %v431_v14, %v8290_v57  ;;  %v499_v20 = vcombine.high %v489_v59, %v497_v63 }
 0x1f9   : > { %v396_v32 = vpop.permute.xlu1 %395 }
 0x1fa   : > { %v397_v53 = vrot.slane %v396_v32, 4  ;;  %v506_v10 = vrot.slane %v498_v5, %v8290_v57  ;;  %v513_v23 = vrot.slane %v499_v20, %v8290_v57 }
 0x1fd   : > { %v400_v42 = vpop.permute.xlu1 %399 }
 0x1fe   : > { %v401_v44 = vrot.slane %v400_v42, 4  ;;  %v448_v49 = vcombine.low %v392_v30, %v400_v42 }
 0x200   : > { %v516_v54 = vcombine.low %v393_v48, %v401_v44  ;;  %v455_v60 = vrot.slane %v448_v49, %v8285_v38 }
 0x201   : > { %v404_v52 = vpop.permute.xlu1 %403 }
 0x202   : > { %v405_v55 = vrot.slane %v404_v52, 4  ;;  %v456_v56 = vcombine.low %v396_v32, %v404_v52  ;;  %v523_v0 = vrot.slane %v516_v54, %v8285_v38 }
 0x204   : > { %v463_v61 = vrot.slane %v456_v56, %v8285_v38  ;;  %v524_v62 = vcombine.low %v397_v53, %v405_v55 }
 0x206   : > { %v464_v1 = vcombine.low %v455_v60, %v463_v61  ;;  %v531_v2 = vrot.slane %v524_v62, %v8285_v38  ;;  %v465_v13 = vcombine.high %v455_v60, %v463_v61 }
 0x208   : > { %v472_v4 = vrot.slane %v464_v1, %v8290_v57  ;;  %v532_v6 = vcombine.low %v523_v0, %v531_v2  ;;  %v479_v16 = vrot.slane %v465_v13, %v8290_v57  ;;  %v533_v19 = vcombine.high %v523_v0, %v531_v2 }
 0x20a   : > { %v7936_v7 = vcombine.high %v438_v3, %v472_v4  ;;  %v566_v8 = vcombine.low %v438_v3, %v472_v4  ;;  %v540_v9 = vrot.slane %v532_v6, %v8290_v57  ;;  %v570_v18 = vcombine.low %v445_v17, %v479_v16 }
 0x20b   : > { %v7938_v21 = vcombine.high %v445_v17, %v479_v16  ;;  %v547_v22 = vrot.slane %v533_v19, %v8290_v57 }
 0x20c   : > { %578 = vrot.lane.b32.xlu0 %v7936_v7, %s8128_s8  ;;  %574 = vrot.lane.b32.xlu1 %v566_v8, %s8128_s8  ;;  %v567_v11 = vcombine.low %v506_v10, %v540_v9  ;;  %v7937_v12 = vcombine.high %v506_v10, %v540_v9 }
 0x20d   : > { %v571_v24 = vcombine.low %v513_v23, %v547_v22  ;;  %v7939_v25 = vcombine.high %v513_v23, %v547_v22 }
 0x210   : > { %598 = vrot.lane.b32.xlu0 %v566_v8, %s8129_s9  ;;  %576 = vrot.lane.b32.xlu1 %v567_v11, %s8128_s8 }
 0x214   : > { %602 = vrot.lane.b32.xlu0 %v7936_v7, %s8129_s9  ;;  %580 = vrot.lane.b32.xlu1 %v7937_v12, %s8128_s8 }
 0x218   : > { %622 = vrot.lane.b32.xlu0 %v566_v8, %s8130_s10  ;;  %600 = vrot.lane.b32.xlu1 %v567_v11, %s8129_s9 }
 0x21c   : > { %626 = vrot.lane.b32.xlu0 %v7936_v7, %s8130_s10  ;;  %604 = vrot.lane.b32.xlu1 %v7937_v12, %s8129_s9 }
 0x220   : > { %582 = vrot.lane.b32.xlu0 %v570_v18, %s8128_s8  ;;  %624 = vrot.lane.b32.xlu1 %v567_v11, %s8130_s10 }
 0x224   : > { %586 = vrot.lane.b32.xlu0 %v7938_v21, %s8128_s8  ;;  %628 = vrot.lane.b32.xlu1 %v7937_v12, %s8130_s10 }
 0x228   : > { %606 = vrot.lane.b32.xlu0 %v570_v18, %s8129_s9  ;;  %584 = vrot.lane.b32.xlu1 %v571_v24, %s8128_s8 }
 0x22c   : > { %610 = vrot.lane.b32.xlu0 %v7938_v21, %s8129_s9  ;;  %588 = vrot.lane.b32.xlu1 %v7939_v25, %s8128_s8 }
 0x230   : > { %630 = vrot.lane.b32.xlu0 %v570_v18, %s8130_s10  ;;  %608 = vrot.lane.b32.xlu1 %v571_v24, %s8129_s9 }
 0x234   : > { %634 = vrot.lane.b32.xlu0 %v7938_v21, %s8130_s10  ;;  %612 = vrot.lane.b32.xlu1 %v7939_v25, %s8129_s9 }
 0x238   : > { %632 = vrot.lane.b32.xlu1 %v571_v24, %s8130_s10 }
 0x23c   : > { %636 = vrot.lane.b32.xlu1 %v7939_v25, %s8130_s10 }
 0x27e   : > { %v579_v26 = vpop.permute.xlu0 %578  ;;  %v575_v27 = vpop.permute.xlu1 %574 }
 0x282   : > { %v599_v28 = vpop.permute.xlu0 %598  ;;  %v577_v29 = vpop.permute.xlu1 %576 }
 0x283   : > { %v647_v32 = vsel %vm646_vm1, %v575_v27, %v599_v28 }
 0x286   : > { %v603_v30 = vpop.permute.xlu0 %602  ;;  %v581_v31 = vpop.permute.xlu1 %580 }
 0x287   : > { %v649_v39 = vsel %vm646_vm1, %v579_v26, %v603_v30 }
 0x28a   : > { %v623_v33 = vpop.permute.xlu0 %622  ;;  %v601_v34 = vpop.permute.xlu1 %600 }
 0x28b   : > { %v656_v35 = vsel %vm655_vm2, %v647_v32, %v623_v33  ;;  %v648_v46 = vsel %vm646_vm1, %v577_v29, %v601_v34 }
 0x28c   : > { %v668_v36 = vrot.slane %v656_v35, 1  ;;  %v681_v37 = vrot.slane %v656_v35, 7 }
 0x28e   : > { %v713_v40 = vsel %vm680_vm3, %v668_v36, %v681_v37  ;;  %v627_v41 = vpop.permute.xlu0 %626  ;;  %v605_v42 = vpop.permute.xlu1 %604 }
 0x28f   : > { %722 = vst.msk [vmem:[#allocation2] sm:$0xff] %vm721_vm4, %v713_v40  ;;  %v658_v43 = vsel %vm655_vm2, %v649_v39, %v627_v41  ;;  %v650_v53 = vsel %vm646_vm1, %v581_v31, %v605_v42 }
 0x290   : > { %v669_v44 = vrot.slane %v658_v43, 1  ;;  %v684_v45 = vrot.slane %v658_v43, 7 }
 0x292   : > { %v714_v47 = vsel %vm680_vm3, %v669_v44, %v684_v45  ;;  %v583_v48 = vpop.permute.xlu0 %582  ;;  %v625_v49 = vpop.permute.xlu1 %624 }
 0x293   : > { %726 = vst.msk [vmem:[#allocation2 + $0x18] sm:$0xff] %vm721_vm4, %v714_v47  ;;  %v657_v50 = vsel %vm655_vm2, %v648_v46, %v625_v49 }
 0x294   : > { %v682_v51 = vrot.slane %v657_v50, 7  ;;  %v705_v52 = vrot.slane %v657_v50, 5 }
 0x296   : > { %v683_v54 = vsel %vm680_vm3, %v681_v37, %v682_v51  ;;  %v717_v55 = vsel %vm680_vm3, %v682_v51, %v705_v52  ;;  %v587_v56 = vpop.permute.xlu0 %586  ;;  %v629_v58 = vpop.permute.xlu1 %628  ;;  %v950_v59 = vld [vmem:[#allocation2] sm:$0xff] }
 0x297   : > { %723 = vst.msk [vmem:[#allocation2 + $0x8] sm:$0xff] %vm721_vm4, %v683_v54  ;;  %v659_v60 = vsel %vm655_vm2, %v650_v53, %v629_v58  ;;  %958 = vrot.lane.b32.xlu0 %v950_v59, %s8128_s8  ;;  %v8352_v4 = vrot.slane %v950_v59, %v8285_v38  ;;  %v739_v6 = vcombine.high %v950_v59, %v13214_v15 }
 0x298   : > { %725 = vst.msk [vmem:[#allocation2 + $0x10] sm:$0x3] %vm724_vm5, %v717_v55  ;;  %v685_v61 = vrot.slane %v659_v60, 7  ;;  %v706_v62 = vrot.slane %v659_v60, 5 }
 0x299   : > { %v8372_v13 = vrot.slane %v739_v6, %v8285_v38 }
 0x29a   : > { %v686_v63 = vsel %vm680_vm3, %v684_v45, %v685_v61  ;;  %v718_v0 = vsel %vm680_vm3, %v685_v61, %v706_v62  ;;  %v607_v1 = vpop.permute.xlu0 %606  ;;  %v585_v2 = vpop.permute.xlu1 %584  ;;  %v952_v3 = vld [vmem:[#allocation2 + $0x18] sm:$0xff] }
 0x29b   : > { %727 = vst.msk [vmem:[#allocation2 + $0x20] sm:$0xff] %vm721_vm4, %v686_v63  ;;  %1188 = vrot.lane.b32.xlu0 %v950_v59, %s8132_s11  ;;  %962 = vrot.lane.b32.xlu1 %v952_v3, %s8128_s8  ;;  %v8359_v5 = vrot.slane %v952_v3, %v8285_v38  ;;  %v754_v7 = vcombine.high %v952_v3, %v13214_v15 }
 0x29c   : > { %728 = vst.msk [vmem:[#allocation2 + $0x28] sm:$0x3] %vm724_vm5, %v718_v0  ;;  %v651_v17 = vsel %vm646_vm1, %v583_v48, %v607_v1 }
 0x29d   : > { %v770_v8 = vcombine.high %v8352_v4, %v8359_v5  ;;  %v769_v9 = vcombine.low %v8352_v4, %v8359_v5  ;;  %v8368_v10 = vrot.slane %v754_v7, %v8285_v38 }
 0x29e   : > { %v611_v11 = vpop.permute.xlu0 %610  ;;  %v589_v12 = vpop.permute.xlu1 %588  ;;  %v8410_v37 = vld [vmem:[#allocation2 + $0x1] sm:$0xff] }
 0x29f   : > { %1192 = vrot.lane.b32.xlu1 %v952_v3, %s8132_s11  ;;  %v8374_v14 = vld [vmem:[#allocation2 + $0x9] sm:$0xff]  ;;  %v785_v16 = vcombine.low %v8372_v13, %v8368_v10  ;;  %v786_v23 = vcombine.high %v8372_v13, %v8368_v10  ;;  %v653_v33 = vsel %vm646_vm1, %v587_v56, %v611_v11  ;;  %v8422_v45 = vrot.slane %v8410_v37, %v8285_v38 }
 0x2a0   : > { %v8379_v20 = vld [vmem:[#allocation2 + $0xa] sm:$0xff]  ;;  %v8390_v25 = vrot.slane %v8374_v14, %v8285_v38  ;;  %v1480_v54 = vcombine.high %v8374_v14, %v13214_v15 }
 0x2a1   : > { %v8402_v31 = vrot.slane %v8379_v20, %v8285_v38  ;;  %v951_v53 = vld [vmem:[#allocation2 + $0x8] sm:$0xff]  ;;  %v2148_v61 = vcombine.high %v8379_v20, %v13214_v15 }
 0x2a2   : > { %v631_v18 = vpop.permute.xlu0 %630  ;;  %v609_v19 = vpop.permute.xlu1 %608  ;;  %v8412_v39 = vld [vmem:[#allocation2 + $0x19] sm:$0xff]  ;;  %v8451_v6 = vrot.slane %v951_v53, %v8285_v38 }
 0x2a3   : > { %v8381_v21 = vld [vmem:[#allocation2 + $0x21] sm:$0xff]  ;;  %v660_v24 = vsel %vm655_vm2, %v651_v17, %v631_v18  ;;  %v8426_v46 = vrot.slane %v8412_v39, %v8285_v38  ;;  %v652_v47 = vsel %vm646_vm1, %v585_v2, %v609_v19 }
 0x2a4   : > { %v8383_v22 = vld [vmem:[#allocation2 + $0x22] sm:$0xff]  ;;  %v8394_v26 = vrot.slane %v8381_v21, %v8285_v38  ;;  %v670_v27 = vrot.slane %v660_v24, 1  ;;  %v687_v28 = vrot.slane %v660_v24, 7  ;;  %v1495_v51 = vcombine.high %v8381_v21, %v13214_v15  ;;  %v8582_v19 = vld [vmem:[#allocation2 + $0x1a] sm:$0xff] }
 0x2a5   : > { %v8406_v32 = vrot.slane %v8383_v22, %v8285_v38  ;;  %v953_v50 = vld [vmem:[#allocation2 + $0x20] sm:$0xff]  ;;  %v1445_v56 = vcombine.high %v8422_v45, %v8426_v46  ;;  %v2163_v62 = vcombine.high %v8383_v22, %v13214_v15 }
 0x2a6   : > { %v1511_v30 = vcombine.high %v8390_v25, %v8394_v26  ;;  %v715_v34 = vsel %vm680_vm3, %v670_v27, %v687_v28  ;;  %v635_v35 = vpop.permute.xlu0 %634  ;;  %v613_v36 = vpop.permute.xlu1 %612  ;;  %v8446_v63 = vrot.slane %v953_v50, %v8285_v38  ;;  %v8454_v7 = vrot.slane %v1495_v51, %v8285_v38 }
 0x2a7   : > { %729 = vst.msk [vmem:[#allocation2 + $0x30] sm:$0xff] %vm721_vm4, %v715_v34  ;;  %v662_v40 = vsel %vm655_vm2, %v653_v33, %v635_v35  ;;  %v2179_v44 = vcombine.high %v8402_v31, %v8406_v32  ;;  %v654_v60 = vsel %vm646_vm1, %v589_v12, %v613_v36  ;;  %v8461_v12 = vrot.slane %v1480_v54, %v8285_v38 }
 0x2a8   : > { %v671_v42 = vrot.slane %v662_v40, 1  ;;  %v690_v43 = vrot.slane %v662_v40, 7  ;;  %v836_v24 = vcombine.high %v8451_v6, %v8446_v63  ;;  %v8472_v35 = vrot.slane %v2148_v61, %v8285_v38 }
 0x2a9   : > { %v8475_v36 = vrot.slane %v2163_v62, %v8285_v38  ;;  %v2193_v5 = vrot.slane %v2179_v44, %v8290_v57 }
 0x2aa   : > { %v716_v48 = vsel %vm680_vm3, %v671_v42, %v690_v43  ;;  %v633_v49 = vpop.permute.xlu1 %632 }
 0x2ab   : > { %732 = vst.msk [vmem:[#allocation2 + $0x48] sm:$0xff] %vm721_vm4, %v716_v48  ;;  %v661_v52 = vsel %vm655_vm2, %v652_v47, %v633_v49 }
 0x2ac   : > { %v688_v58 = vrot.slane %v661_v52, 7  ;;  %v707_v59 = vrot.slane %v661_v52, 5 }
 0x2ae   : > { %v689_v0 = vsel %vm680_vm3, %v687_v28, %v688_v58  ;;  %v719_v1 = vsel %vm680_vm3, %v688_v58, %v707_v59  ;;  %v637_v2 = vpop.permute.xlu1 %636  ;;  %v3357_v3 = vld [vmem:[#allocation2 + $0x30] sm:$0xff] }
 0x2af   : > { %730 = vst.msk [vmem:[#allocation2 + $0x38] sm:$0xff] %vm721_vm4, %v689_v0  ;;  %v663_v11 = vsel %vm655_vm2, %v654_v60, %v637_v2  ;;  %3365 = vrot.lane.b32.xlu0 %v3357_v3, %s8128_s8  ;;  %v8482_v40 = vrot.slane %v3357_v3, %v8285_v38  ;;  %v3153_v47 = vcombine.high %v3357_v3, %v13214_v15 }
 0x2b0   : > { %731 = vst.msk [vmem:[#allocation2 + $0x40] sm:$0x3] %vm724_vm5, %v719_v1  ;;  %v691_v17 = vrot.slane %v663_v11, 7  ;;  %v708_v18 = vrot.slane %v663_v11, 5  ;;  %v820_v60 = vcombine.high %v953_v50, %v13214_v15  ;;  %v805_v0 = vcombine.high %v951_v53, %v13214_v15 }
 0x2b1   : > { %v8501_v54 = vrot.slane %v3153_v47, %v8285_v38 }
 0x2b2   : > { %v692_v28 = vsel %vm680_vm3, %v690_v43, %v691_v17  ;;  %v720_v33 = vsel %vm680_vm3, %v691_v17, %v708_v18  ;;  %v3359_v34 = vld [vmem:[#allocation2 + $0x48] sm:$0xff]  ;;  %v8515_v1 = vrot.slane %v820_v60, %v8285_v38  ;;  %v8524_v11 = vrot.slane %v805_v0, %v8285_v38 }
 0x2b3   : > { %733 = vst.msk [vmem:[#allocation2 + $0x50] sm:$0xff] %vm721_vm4, %v692_v28  ;;  %3595 = vrot.lane.b32.xlu0 %v3357_v3, %s8132_s11  ;;  %3369 = vrot.lane.b32.xlu1 %v3359_v34, %s8128_s8  ;;  %v3168_v42 = vcombine.high %v3359_v34, %v13214_v15  ;;  %v8486_v43 = vrot.slane %v3359_v34, %v8285_v38 }
 0x2b4   : > { %734 = vst.msk [vmem:[#allocation2 + $0x58] sm:$0x3] %vm724_vm5, %v720_v33  ;;  %v1414_v18 = vcombine.high %v8410_v37, %v13214_v15  ;;  %v1429_v28 = vcombine.high %v8412_v39, %v13214_v15  ;;  %v8564_v33 = vld [vmem:[#allocation2 + $0x2] sm:$0xff] }
 0x2b5   : > { %v3183_v49 = vcombine.low %v8482_v40, %v8486_v43  ;;  %v3184_v51 = vcombine.high %v8482_v40, %v8486_v43  ;;  %v8496_v52 = vrot.slane %v3168_v42, %v8285_v38 }
 0x2b6   : > { %v3358_v61 = vld [vmem:[#allocation2 + $0x38] sm:$0xff]  ;;  %v8555_v0 = vrot.slane %v1414_v18, %v8285_v38  ;;  %v8558_v17 = vrot.slane %v1429_v28, %v8285_v38 }
 0x2b7   : > { %3599 = vrot.lane.b32.xlu1 %v3359_v34, %s8132_s11  ;;  %960 = vrot.lane.b32.xlu0 %v951_v53, %s8128_s8  ;;  %v8518_v2 = vrot.slane %v3358_v61, %v8285_v38  ;;  %v8546_v47 = vld [vmem:[#allocation2 + $0x39] sm:$0xff]  ;;  %v3219_v18 = vcombine.high %v3358_v61, %v13214_v15  ;;  %v3198_v27 = vrot.slane %v3184_v51, %v8290_v57 }
 0x2b8   : > { %v3887_v34 = vcombine.high %v8546_v47, %v13214_v15  ;;  %v8781_v13 = vrot.slane %v3183_v49, %v8290_v57 }
 0x2b9   : > { %v8591_v41 = vrot.slane %v3219_v18, %v8285_v38  ;;  %v8668_v18 = vrot.slane %v8564_v33, %v8285_v38 }
 0x2ba   : > { %v3360_v62 = vld [vmem:[#allocation2 + $0x50] sm:$0xff]  ;;  %v8577_v55 = vrot.slane %v3887_v34, %v8285_v38  ;;  %13405 = vst [vmem:[#allocation16_spill] sm:$0xff] %v8781_v13 }
 0x2bb   : > { %1190 = vrot.lane.b32.xlu0 %v951_v53, %s8132_s11  ;;  %964 = vrot.lane.b32.xlu1 %v953_v50, %s8128_s8  ;;  %v8521_v3 = vrot.slane %v3360_v62, %v8285_v38  ;;  %v8548_v60 = vld [vmem:[#allocation2 + $0x51] sm:$0xff]  ;;  %v3234_v28 = vcombine.high %v3360_v62, %v13214_v15  ;;  %13400 = vst [vmem:[#allocation11_spill] sm:$0xff] %v8591_v41 }
 0x2bc   : > { %v3902_v42 = vcombine.high %v8548_v60, %v13214_v15  ;;  %v8727_v51 = vrot.slane %v8548_v60, %v8285_v38 }
 0x2bd   : > { %v8594_v34 = vrot.slane %v3234_v28, %v8285_v38  ;;  %v784_v28 = vrot.slane %v770_v8, %v8290_v57  ;;  %v8690_v8 = vrot.slane %v769_v9, %v8290_v57  ;;  %v8717_v9 = vrot.slane %v785_v16, %v8290_v57 }
 0x2be   : > { %v8580_v48 = vrot.slane %v3902_v42, %v8285_v38  ;;  %v8741_v16 = vrot.slane %v8546_v47, %v8285_v38 }
 0x2bf   : > { %1858 = vrot.lane.b32.xlu0 %v8374_v14, %s8132_s11  ;;  %1194 = vrot.lane.b32.xlu1 %v953_v50, %s8132_s11  ;;  %13401 = vst [vmem:[#allocation12_spill] sm:$0xff] %v8594_v34  ;;  %13402 = vst [vmem:[#allocation13_spill] sm:$0xff] %v8690_v8  ;;  %v8701_v50 = vrot.slane %v1511_v30, %v8290_v57  ;;  %v802_v4 = vcombine.high %v784_v28, %v13214_v15 }
 0x2c0   : > { %v8723_v30 = vrot.slane %v1445_v56, %v8290_v57 }
 0x2c3   : > { %2302 = vrot.lane.b32.xlu0 %v8379_v20, %s8128_s8  ;;  %1862 = vrot.lane.b32.xlu1 %v8381_v21, %s8132_s11 }
 0x2c7   : > { %1856 = vrot.lane.b32.xlu0 %v8410_v37, %s8132_s11  ;;  %2306 = vrot.lane.b32.xlu1 %v8383_v22, %s8128_s8 }
 0x2cb   : > { %2300 = vrot.lane.b32.xlu0 %v8564_v33, %s8128_s8  ;;  %1860 = vrot.lane.b32.xlu1 %v8412_v39, %s8132_s11 }
 0x2cf   : > { %1634 = vrot.lane.b32.xlu0 %v8374_v14, %s8128_s8  ;;  %2304 = vrot.lane.b32.xlu1 %v8582_v19, %s8128_s8 }
 0x2d3   : > { %1632 = vrot.lane.b32.xlu0 %v8410_v37, %s8128_s8  ;;  %1638 = vrot.lane.b32.xlu1 %v8381_v21, %s8128_s8  ;;  %v8618_v21 = vld [vmem:[#allocation2 + $0x3a] sm:$0xff]  ;;  %v8636_v37 = vld [vmem:[#allocation2 + $0x32] sm:$0xff] }
 0x2d4   : > { %v8745_v56 = vrot.slane %v8636_v37, %v8285_v38  ;;  %v8775_v10 = vrot.slane %v8618_v21, %v8285_v38 }
 0x2d7   : > { %2532 = vrot.lane.b32.xlu0 %v8379_v20, %s8132_s11  ;;  %1636 = vrot.lane.b32.xlu1 %v8412_v39, %s8128_s8  ;;  %v8624_v20 = vld [vmem:[#allocation2 + $0x52] sm:$0xff]  ;;  %v8638_v39 = vld [vmem:[#allocation2 + $0x49] sm:$0xff] }
 0x2d8   : > { %v8765_v29 = vrot.slane %v8624_v20, %v8285_v38 }
 0x2da   : > { %v4586_v58 = vcombine.high %v8775_v10, %v8765_v29 }
 0x2db   : > { %2536 = vrot.lane.b32.xlu1 %v8383_v22, %s8132_s11  ;;  %3367 = vrot.lane.b32.xlu0 %v3358_v61, %s8128_s8  ;;  %v8630_v22 = vld [vmem:[#allocation2 + $0x31] sm:$0xff] }
 0x2dc   : > { %v8803_v40 = vrot.slane %v8630_v22, %v8285_v38 }
 0x2df   : > { %3597 = vrot.lane.b32.xlu0 %v3358_v61, %s8132_s11  ;;  %3371 = vrot.lane.b32.xlu1 %v3360_v62, %s8128_s8  ;;  %v8644_v61 = vld [vmem:[#allocation2 + $0x4a] sm:$0xff] }
 0x2e0   : > { %v8731_v44 = vrot.slane %v8644_v61, %v8285_v38 }
 0x2e3   : > { %4265 = vrot.lane.b32.xlu0 %v8546_v47, %s8132_s11  ;;  %3601 = vrot.lane.b32.xlu1 %v3360_v62, %s8132_s11  ;;  %v8660_v62 = vrot.slane %v8582_v19, %v8285_v38 }
 0x2e5   : > { %v2113_v14 = vcombine.high %v8668_v18, %v8660_v62 }
 0x2e7   : > { %4709 = vrot.lane.b32.xlu0 %v8618_v21, %s8128_s8  ;;  %4269 = vrot.lane.b32.xlu1 %v8548_v60, %s8132_s11  ;;  %v8680_v42 = vrot.slane %v2113_v14, %v8290_v57  ;;  %v801_v14 = vcombine.high %v8690_v8, %v13214_v15  ;;  %v8795_v15 = vrot.slane %v8638_v39, %v8285_v38 }
 0x2eb   : > { %2530 = vrot.lane.b32.xlu0 %v8564_v33, %s8132_s11  ;;  %4713 = vrot.lane.b32.xlu1 %v8624_v20, %s8128_s8 }
 0x2ef   : > { %4263 = vrot.lane.b32.xlu0 %v8630_v22, %s8132_s11  ;;  %2534 = vrot.lane.b32.xlu1 %v8582_v19, %s8132_s11 }
 0x2f3   : > { %4707 = vrot.lane.b32.xlu0 %v8636_v37, %s8128_s8  ;;  %4267 = vrot.lane.b32.xlu1 %v8638_v39, %s8132_s11 }
 0x2f7   : > { %4041 = vrot.lane.b32.xlu0 %v8546_v47, %s8128_s8  ;;  %4711 = vrot.lane.b32.xlu1 %v8644_v61, %s8128_s8  ;;  %v3918_v47 = vcombine.high %v8741_v16, %v8727_v51 }
 0x2fb   : > { %4039 = vrot.lane.b32.xlu0 %v8630_v22, %s8128_s8  ;;  %4045 = vrot.lane.b32.xlu1 %v8548_v60, %s8128_s8  ;;  %v8751_v60 = vrot.slane %v786_v23, %v8290_v57 }
 0x2ff   : > { %4939 = vrot.lane.b32.xlu0 %v8618_v21, %s8132_s11  ;;  %4043 = vrot.lane.b32.xlu1 %v8638_v39, %s8128_s8 }
 0x303   : > { %4937 = vrot.lane.b32.xlu0 %v8636_v37, %s8132_s11  ;;  %4943 = vrot.lane.b32.xlu1 %v8624_v20, %s8132_s11 }
 0x307   : > { %876 = vrot.lane.b32.xlu0 %v784_v28, %s8124_s28  ;;  %4941 = vrot.lane.b32.xlu1 %v8644_v61, %s8132_s11 }
 0x309   : > { %v8733_v28 = vpop.permute.xlu0 %958 }
 0x30a   : > { %13403 = vst [vmem:[#allocation14_spill] sm:$0xff] %v8733_v28 }
 0x30b   : > { %2219 = vrot.lane.b32.xlu0 %v8680_v42, %s8124_s28  ;;  %3290 = vrot.lane.b32.xlu1 %v3198_v27, %s8124_s28 }
 0x30d   : > { %v8767_v59 = vpop.permute.xlu1 %962  ;;  %v8783_v23 = vpop.permute.xlu0 %1188 }
 0x30e   : > { %13404 = vst [vmem:[#allocation15_spill] sm:$0xff] %v8767_v59  ;;  %13406 = vst [vmem:[#allocation17_spill] sm:$0xff] %v8783_v23  ;;  %v3852_v23 = vcombine.high %v8803_v40, %v8795_v15 }
 0x30f   : > { %872 = vrot.lane.b32.xlu0 %v801_v14, %s8125_s7  ;;  %1579 = vrot.lane.b32.xlu1 %v8701_v50, %s8124_s28  ;;  %v8757_v14 = vrot.slane %v836_v24, %v8290_v57  ;;  %v8786_v24 = vrot.slane %v3918_v47, %v8290_v57  ;;  %v8810_v47 = vrot.slane %v4586_v58, %v8290_v57 }
 0x310   : > { %v8825_v58 = vrot.slane %v3852_v23, %v8290_v57  ;;  %v13416_v23 = vcombine.high %v8518_v2, %v8521_v3 }
 0x311   : > { %v8805_v43 = vpop.permute.xlu1 %1192 }
 0x312   : > { %13407 = vst [vmem:[#allocation18_spill] sm:$0xff] %v8805_v43 }
 0x313   : > { %880 = vrot.lane.b32.xlu0 %v802_v4, %s8123_s27  ;;  %2247 = vrot.lane.b32.xlu1 %v2193_v5, %s8124_s28  ;;  %v4520_v4 = vcombine.high %v8745_v56, %v8731_v44 }
 0x315   : > { %v8789_v53 = vrot.slane %v4520_v4, %v8290_v57  ;;  %v13409_v4 = vmov 0.0  }
 0x316   : > { %v3215_v8 = vcombine.high %v8781_v13, %v13409_v4  ;;  %v3216_v28 = vcombine.high %v3198_v27, %v13409_v4  ;;  %v13414_v27 = vcombine.low %v8501_v54, %v8496_v52 }
 0x317   : > { %884 = vrot.lane.b32.xlu0 %v8717_v9, %s8122_s21  ;;  %1551 = vrot.lane.b32.xlu1 %v8723_v30, %s8124_s28 }
 0x31b   : > { %892 = vrot.lane.b32.xlu0 %v8751_v60, %s8121_s20  ;;  %904 = vrot.lane.b32.xlu1 %v8757_v14, %s8124_s28 }
 0x31f   : > { %3986 = vrot.lane.b32.xlu0 %v8786_v24, %s8124_s28  ;;  %4626 = vrot.lane.b32.xlu1 %v8789_v53, %s8124_s28 }
 0x321   : > { %v8807_v49 = vpop.permute.xlu0 %3365 }
 0x322   : > { %13408 = vst [vmem:[#allocation19_spill] sm:$0xff] %v8807_v49 }
 0x323   : > { %4654 = vrot.lane.b32.xlu0 %v8810_v47, %s8124_s28  ;;  %3286 = vrot.lane.b32.xlu1 %v3215_v8, %s8125_s7  ;;  %v8838_v8 = vrot.slane %v13414_v27, %v8290_v57  ;;  %v13419_v27 = vcombine.high %v8501_v54, %v8496_v52 }
 0x325   : > { %v8820_v59 = vpop.permute.xlu0 %3595  ;;  %v8822_v43 = vpop.permute.xlu1 %3369  ;;  %13415 = vst [vmem:[#allocation24_spill] sm:$0xff] %v8838_v8  ;;  %v8859_v34 = vrot.slane %v13419_v27, %v8290_v57 }
 0x326   : > { %13410 = vst [vmem:[#allocation20_spill] sm:$0xff] %v8820_v59  ;;  %13411 = vst [vmem:[#allocation21_spill] sm:$0xff] %v8822_v43  ;;  %v8844_v59 = vrot.slane %v13416_v23, %v8290_v57  ;;  %v13420_v23 = vcombine.low %v8390_v25, %v8394_v26  ;;  %v13424_v26 = vcombine.low %v8461_v12, %v8454_v7 }
 0x327   : > { %3958 = vrot.lane.b32.xlu0 %v8825_v58, %s8124_s28  ;;  %3294 = vrot.lane.b32.xlu1 %v3216_v28, %s8123_s27  ;;  %v2211_v28 = vcombine.high %v2193_v5, %v13409_v4 }
 0x328   : > { %v8888_v27 = vrot.slane %v13424_v26, %v8290_v57  ;;  %v2112_v26 = vcombine.low %v8668_v18, %v8660_v62  ;;  %v13430_v62 = vcombine.low %v8422_v45, %v8426_v46  ;;  %v868_v45 = vcombine.high %v8757_v14, %v13409_v4 }
 0x329   : > { %v8830_v13 = vpop.permute.xlu0 %960  ;;  %v8832_v49 = vpop.permute.xlu1 %3599 }
 0x32a   : > { %13412 = vst [vmem:[#allocation22_spill] sm:$0xff] %v8830_v13  ;;  %13413 = vst [vmem:[#allocation23_spill] sm:$0xff] %v8832_v49  ;;  %v8869_v41 = vrot.slane %v8830_v13, %v8285_v38  ;;  %v8929_v18 = vrot.slane %v13430_v62, %v8290_v57 }
 0x32b   : > { %3298 = vrot.lane.b32.xlu1 %v8838_v8, %s8122_s21  ;;  %3318 = vrot.lane.b32.xlu0 %v8844_v59, %s8124_s28  ;;  %v8865_v8 = vrot.slane %v13420_v23, %v8290_v57 }
 0x32c   : > { %13431 = vst [vmem:[#allocation33_spill] sm:$0xff] %v8929_v18 }
 0x32d   : > { %v8851_v49 = vpop.permute.xlu0 %1190  ;;  %v8853_v43 = vpop.permute.xlu1 %964  ;;  %13421 = vst [vmem:[#allocation27_spill] sm:$0xff] %v8865_v8  ;;  %v1542_v23 = vcombine.high %v8865_v8, %v13409_v4 }
 0x32e   : > { %13417 = vst [vmem:[#allocation25_spill] sm:$0xff] %v8851_v49  ;;  %13418 = vst [vmem:[#allocation26_spill] sm:$0xff] %v8853_v43  ;;  %v8873_v5 = vrot.slane %v8853_v43, %v8285_v38  ;;  %v8900_v52 = vrot.slane %v8851_v49, %v8285_v38  ;;  %v13429_v49 = vcombine.low %v8472_v35, %v8475_v36 }
 0x32f   : > { %2251 = vrot.lane.b32.xlu1 %v2211_v28, %s8123_s27  ;;  %3306 = vrot.lane.b32.xlu0 %v8859_v34, %s8121_s20  ;;  %v13425_v28 = vcombine.low %v8402_v31, %v8406_v32 }
 0x331   : > { %v8880_v54 = vpop.permute.xlu0 %1858  ;;  %v8882_v25 = vpop.permute.xlu1 %1194  ;;  %v8896_v13 = vrot.slane %v13425_v28, %v8290_v57 }
 0x332   : > { %13422 = vst [vmem:[#allocation28_spill] sm:$0xff] %v8880_v54  ;;  %13423 = vst [vmem:[#allocation29_spill] sm:$0xff] %v8882_v25  ;;  %v8904_v43 = vrot.slane %v8882_v25, %v8285_v38  ;;  %v8921_v25 = vrot.slane %v13429_v49, %v8290_v57 }
 0x333   : > { %13426 = vst [vmem:[#allocation30_spill] sm:$0xff] %v8896_v13  ;;  %1587 = vrot.lane.b32.xlu1 %v8888_v27, %s8122_s21  ;;  %1575 = vrot.lane.b32.xlu0 %v1542_v23, %s8125_s7  ;;  %v2210_v8 = vcombine.high %v8896_v13, %v13409_v4  ;;  %v8933_v23 = vrot.slane %v8880_v54, %v8285_v38 }
 0x334   : > { %v1476_v54 = vcombine.high %v8929_v18, %v13409_v4 }
 0x335   : > { %v8913_v32 = vpop.permute.xlu0 %2302  ;;  %v8915_v28 = vpop.permute.xlu1 %1862 }
 0x336   : > { %13427 = vst [vmem:[#allocation31_spill] sm:$0xff] %v8913_v32  ;;  %13428 = vst [vmem:[#allocation32_spill] sm:$0xff] %v8915_v28  ;;  %v8937_v31 = vrot.slane %v8915_v28, %v8285_v38  ;;  %v8953_v28 = vrot.slane %v2112_v26, %v8290_v57  ;;  %v8957_v13 = vrot.slane %v8913_v32, %v8285_v38 }
 0x337   : > { %2255 = vrot.lane.b32.xlu1 %v8921_v25, %s8122_s21  ;;  %2243 = vrot.lane.b32.xlu0 %v2210_v8, %s8125_s7  ;;  %v13438_v26 = vcombine.low %v8524_v11, %v8515_v1 }
 0x338   : > { %13434 = vst [vmem:[#allocation36_spill] sm:$0xff] %v8953_v28  ;;  %13435 = vst [vmem:[#allocation37_spill] sm:$0xff] %v8957_v13 }
 0x339   : > { %v8946_v46 = vpop.permute.xlu0 %1856  ;;  %v8948_v62 = vpop.permute.xlu1 %2306  ;;  %v8975_v32 = vrot.slane %v13438_v26, %v8290_v57 }
 0x33a   : > { %13432 = vst [vmem:[#allocation34_spill] sm:$0xff] %v8946_v46  ;;  %13433 = vst [vmem:[#allocation35_spill] sm:$0xff] %v8948_v62  ;;  %v8961_v8 = vrot.slane %v8948_v62, %v8285_v38  ;;  %v2144_v62 = vcombine.high %v8953_v28, %v13409_v4  ;;  %v8987_v14 = vrot.slane %v8946_v46, %v8285_v38 }
 0x33b   : > { %908 = vrot.lane.b32.xlu1 %v868_v45, %s8123_s27  ;;  %1547 = vrot.lane.b32.xlu0 %v1476_v54, %s8125_s7  ;;  %v13439_v54 = vcombine.low %v8451_v6, %v8446_v63  ;;  %v13445_v6 = vcombine.high %v8461_v12, %v8454_v7  ;;  %v1543_v7 = vcombine.high %v8701_v50, %v13409_v4 }
 0x33c   : > { %13441 = vst [vmem:[#allocation41_spill] sm:$0xff] %v8987_v14  ;;  %v3917_v12 = vcombine.low %v8741_v16, %v8727_v51  ;;  %v2097_v51 = vcombine.high %v8582_v19, %v13409_v4  ;;  %v4585_v16 = vcombine.low %v8775_v10, %v8765_v29  ;;  %v2145_v29 = vcombine.high %v8680_v42, %v13409_v4 }
 0x33d   : > { %v8967_v49 = vpop.permute.xlu0 %2300  ;;  %v8969_v18 = vpop.permute.xlu1 %1860  ;;  %v8983_v45 = vrot.slane %v13439_v54, %v8290_v57  ;;  %v9006_v54 = vrot.slane %v13445_v6, %v8290_v57 }
 0x33e   : > { %13436 = vst [vmem:[#allocation38_spill] sm:$0xff] %v8967_v49  ;;  %13437 = vst [vmem:[#allocation39_spill] sm:$0xff] %v8969_v18  ;;  %v8991_v13 = vrot.slane %v8969_v18, %v8285_v38  ;;  %v9012_v18 = vrot.slane %v8967_v49, %v8285_v38  ;;  %v9067_v19 = vrot.slane %v3917_v12, %v8290_v57 }
 0x33f   : > { %13440 = vst [vmem:[#allocation40_spill] sm:$0xff] %v8983_v45  ;;  %912 = vrot.lane.b32.xlu1 %v8975_v32, %s8122_s21  ;;  %2215 = vrot.lane.b32.xlu0 %v2144_v62, %s8125_s7  ;;  %v867_v46 = vcombine.high %v8983_v45, %v13409_v4 }
 0x340   : > { %13442 = vst [vmem:[#allocation42_spill] sm:$0xff] %v8991_v13  ;;  %13450 = vst [vmem:[#allocation47_spill] sm:$0xff] %v9067_v19 }
 0x341   : > { %v8998_v28 = vpop.permute.xlu0 %1634  ;;  %v9000_v63 = vpop.permute.xlu1 %2304 }
 0x342   : > { %13443 = vst [vmem:[#allocation43_spill] sm:$0xff] %v8998_v28  ;;  %13444 = vst [vmem:[#allocation44_spill] sm:$0xff] %v9000_v63  ;;  %v9016_v62 = vrot.slane %v9000_v63, %v8285_v38  ;;  %v13447_v63 = vcombine.high %v8472_v35, %v8475_v36  ;;  %v1477_v36 = vcombine.high %v8723_v30, %v13409_v4 }
 0x343   : > { %1595 = vrot.lane.b32.xlu1 %v9006_v54, %s8121_s20  ;;  %900 = vrot.lane.b32.xlu0 %v867_v46, %s8125_s7  ;;  %v9039_v46 = vrot.slane %v8998_v28, %v8285_v38  ;;  %v2082_v35 = vcombine.high %v8564_v33, %v13409_v4  ;;  %v2111_v33 = vrot.slane %v2097_v51, %v8285_v38 }
 0x344   : > { %v9035_v45 = vrot.slane %v13447_v63, %v8290_v57  ;;  %v3851_v51 = vcombine.low %v8803_v40, %v8795_v15  ;;  %v804_v40 = vcombine.high %v8751_v60, %v13409_v4 }
 0x345   : > { %v9027_v26 = vpop.permute.xlu0 %1632  ;;  %v9029_v49 = vpop.permute.xlu1 %1638  ;;  %v2096_v42 = vrot.slane %v2082_v35, %v8285_v38 }
 0x346   : > { %13446 = vst [vmem:[#allocation45_spill] sm:$0xff] %v9029_v49  ;;  %v9043_v50 = vrot.slane %v9029_v49, %v8285_v38 }
 0x347   : > { %2263 = vrot.lane.b32.xlu1 %v9035_v45, %s8121_s20  ;;  %1583 = vrot.lane.b32.xlu0 %v1543_v7, %s8123_s27  ;;  %v13449_v7 = vcombine.high %v8524_v11, %v8515_v1  ;;  %v3949_v1 = vcombine.high %v9067_v19, %v13409_v4  ;;  %v9083_v11 = vrot.slane %v4585_v16, %v8290_v57 }
 0x348   : > { %v2128_v35 = vcombine.low %v2096_v42, %v2111_v33 }
 0x349   : > { %v9056_v63 = vpop.permute.xlu0 %2532  ;;  %v9058_v6 = vpop.permute.xlu1 %1636  ;;  %v9064_v28 = vrot.slane %v13449_v7, %v8290_v57  ;;  %13453 = vst [vmem:[#allocation50_spill] sm:$0xff] %v9083_v11 }
 0x34a   : > { %13448 = vst [vmem:[#allocation46_spill] sm:$0xff] %v9056_v63  ;;  %v9088_v12 = vrot.slane %v9056_v63, %v8285_v38  ;;  %v4617_v63 = vcombine.high %v9083_v11, %v13409_v4  ;;  %v13465_v11 = vcombine.high %v8555_v0, %v8558_v17 }
 0x34b   : > { %920 = vrot.lane.b32.xlu1 %v9064_v28, %s8121_s20  ;;  %1555 = vrot.lane.b32.xlu0 %v1477_v36, %s8123_s27 }
 0x34d   : > { %v9076_v30 = vpop.permute.xlu0 %3367  ;;  %v9078_v10 = vpop.permute.xlu1 %2536 }
 0x34e   : > { %13451 = vst [vmem:[#allocation48_spill] sm:$0xff] %v9076_v30  ;;  %13452 = vst [vmem:[#allocation49_spill] sm:$0xff] %v9078_v10  ;;  %v9092_v36 = vrot.slane %v9078_v10, %v8285_v38  ;;  %v9115_v16 = vrot.slane %v9076_v30, %v8285_v38 }
 0x34f   : > { %3982 = vrot.lane.b32.xlu1 %v3949_v1, %s8125_s7  ;;  %2223 = vrot.lane.b32.xlu0 %v2145_v29, %s8123_s27  ;;  %v13456_v1 = vcombine.low %v8555_v0, %v8558_v17 }
 0x350   : > { %13457 = vst [vmem:[#allocation53_spill] sm:$0xff] %v9115_v16 }
 0x351   : > { %v9101_v7 = vpop.permute.xlu0 %3597  ;;  %v9103_v19 = vpop.permute.xlu1 %3371  ;;  %v9111_v29 = vrot.slane %v13456_v1, %v8290_v57  ;;  %v4519_v1 = vcombine.low %v8745_v56, %v8731_v44 }
 0x352   : > { %13454 = vst [vmem:[#allocation51_spill] sm:$0xff] %v9101_v7  ;;  %13455 = vst [vmem:[#allocation52_spill] sm:$0xff] %v9103_v19  ;;  %v9119_v15 = vrot.slane %v9103_v19, %v8285_v38  ;;  %v9135_v19 = vrot.slane %v2128_v35, %v8290_v57  ;;  %v9142_v49 = vrot.slane %v9101_v7, %v8285_v38 }
 0x353   : > { %4650 = vrot.lane.b32.xlu1 %v4617_v63, %s8125_s7  ;;  %1559 = vrot.lane.b32.xlu0 %v9111_v29, %s8122_s21  ;;  %v9138_v63 = vrot.slane %v3851_v51, %v8290_v57  ;;  %v9163_v7 = vrot.slane %v13465_v11, %v8290_v57 }
 0x354   : > { %13461 = vst [vmem:[#allocation57_spill] sm:$0xff] %v9142_v49 }
 0x355   : > { %v9130_v30 = vpop.permute.xlu0 %4265  ;;  %v9132_v10 = vpop.permute.xlu1 %3601  ;;  %13460 = vst [vmem:[#allocation56_spill] sm:$0xff] %v9138_v63  ;;  %v3883_v35 = vcombine.high %v9138_v63, %v13409_v4 }
 0x356   : > { %13458 = vst [vmem:[#allocation54_spill] sm:$0xff] %v9130_v30  ;;  %13459 = vst [vmem:[#allocation55_spill] sm:$0xff] %v9132_v10  ;;  %v9146_v44 = vrot.slane %v9132_v10, %v8285_v38  ;;  %v2129_v10 = vcombine.high %v2096_v42, %v2111_v33  ;;  %v9170_v56 = vrot.slane %v9130_v30, %v8285_v38 }
 0x357   : > { %896 = vrot.lane.b32.xlu1 %v804_v40, %s8120_s16  ;;  %2227 = vrot.lane.b32.xlu0 %v9135_v19, %s8122_s21  ;;  %v9166_v40 = vrot.slane %v4519_v1, %v8290_v57  ;;  %v13471_v1 = vcombine.low %v8518_v2, %v8521_v3  ;;  %v803_v2 = vcombine.high %v8717_v9, %v13409_v4 }
 0x358   : > { %13462 = vst [vmem:[#allocation58_spill] sm:$0xff] %v9146_v44  ;;  %13467 = vst [vmem:[#allocation62_spill] sm:$0xff] %v9170_v56  ;;  %v9188_v42 = vrot.slane %v2129_v10, %v8290_v57  ;;  %v4570_v3 = vcombine.high %v8624_v20, %v13409_v4  ;;  %v3836_v20 = vcombine.high %v8638_v39, %v13409_v4 }
 0x359   : > { %v9153_v60 = vpop.permute.xlu0 %4709  ;;  %v9155_v51 = vpop.permute.xlu1 %4269  ;;  %13466 = vst [vmem:[#allocation61_spill] sm:$0xff] %v9166_v40  ;;  %v4551_v33 = vcombine.high %v9166_v40, %v13409_v4  ;;  %v3950_v10 = vcombine.high %v8786_v24, %v13409_v4  ;;  %v3821_v24 = vcombine.high %v8630_v22, %v13409_v4  ;;  %v13485_v22 = vcombine.low %v8577_v55, %v8580_v48 }
 0x35a   : > { %13463 = vst [vmem:[#allocation59_spill] sm:$0xff] %v9153_v60  ;;  %13464 = vst [vmem:[#allocation60_spill] sm:$0xff] %v9155_v51  ;;  %v9174_v49 = vrot.slane %v9155_v51, %v8285_v38  ;;  %v9198_v63 = vrot.slane %v9153_v60, %v8285_v38 }
 0x35b   : > { %3954 = vrot.lane.b32.xlu1 %v3883_v35, %s8125_s7  ;;  %1567 = vrot.lane.b32.xlu0 %v9163_v7, %s8121_s20  ;;  %v9194_v35 = vrot.slane %v13471_v1, %v8290_v57 }
 0x35c   : > { %13468 = vst [vmem:[#allocation63_spill] sm:$0xff] %v9174_v49  ;;  %13473 = vst [vmem:[#allocation67_spill] sm:$0xff] %v9198_v63 }
 0x35d   : > { %v9181_v0 = vpop.permute.xlu0 %2530  ;;  %v9183_v11 = vpop.permute.xlu1 %4713  ;;  %13472 = vst [vmem:[#allocation66_spill] sm:$0xff] %v9194_v35  ;;  %v3281_v60 = vcombine.high %v9194_v35, %v13409_v4 }
 0x35e   : > { %13469 = vst [vmem:[#allocation64_spill] sm:$0xff] %v9181_v0  ;;  %13470 = vst [vmem:[#allocation65_spill] sm:$0xff] %v9183_v11  ;;  %v9202_v17 = vrot.slane %v9183_v11, %v8285_v38  ;;  %v9223_v11 = vrot.slane %v9181_v0, %v8285_v38 }
 0x35f   : > { %4622 = vrot.lane.b32.xlu1 %v4551_v33, %s8125_s7  ;;  %2235 = vrot.lane.b32.xlu0 %v9188_v42, %s8121_s20  ;;  %v4555_v33 = vcombine.high %v8618_v21, %v13409_v4  ;;  %v4618_v21 = vcombine.high %v8810_v47, %v13409_v4 }
 0x360   : > { %13474 = vst [vmem:[#allocation68_spill] sm:$0xff] %v9202_v17  ;;  %13477 = vst [vmem:[#allocation71_spill] sm:$0xff] %v9223_v11 }
 0x361   : > { %v9213_v1 = vpop.permute.xlu0 %4263  ;;  %v9215_v40 = vpop.permute.xlu1 %2534  ;;  %v4569_v47 = vrot.slane %v4555_v33, %v8285_v38 }
 0x362   : > { %13475 = vst [vmem:[#allocation69_spill] sm:$0xff] %v9213_v1  ;;  %13476 = vst [vmem:[#allocation70_spill] sm:$0xff] %v9215_v40  ;;  %v9227_v9 = vrot.slane %v9215_v40, %v8285_v38 }
 0x363   : > { %888 = vrot.lane.b32.xlu0 %v803_v2, %s8119_s30  ;;  %3314 = vrot.lane.b32.xlu1 %v3281_v60, %s8125_s7  ;;  %v9244_v2 = vrot.slane %v4570_v3, %v8285_v38  ;;  %v9248_v60 = vrot.slane %v9213_v1, %v8285_v38  ;;  %v4504_v3 = vcombine.high %v8644_v61, %v13409_v4 }
 0x364   : > { %13478 = vst [vmem:[#allocation72_spill] sm:$0xff] %v9227_v9  ;;  %v3884_v1 = vcombine.high %v8825_v58, %v13409_v4  ;;  %v3850_v61 = vrot.slane %v3836_v20, %v8285_v38  ;;  %v4552_v20 = vcombine.high %v8789_v53, %v13409_v4 }
 0x365   : > { %v9239_v30 = vpop.permute.xlu0 %4707  ;;  %v9241_v51 = vpop.permute.xlu1 %4267  ;;  %13481 = vst [vmem:[#allocation75_spill] sm:$0xff] %v9248_v60  ;;  %v4601_v33 = vcombine.low %v4569_v47, %v9244_v2  ;;  %v4518_v17 = vrot.slane %v4504_v3, %v8285_v38  ;;  %v3282_v3 = vcombine.high %v8844_v59, %v13409_v4 }
 0x366   : > { %13479 = vst [vmem:[#allocation73_spill] sm:$0xff] %v9239_v30  ;;  %13480 = vst [vmem:[#allocation74_spill] sm:$0xff] %v9241_v51  ;;  %v9252_v39 = vrot.slane %v9241_v51, %v8285_v38  ;;  %v9281_v58 = vrot.slane %v9239_v30, %v8285_v38 }
 0x367   : > { %4658 = vrot.lane.b32.xlu0 %v4618_v21, %s8123_s27  ;;  %3990 = vrot.lane.b32.xlu1 %v3950_v10, %s8123_s27  ;;  %v9273_v10 = vrot.slane %v13485_v22, %v8290_v57  ;;  %v4489_v21 = vcombine.high %v8636_v37, %v13409_v4  ;;  %v3835_v22 = vrot.slane %v3821_v24, %v8285_v38 }
 0x368   : > { %13482 = vst [vmem:[#allocation76_spill] sm:$0xff] %v9252_v39 }
 0x369   : > { %v9265_v51 = vpop.permute.xlu0 %4041  ;;  %v9267_v0 = vpop.permute.xlu1 %4711  ;;  %v3867_v63 = vcombine.low %v3835_v22, %v3850_v61  ;;  %v4503_v24 = vrot.slane %v4489_v21, %v8285_v38 }
 0x36a   : > { %13483 = vst [vmem:[#allocation77_spill] sm:$0xff] %v9265_v51  ;;  %13484 = vst [vmem:[#allocation78_spill] sm:$0xff] %v9267_v0  ;;  %v9285_v35 = vrot.slane %v9267_v0, %v8285_v38  ;;  %v9300_v0 = vrot.slane %v4601_v33, %v8290_v57  ;;  %v13496_v33 = vld [vmem:[#allocation11_spill] sm:$0xff] }
 0x36b   : > { %3994 = vrot.lane.b32.xlu0 %v9273_v10, %s8122_s21  ;;  %3962 = vrot.lane.b32.xlu1 %v3884_v1, %s8123_s27  ;;  %v9305_v1 = vrot.slane %v9265_v51, %v8285_v38  ;;  %v4535_v56 = vcombine.low %v4503_v24, %v4518_v17 }
 0x36d   : > { %v9295_v40 = vpop.permute.xlu0 %4039  ;;  %v9297_v30 = vpop.permute.xlu1 %4045  ;;  %13488 = vst [vmem:[#allocation81_spill] sm:$0xff] %v9305_v1 }
 0x36e   : > { %13486 = vst [vmem:[#allocation79_spill] sm:$0xff] %v9295_v40  ;;  %13487 = vst [vmem:[#allocation80_spill] sm:$0xff] %v9297_v30  ;;  %v9309_v53 = vrot.slane %v9297_v30, %v8285_v38  ;;  %v9324_v30 = vrot.slane %v3867_v63, %v8290_v57  ;;  %v9328_v49 = vrot.slane %v9295_v40, %v8285_v38  ;;  %v13497_v40 = vld [vmem:[#allocation12_spill] sm:$0xff] }
 0x36f   : > { %4662 = vrot.lane.b32.xlu0 %v9300_v0, %s8122_s21  ;;  %4630 = vrot.lane.b32.xlu1 %v4552_v20, %s8123_s27  ;;  %v13498_v1 = vcombine.low %v13496_v33, %v13497_v40 }
 0x370   : > { %13489 = vst [vmem:[#allocation82_spill] sm:$0xff] %v9309_v53  ;;  %13492 = vst [vmem:[#allocation85_spill] sm:$0xff] %v9328_v49  ;;  %v4602_v49 = vcombine.high %v4569_v47, %v9244_v2 }
 0x371   : > { %v9319_v37 = vpop.permute.xlu0 %4939  ;;  %v9321_v51 = vpop.permute.xlu1 %4043  ;;  %v9347_v53 = vrot.slane %v13498_v1, %v8290_v57 }
 0x372   : > { %13490 = vst [vmem:[#allocation83_spill] sm:$0xff] %v9319_v37  ;;  %13491 = vst [vmem:[#allocation84_spill] sm:$0xff] %v9321_v51  ;;  %v9332_v21 = vrot.slane %v9321_v51, %v8285_v38  ;;  %v9350_v51 = vrot.slane %v4535_v56, %v8290_v57  ;;  %v9354_v44 = vrot.slane %v9319_v37, %v8285_v38 }
 0x373   : > { %3322 = vrot.lane.b32.xlu0 %v3282_v3, %s8123_s27  ;;  %3966 = vrot.lane.b32.xlu1 %v9324_v30, %s8122_s21  ;;  %v3868_v3 = vcombine.high %v3835_v22, %v3850_v61  ;;  %v13502_v22 = vcombine.high %v8577_v55, %v8580_v48  ;;  %v4616_v2 = vrot.slane %v4602_v49, %v8290_v57 }
 0x374   : > { %13493 = vst [vmem:[#allocation86_spill] sm:$0xff] %v9332_v21  ;;  %13499 = vst [vmem:[#allocation11_spill] sm:$0xff] %v9354_v44  ;;  %v4536_v21 = vcombine.high %v4503_v24, %v4518_v17 }
 0x375   : > { %v9339_v20 = vpop.permute.xlu0 %4937  ;;  %v9341_v63 = vpop.permute.xlu1 %4943  ;;  %v9374_v37 = vrot.slane %v13502_v22, %v8290_v57  ;;  %v13508_v22 = vld [vmem:[#allocation24_spill] sm:$0xff] }
 0x376   : > { %13494 = vst [vmem:[#allocation87_spill] sm:$0xff] %v9339_v20  ;;  %13495 = vst [vmem:[#allocation88_spill] sm:$0xff] %v9341_v63  ;;  %v9358_v59 = vrot.slane %v9341_v63, %v8285_v38  ;;  %v9377_v63 = vrot.slane %v3868_v3, %v8290_v57  ;;  %v9382_v16 = vrot.slane %v9339_v20, %v8285_v38 }
 0x377   : > { %3326 = vrot.lane.b32.xlu0 %v9347_v53, %s8122_s21  ;;  %4634 = vrot.lane.b32.xlu1 %v9350_v51, %s8122_s21  ;;  %v9400_v47 = vrot.slane %v4536_v21, %v8290_v57  ;;  %v3217_v55 = vcombine.high %v13508_v22, %v13409_v4  ;;  %v3218_v21 = vcombine.high %v8859_v34, %v13409_v4 }
 0x378   : > { %13500 = vst [vmem:[#allocation12_spill] sm:$0xff] %v9358_v59  ;;  %13503 = vst [vmem:[#allocation90_spill] sm:$0xff] %v9382_v16  ;;  %v1478_v22 = vcombine.high %v9111_v29, %v13409_v4  ;;  %v1544_v34 = vcombine.high %v8888_v27, %v13409_v4 }
 0x379   : > { %v9366_v56 = vpop.permute.xlu0 %876  ;;  %v9368_v61 = vpop.permute.xlu1 %4941 }
 0x37a   : > { %13501 = vst [vmem:[#allocation89_spill] sm:$0xff] %v9368_v61  ;;  %v9386_v1 = vrot.slane %v9368_v61, %v8285_v38 }
 0x37b   : > { %4002 = vrot.lane.b32.xlu0 %v9374_v37, %s8121_s20  ;;  %3974 = vrot.lane.b32.xlu1 %v9377_v63, %s8121_s20 }
 0x37c   : > { %13504 = vst [vmem:[#allocation91_spill] sm:$0xff] %v9386_v1 }
 0x37d   : > { %v9394_v48 = vpop.permute.xlu0 %2219  ;;  %v9396_v17 = vpop.permute.xlu1 %3290 }
 0x37e   : > { %13505 = vst [vmem:[#allocation92_spill] sm:$0xff] %v9394_v48  ;;  %13506 = vst [vmem:[#allocation93_spill] sm:$0xff] %v9396_v17  ;;  %v13509_v17 = vcombine.high %v13496_v33, %v13497_v40  ;;  %v1067_v48 = vcombine.high %v8869_v41, %v8873_v5 }
 0x37f   : > { %4670 = vrot.lane.b32.xlu0 %v4616_v2, %s8121_s20  ;;  %4642 = vrot.lane.b32.xlu1 %v9400_v47, %s8121_s20 }
 0x380   : > { %v9415_v49 = vrot.slane %v13509_v17, %v8290_v57 }
 0x381   : > { %v9405_v24 = vpop.permute.xlu0 %872  ;;  %v9407_v3 = vpop.permute.xlu1 %1579 }
 0x382   : > { %13507 = vst [vmem:[#allocation94_spill] sm:$0xff] %v9407_v3 }
 0x383   : > { %3302 = vrot.lane.b32.xlu0 %v3217_v55, %s8119_s30  ;;  %3334 = vrot.lane.b32.xlu1 %v9415_v49, %s8121_s20  ;;  %v2146_v55 = vcombine.high %v9135_v19, %v13409_v4 }
 0x385   : > { %v9422_v20 = vpop.permute.xlu0 %880  ;;  %v9424_v61 = vpop.permute.xlu1 %2247 }
 0x386   : > { %13510 = vst [vmem:[#allocation24_spill] sm:$0xff] %v9424_v61 }
 0x387   : > { %1563 = vrot.lane.b32.xlu0 %v1478_v22, %s8119_s30  ;;  %3310 = vrot.lane.b32.xlu1 %v3218_v21, %s8120_s16  ;;  %v1479_v21 = vcombine.high %v9163_v7, %v13409_v4  ;;  %v2212_v22 = vcombine.high %v8921_v25, %v13409_v4 }
 0x389   : > { %v9430_v40 = vpop.permute.xlu0 %884  ;;  %v9432_v33 = vpop.permute.xlu1 %1551 }
 0x38a   : > { %13511 = vst [vmem:[#allocation95_spill] sm:$0xff] %v9432_v33 }
 0x38b   : > { %2231 = vrot.lane.b32.xlu0 %v2146_v55, %s8119_s30  ;;  %1591 = vrot.lane.b32.xlu1 %v1544_v34, %s8119_s30  ;;  %v2147_v55 = vcombine.high %v9188_v42, %v13409_v4  ;;  %v869_v34 = vcombine.high %v8975_v32, %v13409_v4 }
 0x38d   : > { %v9440_v17 = vpop.permute.xlu0 %892  ;;  %v9442_v29 = vpop.permute.xlu1 %904 }
 0x38e   : > { %13512 = vst [vmem:[#allocation96_spill] sm:$0xff] %v9442_v29 }
 0x38f   : > { %1571 = vrot.lane.b32.xlu0 %v1479_v21, %s8120_s16  ;;  %2259 = vrot.lane.b32.xlu1 %v2212_v22, %s8119_s30  ;;  %v3951_v21 = vcombine.high %v9273_v10, %v13409_v4  ;;  %v1545_v22 = vcombine.high %v9006_v54, %v13409_v4 }
 0x391   : > { %v9450_v19 = vpop.permute.xlu0 %3986  ;;  %v9452_v27 = vpop.permute.xlu1 %4626 }
 0x392   : > { %13513 = vst [vmem:[#allocation97_spill] sm:$0xff] %v9450_v19  ;;  %13514 = vst [vmem:[#allocation98_spill] sm:$0xff] %v9452_v27  ;;  %v4553_v27 = vcombine.high %v9350_v51, %v13409_v4 }
 0x393   : > { %2239 = vrot.lane.b32.xlu0 %v2147_v55, %s8120_s16  ;;  %916 = vrot.lane.b32.xlu1 %v869_v34, %s8119_s30  ;;  %v4619_v55 = vcombine.high %v9300_v0, %v13409_v4  ;;  %v2213_v34 = vcombine.high %v9035_v45, %v13409_v4 }
 0x395   : > { %v9460_v7 = vpop.permute.xlu0 %4654  ;;  %v9462_v25 = vpop.permute.xlu1 %3286 }
 0x396   : > { %13515 = vst [vmem:[#allocation99_spill] sm:$0xff] %v9460_v7  ;;  %13516 = vst [vmem:[#allocation100_spill] sm:$0xff] %v9462_v25  ;;  %v4620_v7 = vcombine.high %v4616_v2, %v13409_v4 }
 0x397   : > { %3998 = vrot.lane.b32.xlu0 %v3951_v21, %s8119_s30  ;;  %1599 = vrot.lane.b32.xlu1 %v1545_v22, %s8120_s16  ;;  %v3283_v21 = vcombine.high %v9347_v53, %v13409_v4  ;;  %v870_v22 = vcombine.high %v9064_v28, %v13409_v4  ;;  %v13523_v28 = vld [vmem:[#allocation15_spill] sm:$0xff] }
 0x398   : > { %v992_v53 = vrot.slane %v13523_v28, %v8285_v38 }
 0x399   : > { %v9470_v42 = vpop.permute.xlu0 %3958  ;;  %v9472_v32 = vpop.permute.xlu1 %3294 }
 0x39a   : > { %13517 = vst [vmem:[#allocation101_spill] sm:$0xff] %v9470_v42  ;;  %13518 = vst [vmem:[#allocation102_spill] sm:$0xff] %v9472_v32  ;;  %v4554_v42 = vcombine.high %v9400_v47, %v13409_v4 }
 0x39b   : > { %4666 = vrot.lane.b32.xlu0 %v4619_v55, %s8119_s30  ;;  %2267 = vrot.lane.b32.xlu1 %v2213_v34, %s8120_s16  ;;  %v3952_v55 = vcombine.high %v9374_v37, %v13409_v4  ;;  %v3885_v34 = vcombine.high %v9324_v30, %v13409_v4  ;;  %v13526_v37 = vld [vmem:[#allocation14_spill] sm:$0xff]  ;;  %v3886_v30 = vcombine.high %v9377_v63, %v13409_v4  ;;  %v13532_v63 = vld [vmem:[#allocation19_spill] sm:$0xff] }
 0x39c   : > { %v3384_v25 = vrot.slane %v13532_v63, %v8285_v38 }
 0x39d   : > { %v9480_v10 = vpop.permute.xlu0 %3318  ;;  %v9482_v54 = vpop.permute.xlu1 %3298 }
 0x39e   : > { %13519 = vst [vmem:[#allocation103_spill] sm:$0xff] %v9480_v10  ;;  %13520 = vst [vmem:[#allocation104_spill] sm:$0xff] %v9482_v54  ;;  %v977_v10 = vrot.slane %v13526_v37, %v8285_v38 }
 0x39f   : > { %3330 = vrot.lane.b32.xlu0 %v3283_v21, %s8119_s30  ;;  %924 = vrot.lane.b32.xlu1 %v870_v22, %s8120_s16 }
 0x3a0   : > { %v1000_v47 = vcombine.low %v977_v10, %v992_v53 }
 0x3a1   : > { %v9490_v0 = vpop.permute.xlu0 %3306  ;;  %v9492_v45 = vpop.permute.xlu1 %2251 }
 0x3a2   : > { %13521 = vst [vmem:[#allocation105_spill] sm:$0xff] %v9490_v0  ;;  %13522 = vst [vmem:[#allocation106_spill] sm:$0xff] %v9492_v45  ;;  %v13528_v0 = vld [vmem:[#allocation21_spill] sm:$0xff] }
 0x3a3   : > { %4006 = vrot.lane.b32.xlu0 %v3952_v55, %s8120_s16  ;;  %3970 = vrot.lane.b32.xlu1 %v3885_v34, %s8119_s30  ;;  %v1001_v55 = vcombine.high %v977_v10, %v992_v53  ;;  %v13527_v34 = vld [vmem:[#allocation18_spill] sm:$0xff]  ;;  %v9519_v2 = vrot.slane %v13528_v0, %v8285_v38  ;;  %v1297_v53 = vcombine.high %v8900_v52, %v8904_v43 }
 0x3a4   : > { %v1222_v19 = vrot.slane %v13527_v34, %v8285_v38 }
 0x3a5   : > { %v9502_v21 = vpop.permute.xlu0 %1575  ;;  %v9504_v22 = vpop.permute.xlu1 %1587  ;;  %v3408_v45 = vcombine.high %v3384_v25, %v9519_v2  ;;  %v1015_v3 = vrot.slane %v1001_v55, %v8290_v57 }
 0x3a6   : > { %13524 = vst [vmem:[#allocation15_spill] sm:$0xff] %v9502_v21  ;;  %13525 = vst [vmem:[#allocation107_spill] sm:$0xff] %v9504_v22 }
 0x3a7   : > { %4674 = vrot.lane.b32.xlu0 %v4620_v7, %s8120_s16  ;;  %4638 = vrot.lane.b32.xlu1 %v4553_v27, %s8119_s30  ;;  %v3284_v7 = vcombine.high %v9415_v49, %v13409_v4  ;;  %v13531_v27 = vld [vmem:[#allocation17_spill] sm:$0xff] }
 0x3a8   : > { %v1207_v32 = vrot.slane %v13531_v27, %v8285_v38 }
 0x3a9   : > { %v9521_v54 = vpop.permute.xlu0 %2243  ;;  %v9523_v51 = vpop.permute.xlu1 %2255 }
 0x3aa   : > { %13529 = vst [vmem:[#allocation14_spill] sm:$0xff] %v9521_v54  ;;  %13530 = vst [vmem:[#allocation18_spill] sm:$0xff] %v9523_v51  ;;  %v1231_v29 = vcombine.high %v1207_v32, %v1222_v19  ;;  %v13533_v51 = vld [vmem:[#allocation23_spill] sm:$0xff]  ;;  %v1230_v10 = vcombine.low %v1207_v32, %v1222_v19  ;;  %v1965_v32 = vcombine.high %v8933_v23, %v8937_v31 }
 0x3ab   : > { %3978 = vrot.lane.b32.xlu0 %v3886_v30, %s8120_s16  ;;  %3338 = vrot.lane.b32.xlu1 %v3284_v7, %s8120_s16  ;;  %v9538_v22 = vrot.slane %v13533_v51, %v8285_v38  ;;  %v13535_v30 = vld [vmem:[#allocation20_spill] sm:$0xff] }
 0x3ac   : > { %v3614_v54 = vrot.slane %v13535_v30, %v8285_v38  ;;  %v9560_v55 = vrot.slane %v1231_v29, %v8290_v57  ;;  %v9586_v19 = vrot.slane %v1230_v10, %v8290_v57  ;;  %v13546_v10 = vld [vmem:[#allocation37_spill] sm:$0xff] }
 0x3ad   : > { %v9540_v49 = vpop.permute.xlu0 %1547  ;;  %v9542_v61 = vpop.permute.xlu1 %908 }
 0x3ae   : > { %13534 = vst [vmem:[#allocation21_spill] sm:$0xff] %v9542_v61  ;;  %v3638_v7 = vcombine.high %v3614_v54, %v9538_v22  ;;  %v9557_v61 = vrot.slane %v3408_v45, %v8290_v57  ;;  %13542 = vst [vmem:[#allocation110_spill] sm:$0xff] %v9586_v19 }
 0x3af   : > { %4646 = vrot.lane.b32.xlu0 %v4554_v42, %s8120_s16  ;;  %1107 = vrot.lane.b32.xlu1 %v1015_v3, %s8124_s28  ;;  %v9567_v42 = vrot.slane %v1000_v47, %v8290_v57 }
 0x3b0   : > { %v9576_v29 = vrot.slane %v3638_v7, %v8290_v57  ;;  %v9597_v7 = vrot.slane %v1297_v53, %v8290_v57  ;;  %v9613_v53 = vrot.slane %v1965_v32, %v8290_v57 }
 0x3b1   : > { %v9552_v21 = vpop.permute.xlu0 %2215  ;;  %v9554_v33 = vpop.permute.xlu1 %912  ;;  %13538 = vst [vmem:[#allocation23_spill] sm:$0xff] %v9567_v42 }
 0x3b2   : > { %13536 = vst [vmem:[#allocation17_spill] sm:$0xff] %v9552_v21  ;;  %13537 = vst [vmem:[#allocation19_spill] sm:$0xff] %v9554_v33  ;;  %v9579_v21 = vrot.slane %v1067_v48, %v8290_v57  ;;  %v1032_v48 = vcombine.high %v9567_v42, %v13409_v4  ;;  %v1262_v42 = vcombine.high %v9586_v19, %v13409_v4 }
 0x3b3   : > { %3514 = vrot.lane.b32.xlu0 %v9557_v61, %s8124_s28  ;;  %1337 = vrot.lane.b32.xlu1 %v9560_v55, %s8124_s28  ;;  %13545 = vst [vmem:[#allocation113_spill] sm:$0xff] %v9597_v7 }
 0x3b4   : > { %13541 = vst [vmem:[#allocation109_spill] sm:$0xff] %v9579_v21 }
 0x3b5   : > { %v9571_v33 = vpop.permute.xlu0 %900  ;;  %v9573_v45 = vpop.permute.xlu1 %1595 }
 0x3b6   : > { %13539 = vst [vmem:[#allocation20_spill] sm:$0xff] %v9571_v33  ;;  %13540 = vst [vmem:[#allocation108_spill] sm:$0xff] %v9573_v45  ;;  %v1899_v33 = vcombine.high %v8987_v14, %v8991_v13  ;;  %v1741_v13 = vcombine.high %v9039_v46, %v9043_v50 }
 0x3b7   : > { %3744 = vrot.lane.b32.xlu0 %v9576_v29, %s8124_s28  ;;  %1135 = vrot.lane.b32.xlu1 %v9579_v21, %s8124_s28  ;;  %v2409_v21 = vcombine.high %v13546_v10, %v8961_v8 }
 0x3b8   : > { %v9628_v32 = vrot.slane %v1899_v33, %v8290_v57 }
 0x3b9   : > { %v9590_v47 = vpop.permute.xlu0 %1583  ;;  %v9592_v45 = vpop.permute.xlu1 %2263 }
 0x3ba   : > { %13543 = vst [vmem:[#allocation111_spill] sm:$0xff] %v9590_v47  ;;  %13544 = vst [vmem:[#allocation112_spill] sm:$0xff] %v9592_v45 }
 0x3bb   : > { %1103 = vrot.lane.b32.xlu0 %v1032_v48, %s8125_s7  ;;  %1365 = vrot.lane.b32.xlu1 %v9597_v7, %s8124_s28  ;;  %v3407_v48 = vcombine.low %v3384_v25, %v9519_v2  ;;  %v2343_v7 = vcombine.high %v9012_v18, %v9016_v62  ;;  %13549 = vst [vmem:[#allocation115_spill] sm:$0xff] %v9628_v32 }
 0x3bc   : > { %v985_v25 = vcombine.high %v13523_v28, %v13409_v4 }
 0x3bd   : > { %v9606_v47 = vpop.permute.xlu0 %1555  ;;  %v9608_v45 = vpop.permute.xlu1 %920  ;;  %v9640_v2 = vrot.slane %v3407_v48, %v8290_v57 }
 0x3be   : > { %13547 = vst [vmem:[#allocation37_spill] sm:$0xff] %v9608_v45  ;;  %v9662_v28 = vrot.slane %v985_v25, %v8285_v38 }
 0x3bf   : > { %1333 = vrot.lane.b32.xlu0 %v1262_v42, %s8125_s7  ;;  %2033 = vrot.lane.b32.xlu1 %v9613_v53, %s8124_s28  ;;  %v9631_v42 = vrot.slane %v2409_v21, %v8290_v57  ;;  %13551 = vst [vmem:[#allocation117_spill] sm:$0xff] %v9640_v2  ;;  %v9648_v21 = vrot.slane %v2343_v7, %v8290_v57 }
 0x3c0   : > { %v3439_v48 = vcombine.high %v9640_v2, %v13409_v4 }
 0x3c1   : > { %v9623_v45 = vpop.permute.xlu0 %2223  ;;  %v9625_v14 = vpop.permute.xlu1 %3982  ;;  %13550 = vst [vmem:[#allocation116_spill] sm:$0xff] %v9631_v42 }
 0x3c2   : > { %13548 = vst [vmem:[#allocation114_spill] sm:$0xff] %v9625_v14  ;;  %v3637_v14 = vcombine.low %v3614_v54, %v9538_v22  ;;  %v1215_v54 = vcombine.high %v13527_v34, %v13409_v4 }
 0x3c3   : > { %2005 = vrot.lane.b32.xlu0 %v9628_v32, %s8124_s28  ;;  %2477 = vrot.lane.b32.xlu1 %v9631_v42, %s8124_s28  ;;  %v9651_v32 = vrot.slane %v1741_v13, %v8290_v57  ;;  %v970_v42 = vcombine.high %v13526_v37, %v13409_v4  ;;  %v1033_v37 = vcombine.high %v1015_v3, %v13409_v4 }
 0x3c4   : > { %v9665_v22 = vrot.slane %v3637_v14, %v8290_v57  ;;  %v9678_v14 = vrot.slane %v1215_v54, %v8285_v38  ;;  %v2573_v3 = vcombine.high %v9223_v11, %v9227_v9  ;;  %v9716_v11 = vrot.slane %v9027_v26, %v8285_v38 }
 0x3c5   : > { %v9643_v19 = vpop.permute.xlu0 %1559  ;;  %v9645_v33 = vpop.permute.xlu1 %4650  ;;  %13553 = vst [vmem:[#allocation119_spill] sm:$0xff] %v9651_v32 }
 0x3c6   : > { %13552 = vst [vmem:[#allocation118_spill] sm:$0xff] %v9645_v33  ;;  %13554 = vst [vmem:[#allocation120_spill] sm:$0xff] %v9665_v22  ;;  %v1200_v33 = vcombine.high %v13531_v27, %v13409_v4  ;;  %v1263_v27 = vcombine.high %v9560_v55, %v13409_v4  ;;  %v4306_v55 = vcombine.high %v9248_v60, %v9252_v39 }
 0x3c7   : > { %2449 = vrot.lane.b32.xlu0 %v9648_v21, %s8124_s28  ;;  %1809 = vrot.lane.b32.xlu1 %v9651_v32, %s8124_s28  ;;  %v984_v32 = vrot.slane %v970_v42, %v8285_v38  ;;  %v3669_v42 = vcombine.high %v9665_v22, %v13409_v4  ;;  %v9712_v22 = vrot.slane %v2573_v3, %v8290_v57 }
 0x3c8   : > { %v9738_v39 = vrot.slane %v4306_v55, %v8290_v57 }
 0x3c9   : > { %v9667_v13 = vpop.permute.xlu0 %2227  ;;  %v897_v7 = vpop.permute.xlu1 %896  ;;  %v1016_v34 = vcombine.low %v984_v32, %v9662_v28  ;;  %13558 = vst [vmem:[#allocation122_spill] sm:$0xff] %v9712_v22 }
 0x3ca   : > { %13560 = vst [vmem:[#allocation124_spill] sm:$0xff] %v9738_v39 }
 0x3cb   : > { %1111 = vrot.lane.b32.xlu0 %v1033_v37, %s8123_s27  ;;  %3510 = vrot.lane.b32.xlu1 %v3439_v48, %s8125_s7  ;;  %v1214_v37 = vrot.slane %v1200_v33, %v8285_v38  ;;  %v9697_v48 = vrot.slane %v9058_v6, %v8285_v38 }
 0x3cd   : > { %v9683_v25 = vpop.permute.xlu0 %1567  ;;  %v9685_v2 = vpop.permute.xlu1 %3954  ;;  %v1246_v54 = vcombine.low %v1214_v37, %v9678_v14 }
 0x3ce   : > { %13555 = vst [vmem:[#allocation121_spill] sm:$0xff] %v9685_v2  ;;  %v13556_v2 = vld [vmem:[#allocation13_spill] sm:$0xff] }
 0x3cf   : > { %1341 = vrot.lane.b32.xlu0 %v1263_v27, %s8123_s27  ;;  %3740 = vrot.lane.b32.xlu1 %v3669_v42, %s8125_s7  ;;  %v928_v9 = vsel %vm927_vm6, %v13556_v2, %v9405_v24  ;;  %v9709_v42 = vrot.slane %v1016_v34, %v8290_v57  ;;  %v1675_v2 = vcombine.high %v9716_v11, %v9697_v48 }
 0x3d0   : > { %v930_v24 = vsel %vm929_vm7, %v928_v9, %v9366_v56  ;;  %v9729_v3 = vrot.slane %v1246_v54, %v8290_v57  ;;  %v4750_v9 = vcombine.high %v9281_v58, %v9285_v35  ;;  %v1017_v54 = vcombine.high %v984_v32, %v9662_v28 }
 0x3d1   : > { %v9704_v33 = vpop.permute.xlu0 %2235  ;;  %v9706_v27 = vpop.permute.xlu1 %4622  ;;  %v932_v34 = vsel %vm931_vm8, %v930_v24, %v9422_v20  ;;  %v3392_v24 = vcombine.high %v13528_v0, %v13409_v4  ;;  %v1247_v0 = vcombine.high %v1214_v37, %v9678_v14  ;;  %v3622_v28 = vcombine.high %v13533_v51, %v13409_v4 }
 0x3d2   : > { %13557 = vst [vmem:[#allocation13_spill] sm:$0xff] %v9706_v27  ;;  %v934_v56 = vsel %vm933_vm9, %v932_v34, %v9430_v40  ;;  %v3377_v34 = vcombine.high %v13532_v63, %v13409_v4  ;;  %v3440_v63 = vcombine.high %v9557_v61, %v13409_v4  ;;  %v3607_v14 = vcombine.high %v13535_v30, %v13409_v4 }
 0x3d3   : > { %1115 = vrot.lane.b32.xlu0 %v9709_v42, %s8122_s21  ;;  %2679 = vrot.lane.b32.xlu1 %v9712_v22, %s8124_s28  ;;  %v3406_v32 = vrot.slane %v3392_v24, %v8285_v38  ;;  %v9787_v51 = vrot.slane %v1247_v0, %v8290_v57  ;;  %v3670_v30 = vcombine.high %v9576_v29, %v13409_v4  ;;  %v13568_v0 = vld [vmem:[#allocation53_spill] sm:$0xff] }
 0x3d4   : > { %v3621_v24 = vrot.slane %v3607_v14, %v8285_v38  ;;  %v13573_v14 = vld [vmem:[#allocation58_spill] sm:$0xff] }
 0x3d5   : > { %v889_v27 = vpop.permute.xlu0 %888  ;;  %v9735_v22 = vpop.permute.xlu1 %3314 }
 0x3d6   : > { %13559 = vst [vmem:[#allocation123_spill] sm:$0xff] %v9735_v22  ;;  %v936_v60 = vsel %vm935_vm10, %v934_v56, %v889_v27  ;;  %v3391_v56 = vrot.slane %v3377_v34, %v8285_v38 }
 0x3d7   : > { %v938_v20 = vsel %vm937_vm11, %v936_v60, %v9440_v17  ;;  %1345 = vrot.lane.b32.xlu0 %v9729_v3, %s8122_s21  ;;  %4412 = vrot.lane.b32.xlu1 %v9738_v39, %s8124_s28  ;;  %v9756_v60 = vrot.slane %v1675_v2, %v8290_v57  ;;  %v9759_v17 = vrot.slane %v4750_v9, %v8290_v57 }
 0x3d8   : > { %v940_v40 = vsel %vm939_vm12, %v938_v20, %v897_v7  ;;  %v9776_v9 = vrot.slane %v1017_v54, %v8290_v57  ;;  %v3423_v37 = vcombine.low %v3391_v56, %v3406_v32  ;;  %v3636_v20 = vrot.slane %v3622_v28, %v8285_v38 }
 0x3d9   : > { %948 = vst [vmem:[#allocation4] sm:$0x3] %v940_v40  ;;  %v9751_v55 = vpop.permute.xlu0 %4658  ;;  %v9753_v27 = vpop.permute.xlu1 %3990  ;;  %13563 = vst [vmem:[#allocation127_spill] sm:$0xff] %v9759_v17  ;;  %v2639_v40 = vcombine.high %v9088_v12, %v9092_v36  ;;  %v3474_v28 = vcombine.high %v13568_v0, %v9119_v15 }
 0x3da   : > { %13561 = vst [vmem:[#allocation125_spill] sm:$0xff] %v9751_v55  ;;  %13562 = vst [vmem:[#allocation126_spill] sm:$0xff] %v9753_v27  ;;  %v3653_v34 = vcombine.low %v3621_v24, %v3636_v20  ;;  %v9812_v29 = vrot.slane %v3423_v37, %v8290_v57  ;;  %v13576_v27 = vld [vmem:[#allocation85_spill] sm:$0xff] }
 0x3db   : > { %1781 = vrot.lane.b32.xlu0 %v9756_v60, %s8124_s28  ;;  %4856 = vrot.lane.b32.xlu1 %v9759_v17, %s8124_s28  ;;  %v13581_v17 = vld [vmem:[#allocation62_spill] sm:$0xff] }
 0x3dc   : > { %13572 = vst [vmem:[#allocation134_spill] sm:$0xff] %v9812_v29  ;;  %v9830_v37 = vrot.slane %v3653_v34, %v8290_v57 }
 0x3dd   : > { %v9771_v7 = vpop.permute.xlu0 %3994  ;;  %v9773_v2 = vpop.permute.xlu1 %3962 }
 0x3de   : > { %13564 = vst [vmem:[#allocation128_spill] sm:$0xff] %v9771_v7  ;;  %13565 = vst [vmem:[#allocation129_spill] sm:$0xff] %v9773_v2  ;;  %v13575_v7 = vld [vmem:[#allocation86_spill] sm:$0xff]  ;;  %v3424_v2 = vcombine.high %v3391_v56, %v3406_v32  ;;  %v3654_v32 = vcombine.high %v3621_v24, %v3636_v20  ;;  %v13585_v56 = vld [vmem:[#allocation68_spill] sm:$0xff] }
 0x3df   : > { %1123 = vrot.lane.b32.xlu0 %v9776_v9, %s8121_s20  ;;  %3518 = vrot.lane.b32.xlu1 %v3440_v63, %s8123_s27  ;;  %13579 = vst [vmem:[#allocation85_spill] sm:$0xff] %v9830_v37  ;;  %v13590_v20 = vld [vmem:[#allocation82_spill] sm:$0xff]  ;;  %v13591_v24 = vld [vmem:[#allocation81_spill] sm:$0xff] }
 0x3e1   : > { %v9792_v61 = vpop.permute.xlu0 %4662  ;;  %v9794_v54 = vpop.permute.xlu1 %4630 }
 0x3e2   : > { %13566 = vst [vmem:[#allocation130_spill] sm:$0xff] %v9792_v61  ;;  %13567 = vst [vmem:[#allocation131_spill] sm:$0xff] %v9794_v54  ;;  %v9809_v61 = vrot.slane %v2639_v40, %v8290_v57  ;;  %v9827_v40 = vrot.slane %v3474_v28, %v8290_v57 }
 0x3e3   : > { %1353 = vrot.lane.b32.xlu0 %v9787_v51, %s8121_s20  ;;  %3748 = vrot.lane.b32.xlu1 %v3670_v30, %s8123_s27  ;;  %v13574_v30 = vld [vmem:[#allocation57_spill] sm:$0xff] }
 0x3e4   : > { %13571 = vst [vmem:[#allocation133_spill] sm:$0xff] %v9809_v61  ;;  %v3704_v54 = vcombine.high %v13574_v30, %v13573_v14 }
 0x3e5   : > { %v9804_v63 = vpop.permute.xlu0 %3322  ;;  %v9806_v55 = vpop.permute.xlu1 %3966 }
 0x3e6   : > { %13569 = vst [vmem:[#allocation53_spill] sm:$0xff] %v9804_v63  ;;  %13570 = vst [vmem:[#allocation132_spill] sm:$0xff] %v9806_v55  ;;  %v4082_v63 = vcombine.high %v13576_v27, %v13575_v7  ;;  %v9843_v28 = vrot.slane %v3704_v54, %v8290_v57 }
 0x3e7   : > { %2707 = vrot.lane.b32.xlu0 %v9809_v61, %s8124_s28  ;;  %3522 = vrot.lane.b32.xlu1 %v9812_v29, %s8122_s21  ;;  %v13580_v29 = vld [vmem:[#allocation63_spill] sm:$0xff] }
 0x3e8   : > { %v4372_v39 = vcombine.high %v13581_v17, %v13580_v29  ;;  %v9846_v34 = vrot.slane %v4082_v63, %v8290_v57  ;;  %v9862_v63 = vrot.slane %v3424_v2, %v8290_v57  ;;  %v9880_v2 = vrot.slane %v3654_v32, %v8290_v57 }
 0x3e9   : > { %v9822_v22 = vpop.permute.xlu0 %3326  ;;  %v9824_v55 = vpop.permute.xlu1 %4634 }
 0x3ea   : > { %13577 = vst [vmem:[#allocation58_spill] sm:$0xff] %v9822_v22  ;;  %13578 = vst [vmem:[#allocation57_spill] sm:$0xff] %v9824_v55  ;;  %v13586_v55 = vld [vmem:[#allocation67_spill] sm:$0xff]  ;;  %v9859_v54 = vrot.slane %v4372_v39, %v8290_v57 }
 0x3eb   : > { %3542 = vrot.lane.b32.xlu0 %v9827_v40, %s8124_s28  ;;  %3752 = vrot.lane.b32.xlu1 %v9830_v37, %s8122_s21  ;;  %13584 = vst [vmem:[#allocation135_spill] sm:$0xff] %v9846_v34  ;;  %v4816_v37 = vcombine.high %v13586_v55, %v13585_v56  ;;  %13589 = vst [vmem:[#allocation136_spill] sm:$0xff] %v9862_v63 }
 0x3ec   : > { %13595 = vst [vmem:[#allocation138_spill] sm:$0xff] %v9880_v2 }
 0x3ed   : > { %v9838_v61 = vpop.permute.xlu0 %4002  ;;  %v9840_v22 = vpop.permute.xlu1 %3974  ;;  %v9877_v39 = vrot.slane %v4816_v37, %v8290_v57  ;;  %v5046_v37 = vcombine.high %v9354_v44, %v9358_v59  ;;  %v13608_v44 = vld [vmem:[#allocation27_spill] sm:$0xff] }
 0x3ee   : > { %13582 = vst [vmem:[#allocation63_spill] sm:$0xff] %v9838_v61  ;;  %13583 = vst [vmem:[#allocation62_spill] sm:$0xff] %v9840_v22  ;;  %v4148_v22 = vcombine.high %v13591_v24, %v13590_v20 }
 0x3ef   : > { %3772 = vrot.lane.b32.xlu0 %v9843_v28, %s8124_s28  ;;  %4188 = vrot.lane.b32.xlu1 %v9846_v34, %s8124_s28  ;;  %13594 = vst [vmem:[#allocation137_spill] sm:$0xff] %v9877_v39  ;;  %v9931_v59 = vrot.slane %v5046_v37, %v8290_v57 }
 0x3f1   : > { %v9854_v7 = vpop.permute.xlu0 %4670  ;;  %v9856_v61 = vpop.permute.xlu1 %4642 }
 0x3f2   : > { %13587 = vst [vmem:[#allocation68_spill] sm:$0xff] %v9854_v7  ;;  %13588 = vst [vmem:[#allocation67_spill] sm:$0xff] %v9856_v61  ;;  %v4980_v7 = vcombine.high %v9382_v16, %v9386_v1 }
 0x3f3   : > { %4440 = vrot.lane.b32.xlu0 %v9859_v54, %s8124_s28  ;;  %3530 = vrot.lane.b32.xlu1 %v9862_v63, %s8121_s20  ;;  %v13596_v63 = vld [vmem:[#allocation33_spill] sm:$0xff] }
 0x3f4   : > { %v1602_v1 = vsel %vm927_vm6, %v13596_v63, %v9540_v49  ;;  %v13600_v49 = vcombine.low %v8869_v41, %v8873_v5  ;;  %v13605_v41 = vcombine.low %v8933_v23, %v8937_v31  ;;  %v13609_v31 = vld [vmem:[#allocation92_spill] sm:$0xff] }
 0x3f5   : > { %v9872_v34 = vpop.permute.xlu0 %3302  ;;  %v9874_v61 = vpop.permute.xlu1 %3334 }
 0x3f6   : > { %13592 = vst [vmem:[#allocation82_spill] sm:$0xff] %v9872_v34  ;;  %13593 = vst [vmem:[#allocation81_spill] sm:$0xff] %v9874_v61  ;;  %v13597_v61 = vcombine.low %v8900_v52, %v8904_v43  ;;  %v9909_v63 = vrot.slane %v13600_v49, %v8290_v57  ;;  %v13602_v43 = vld [vmem:[#allocation95_spill] sm:$0xff]  ;;  %v9926_v5 = vrot.slane %v13605_v41, %v8290_v57 }
 0x3f7   : > { %4884 = vrot.lane.b32.xlu0 %v9877_v39, %s8124_s28  ;;  %3760 = vrot.lane.b32.xlu1 %v9880_v2, %s8121_s20  ;;  %v9900_v39 = vrot.slane %v4148_v22, %v8290_v57  ;;  %v9903_v2 = vrot.slane %v4980_v7, %v8290_v57  ;;  %v1603_v52 = vsel %vm929_vm7, %v1602_v1, %v13602_v43  ;;  %v13603_v22 = vld [vmem:[#allocation17_spill] sm:$0xff] }
 0x3f8   : > { %v9893_v34 = vrot.slane %v13597_v61, %v8290_v57  ;;  %13601 = vst [vmem:[#allocation140_spill] sm:$0xff] %v9909_v63  ;;  %v13604_v61 = vld [vmem:[#allocation36_spill] sm:$0xff]  ;;  %13606 = vst [vmem:[#allocation95_spill] sm:$0xff] %v9926_v5 }
 0x3f9   : > { %v1564_v32 = vpop.permute.xlu0 %1563  ;;  %v9897_v16 = vpop.permute.xlu1 %3310  ;;  %v2270_v7 = vsel %vm927_vm6, %v13604_v61, %v13603_v22  ;;  %v13607_v61 = vld [vmem:[#allocation15_spill] sm:$0xff] }
 0x3fa   : > { %13598 = vst [vmem:[#allocation33_spill] sm:$0xff] %v9893_v34  ;;  %13599 = vst [vmem:[#allocation139_spill] sm:$0xff] %v9897_v16  ;;  %v1604_v16 = vsel %vm931_vm8, %v1603_v52, %v9606_v47  ;;  %v1328_v22 = vcombine.high %v9893_v34, %v13409_v4  ;;  %v1609_v47 = vsel %vm927_vm6, %v13608_v44, %v13607_v61  ;;  %v13612_v44 = vld [vmem:[#allocation41_spill] sm:$0xff]  ;;  %v13617_v61 = vld [vmem:[#allocation30_spill] sm:$0xff] }
 0x3fb   : > { %4216 = vrot.lane.b32.xlu0 %v9900_v39, %s8124_s28  ;;  %5086 = vrot.lane.b32.xlu1 %v9903_v2, %s8124_s28  ;;  %v1605_v1 = vsel %vm933_vm9, %v1604_v16, %v9643_v19  ;;  %v2271_v23 = vsel %vm929_vm7, %v2270_v7, %v13609_v31  ;;  %v1098_v16 = vcombine.high %v9909_v63, %v13409_v4  ;;  %v13616_v7 = vld [vmem:[#allocation14_spill] sm:$0xff] }
 0x3fc   : > { %v1606_v52 = vsel %vm935_vm10, %v1605_v1, %v1564_v32  ;;  %v13610_v19 = vcombine.low %v13546_v10, %v8961_v8  ;;  %v13613_v32 = vld [vmem:[#allocation42_spill] sm:$0xff]  ;;  %v2277_v31 = vsel %vm927_vm6, %v13617_v61, %v13616_v7 }
 0x3fd   : > { %v2232_v49 = vpop.permute.xlu0 %2231  ;;  %v1592_v43 = vpop.permute.xlu1 %1591  ;;  %v13614_v41 = vcombine.low %v13612_v44, %v13613_v32  ;;  %v13618_v34 = vld [vmem:[#allocation94_spill] sm:$0xff]  ;;  %v1996_v32 = vcombine.high %v9926_v5, %v13409_v4 }
 0x3fe   : > { %v9950_v37 = vrot.slane %v13610_v19, %v8290_v57  ;;  %v1610_v63 = vsel %vm929_vm7, %v1609_v47, %v13618_v34  ;;  %v1607_v19 = vsel %vm937_vm11, %v1606_v52, %v9683_v25  ;;  %v13622_v25 = vld [vmem:[#allocation40_spill] sm:$0xff] }
 0x3ff   : > { %5114 = vrot.lane.b32.xlu0 %v9931_v59, %s8124_s28  ;;  %1361 = vrot.lane.b32.xlu1 %v1328_v22, %s8125_s7  ;;  %v9956_v1 = vrot.slane %v13614_v41, %v8290_v57  ;;  %v2272_v22 = vsel %vm931_vm8, %v2271_v23, %v9623_v45  ;;  %v13619_v41 = vld [vmem:[#allocation111_spill] sm:$0xff]  ;;  %v13620_v23 = vld [vmem:[#allocation24_spill] sm:$0xff] }
 0x400   : > { %13611 = vst [vmem:[#allocation17_spill] sm:$0xff] %v9950_v37  ;;  %v2273_v8 = vsel %vm933_vm9, %v2272_v22, %v9667_v13  ;;  %v1611_v7 = vsel %vm931_vm8, %v1610_v63, %v13619_v41  ;;  %v2278_v34 = vsel %vm929_vm7, %v2277_v31, %v13620_v23  ;;  %v13621_v13 = vld [vmem:[#allocation20_spill] sm:$0xff]  ;;  %v2440_v63 = vcombine.high %v9950_v37, %v13409_v4  ;;  %v13628_v23 = vld [vmem:[#allocation106_spill] sm:$0xff] }
 0x401   : > { %13615 = vst [vmem:[#allocation36_spill] sm:$0xff] %v9956_v1  ;;  %v1572_v10 = vpop.permute.xlu0 %1571  ;;  %v2260_v44 = vpop.permute.xlu1 %2259  ;;  %v2274_v61 = vsel %vm935_vm10, %v2273_v8, %v2232_v49  ;;  %v941_v52 = vsel %vm927_vm6, %v13622_v25, %v13621_v13  ;;  %v1930_v22 = vcombine.high %v9956_v1, %v13409_v4  ;;  %v13623_v49 = vcombine.low %v9012_v18, %v9016_v62  ;;  %v13629_v25 = vld [vmem:[#allocation96_spill] sm:$0xff] }
 0x402   : > { %v1608_v45 = vsel %vm939_vm12, %v1607_v19, %v1572_v10  ;;  %v13627_v10 = vld [vmem:[#allocation107_spill] sm:$0xff]  ;;  %v2279_v18 = vsel %vm931_vm8, %v2278_v34, %v13628_v23 }
 0x403   : > { %v1618_v47 = vrot.slane %v1608_v45, 2  ;;  %1131 = vrot.lane.b32.xlu0 %v1098_v16, %s8125_s7  ;;  %2029 = vrot.lane.b32.xlu1 %v1996_v32, %s8125_s7  ;;  %v9990_v31 = vrot.slane %v13623_v49, %v8290_v57  ;;  %v13625_v16 = vcombine.low %v9039_v46, %v9043_v50  ;;  %v1612_v19 = vsel %vm933_vm9, %v1611_v7, %v13627_v10  ;;  %v13630_v7 = vld [vmem:[#allocation26_spill] sm:$0xff] }
 0x404   : > { %v2275_v32 = vsel %vm937_vm11, %v2274_v61, %v9704_v33  ;;  %v1613_v62 = vsel %vm935_vm10, %v1612_v19, %v1592_v43  ;;  %v942_v46 = vsel %vm929_vm7, %v941_v52, %v13629_v25  ;;  %v1051_v33 = vcombine.high %v13630_v7, %v13409_v4  ;;  %v13631_v61 = vld [vmem:[#allocation18_spill] sm:$0xff]  ;;  %v13633_v43 = vld [vmem:[#allocation108_spill] sm:$0xff] }
 0x405   : > { %13624 = vst [vmem:[#allocation15_spill] sm:$0xff] %v9990_v31  ;;  %v9996_v8 = vrot.slane %v13625_v16, %v8290_v57  ;;  %1622 = vst [vmem:[#allocation4] sm:$0xc0] %v1618_v47  ;;  %v2240_v41 = vpop.permute.xlu0 %2239  ;;  %v917_v45 = vpop.permute.xlu1 %916  ;;  %v2280_v47 = vsel %vm933_vm9, %v2279_v18, %v13631_v61  ;;  %v1614_v49 = vsel %vm937_vm11, %v1613_v62, %v13633_v43  ;;  %v13640_v43 = vld [vmem:[#allocation112_spill] sm:$0xff] }
 0x406   : > { %v2276_v13 = vsel %vm939_vm12, %v2275_v32, %v2240_v41  ;;  %v2374_v52 = vcombine.high %v9990_v31, %v13409_v4  ;;  %v2281_v19 = vsel %vm935_vm10, %v2280_v47, %v2260_v44  ;;  %v13635_v32 = vld [vmem:[#allocation21_spill] sm:$0xff]  ;;  %v10031_v62 = vrot.slane %v1051_v33, %v8285_v38 }
 0x407   : > { %13626 = vst [vmem:[#allocation27_spill] sm:$0xff] %v9996_v8  ;;  %v2286_v50 = vrot.slane %v2276_v13, 4  ;;  %2001 = vrot.lane.b32.xlu0 %v1930_v22, %s8125_s7  ;;  %2473 = vrot.lane.b32.xlu1 %v2440_v63, %s8125_s7  ;;  %v1772_v22 = vcombine.high %v9996_v8, %v13409_v4  ;;  %v13634_v63 = vld [vmem:[#allocation22_spill] sm:$0xff]  ;;  %v943_v41 = vsel %vm931_vm8, %v942_v46, %v13635_v32  ;;  %v13636_v13 = vld [vmem:[#allocation29_spill] sm:$0xff]  ;;  %v13638_v46 = vld [vmem:[#allocation19_spill] sm:$0xff] }
 0x408   : > { %v1036_v10 = vcombine.high %v13634_v63, %v13409_v4  ;;  %v1281_v25 = vcombine.high %v13636_v13, %v13409_v4  ;;  %v1674_v44 = vcombine.low %v9716_v11, %v9697_v48  ;;  %v944_v61 = vsel %vm933_vm9, %v943_v41, %v13638_v46  ;;  %v13641_v48 = vld [vmem:[#allocation25_spill] sm:$0xff] }
 0x409   : > { %2290 = vst [vmem:[#allocation4 + $0x10] sm:$0x30] %v2286_v50  ;;  %v10014_v34 = vpop.permute.xlu0 %3998  ;;  %v1600_v16 = vpop.permute.xlu1 %1599  ;;  %v13637_v50 = vld [vmem:[#allocation109_spill] sm:$0xff]  ;;  %v1266_v63 = vcombine.high %v13641_v48, %v13409_v4 }
 0x40a   : > { %13632 = vst [vmem:[#allocation92_spill] sm:$0xff] %v10014_v34  ;;  %v1615_v23 = vsel %vm939_vm12, %v1614_v49, %v1600_v16  ;;  %v1099_v7 = vcombine.high %v13637_v50, %v13409_v4  ;;  %v2282_v49 = vsel %vm937_vm11, %v2281_v19, %v13640_v43  ;;  %v1997_v16 = vcombine.high %v9613_v53, %v13409_v4  ;;  %v13648_v43 = vld [vmem:[#allocation28_spill] sm:$0xff] }
 0x40b   : > { %v1619_v18 = vrot.slane %v1615_v23, 2  ;;  %2445 = vrot.lane.b32.xlu0 %v2374_v52, %s8125_s7  ;;  %1805 = vrot.lane.b32.xlu1 %v1772_v22, %s8125_s7  ;;  %v10048_v52 = vrot.slane %v1036_v10, %v8285_v38  ;;  %v945_v22 = vsel %vm935_vm10, %v944_v61, %v917_v45  ;;  %v10059_v53 = vrot.slane %v1281_v25, %v8285_v38  ;;  %v13642_v10 = vld [vmem:[#allocation32_spill] sm:$0xff] }
 0x40c   : > { %v1949_v41 = vcombine.high %v13642_v10, %v13409_v4  ;;  %v10064_v45 = vrot.slane %v1674_v44, %v8290_v57  ;;  %v13647_v61 = vld [vmem:[#allocation116_spill] sm:$0xff]  ;;  %v10078_v44 = vrot.slane %v1266_v63, %v8285_v38 }
 0x40d   : > { %1623 = vst [vmem:[#allocation4 + $0x8] sm:$0xc0] %v1619_v18  ;;  %v10041_v47 = vpop.permute.xlu0 %4666  ;;  %v2268_v33 = vpop.permute.xlu1 %2267  ;;  %v1082_v19 = vcombine.low %v10048_v52, %v10031_v62  ;;  %v13645_v18 = vld [vmem:[#allocation37_spill] sm:$0xff]  ;;  %v2441_v25 = vcombine.high %v13647_v61, %v13409_v4  ;;  %v13653_v61 = vld [vmem:[#allocation34_spill] sm:$0xff] }
 0x40e   : > { %13639 = vst [vmem:[#allocation41_spill] sm:$0xff] %v10041_v47  ;;  %v2283_v11 = vsel %vm939_vm12, %v2282_v49, %v2268_v33  ;;  %13643 = vst [vmem:[#allocation42_spill] sm:$0xff] %v10064_v45  ;;  %v946_v13 = vsel %vm937_vm11, %v945_v22, %v13645_v18  ;;  %v1934_v49 = vcombine.high %v13648_v43, %v13409_v4  ;;  %v13649_v22 = vld [vmem:[#allocation35_spill] sm:$0xff] }
 0x40f   : > { %v2287_v32 = vrot.slane %v2283_v11, 4  ;;  %1139 = vrot.lane.b32.xlu0 %v1099_v7, %s8123_s27  ;;  %2037 = vrot.lane.b32.xlu1 %v1997_v16, %s8123_s27  ;;  %v13646_v7 = vld [vmem:[#allocation113_spill] sm:$0xff]  ;;  %v10083_v16 = vrot.slane %v1949_v41, %v8285_v38  ;;  %v2393_v11 = vcombine.high %v13649_v22, %v13409_v4  ;;  %v1312_v48 = vcombine.low %v10078_v44, %v10059_v53 }
 0x410   : > { %v1329_v46 = vcombine.high %v13646_v7, %v13409_v4  ;;  %v10101_v41 = vrot.slane %v1934_v49, %v8285_v38  ;;  %v13652_v7 = vld [vmem:[#allocation31_spill] sm:$0xff] }
 0x411   : > { %2291 = vst [vmem:[#allocation4 + $0x18] sm:$0x30] %v2287_v32  ;;  %v10066_v23 = vpop.permute.xlu0 %3330  ;;  %v925_v50 = vpop.permute.xlu1 %924  ;;  %v13650_v32 = vld [vmem:[#allocation39_spill] sm:$0xff]  ;;  %v10127_v47 = vrot.slane %v1312_v48, %v8290_v57 }
 0x412   : > { %13644 = vst [vmem:[#allocation14_spill] sm:$0xff] %v10066_v23  ;;  %v947_v33 = vsel %vm939_vm12, %v946_v13, %v925_v50  ;;  %v1883_v10 = vcombine.high %v13650_v32, %v13409_v4  ;;  %v1706_v13 = vcombine.high %v10064_v45, %v13409_v4  ;;  %v10098_v50 = vrot.slane %v1082_v19, %v8290_v57  ;;  %v13664_v23 = vld [vmem:[#allocation43_spill] sm:$0xff] }
 0x413   : > { %949 = vst [vmem:[#allocation4 + $0x8] sm:$0x3] %v947_v33  ;;  %1369 = vrot.lane.b32.xlu0 %v1329_v46, %s8123_s27  ;;  %2481 = vrot.lane.b32.xlu1 %v2441_v25, %s8123_s27  ;;  %v2378_v46 = vcombine.high %v13652_v7, %v13409_v4  ;;  %v1868_v25 = vcombine.high %v13653_v61, %v13409_v4  ;;  %v13654_v33 = vld [vmem:[#allocation44_spill] sm:$0xff] }
 0x414   : > { %v1980_v43 = vcombine.low %v10101_v41, %v10083_v16  ;;  %v10113_v19 = vrot.slane %v2393_v11, %v8285_v38  ;;  %v10116_v49 = vrot.slane %v1883_v10, %v8285_v38  ;;  %v2327_v22 = vcombine.high %v13654_v33, %v13409_v4  ;;  %v13658_v10 = vld [vmem:[#allocation38_spill] sm:$0xff] }
 0x415   : > { %v10091_v18 = vpop.permute.xlu0 %4006  ;;  %v10093_v63 = vpop.permute.xlu1 %3970  ;;  %v10130_v8 = vrot.slane %v2378_v46, %v8285_v38  ;;  %v10133_v11 = vrot.slane %v1868_v25, %v8285_v38  ;;  %v2312_v31 = vcombine.high %v13658_v10, %v13409_v4  ;;  %v2375_v10 = vcombine.high %v9648_v21, %v13409_v4 }
 0x416   : > { %13651 = vst [vmem:[#allocation30_spill] sm:$0xff] %v10091_v18  ;;  %v10145_v46 = vrot.slane %v2327_v22, %v8285_v38  ;;  %v1710_v37 = vcombine.high %v13664_v23, %v13409_v4 }
 0x417   : > { %1777 = vrot.lane.b32.xlu0 %v1706_v13, %s8125_s7  ;;  %1143 = vrot.lane.b32.xlu1 %v10098_v50, %s8122_s21  ;;  %v13657_v13 = vld [vmem:[#allocation115_spill] sm:$0xff]  ;;  %v2424_v33 = vcombine.low %v10130_v8, %v10113_v19  ;;  %v1914_v48 = vcombine.low %v10133_v11, %v10116_v49 }
 0x418   : > { %v1931_v61 = vcombine.high %v13657_v13, %v13409_v4 }
 0x419   : > { %v10120_v32 = vpop.permute.xlu0 %4674  ;;  %v10122_v7 = vpop.permute.xlu1 %4638  ;;  %v10169_v21 = vrot.slane %v1914_v48, %v8290_v57 }
 0x41a   : > { %13655 = vst [vmem:[#allocation94_spill] sm:$0xff] %v10120_v32  ;;  %13656 = vst [vmem:[#allocation111_spill] sm:$0xff] %v10122_v7  ;;  %v10157_v32 = vrot.slane %v2312_v31, %v8285_v38  ;;  %v1083_v31 = vcombine.high %v10048_v52, %v10031_v62  ;;  %v1034_v62 = vcombine.high %v9709_v42, %v13409_v4 }
 0x41b   : > { %2009 = vrot.lane.b32.xlu0 %v1931_v61, %s8123_s27  ;;  %1373 = vrot.lane.b32.xlu1 %v10127_v47, %s8122_s21  ;;  %v10154_v61 = vrot.slane %v1980_v43, %v8290_v57  ;;  %v10172_v43 = vrot.slane %v2424_v33, %v8290_v57  ;;  %v13663_v33 = vld [vmem:[#allocation119_spill] sm:$0xff]  ;;  %v1313_v52 = vcombine.high %v10078_v44, %v10059_v53 }
 0x41c   : > { %v2358_v22 = vcombine.low %v10157_v32, %v10145_v46  ;;  %v1773_v18 = vcombine.high %v13663_v33, %v13409_v4  ;;  %v10208_v23 = vrot.slane %v1083_v31, %v8290_v57  ;;  %v1644_v42 = vcombine.high %v9027_v26, %v13409_v4 }
 0x41d   : > { %v10147_v13 = vpop.permute.xlu0 %3978  ;;  %v10149_v25 = vpop.permute.xlu1 %3338  ;;  %v1264_v31 = vcombine.high %v9729_v3, %v13409_v4  ;;  %v1707_v3 = vcombine.high %v9756_v60, %v13409_v4 }
 0x41e   : > { %13659 = vst [vmem:[#allocation24_spill] sm:$0xff] %v10149_v25  ;;  %v10187_v48 = vrot.slane %v2358_v22, %v8290_v57  ;;  %v1658_v26 = vrot.slane %v1644_v42, %v8285_v38  ;;  %v2425_v42 = vcombine.high %v10130_v8, %v10113_v19  ;;  %v2359_v8 = vcombine.high %v10157_v32, %v10145_v46 }
 0x41f   : > { %2453 = vrot.lane.b32.xlu0 %v2375_v10, %s8123_s27  ;;  %2041 = vrot.lane.b32.xlu1 %v10154_v61, %s8122_s21  ;;  %v13661_v10 = vld [vmem:[#allocation45_spill] sm:$0xff]  ;;  %v13673_v32 = vcombine.low %v13568_v0, %v9119_v15  ;;  %v13677_v15 = vld [vmem:[#allocation71_spill] sm:$0xff]  ;;  %v13678_v0 = vld [vmem:[#allocation72_spill] sm:$0xff] }
 0x421   : > { %v10164_v7 = vpop.permute.xlu0 %4646  ;;  %v10166_v45 = vpop.permute.xlu1 %1107  ;;  %v10282_v46 = vrot.slane %v13673_v32, %v8290_v57  ;;  %v13679_v32 = vcombine.low %v13677_v15, %v13678_v0 }
 0x422   : > { %13660 = vst [vmem:[#allocation20_spill] sm:$0xff] %v10164_v7  ;;  %v1725_v7 = vcombine.high %v13661_v10, %v13409_v4  ;;  %v1659_v10 = vcombine.high %v9058_v6, %v13409_v4 }
 0x423   : > { %2013 = vrot.lane.b32.xlu0 %v10169_v21, %s8122_s21  ;;  %2485 = vrot.lane.b32.xlu1 %v10172_v43, %s8122_s21  ;;  %13674 = vst [vmem:[#allocation29_spill] sm:$0xff] %v10282_v46 }
 0x424   : > { %v1739_v22 = vrot.slane %v1725_v7, %v8285_v38  ;;  %v1673_v6 = vrot.slane %v1659_v10, %v8285_v38 }
 0x425   : > { %v10182_v1 = vpop.permute.xlu0 %3514  ;;  %v10184_v25 = vpop.permute.xlu1 %1337 }
 0x426   : > { %13662 = vst [vmem:[#allocation40_spill] sm:$0xff] %v10182_v1  ;;  %v1690_v10 = vcombine.low %v1658_v26, %v1673_v6 }
 0x427   : > { %2457 = vrot.lane.b32.xlu0 %v10187_v48, %s8122_s21  ;;  %1813 = vrot.lane.b32.xlu1 %v1773_v18, %s8123_s27  ;;  %v1724_v18 = vrot.slane %v1710_v37, %v8285_v38  ;;  %v10224_v37 = vrot.slane %v1313_v52, %v8290_v57 }
 0x428   : > { %v10253_v60 = vrot.slane %v1690_v10, %v8290_v57  ;;  %v10272_v10 = vrot.slane %v2425_v42, %v8290_v57  ;;  %v1265_v42 = vcombine.high %v9787_v51, %v13409_v4  ;;  %v3505_v51 = vcombine.high %v10282_v46, %v13409_v4 }
 0x429   : > { %v10203_v33 = vpop.permute.xlu0 %3744  ;;  %v10205_v34 = vpop.permute.xlu1 %1135  ;;  %v1756_v53 = vcombine.low %v1724_v18, %v1739_v22 }
 0x42a   : > { %13665 = vst [vmem:[#allocation107_spill] sm:$0xff] %v10203_v33  ;;  %13666 = vst [vmem:[#allocation106_spill] sm:$0xff] %v10205_v34  ;;  %v13745_v33 = vld [vmem:[#allocation59_spill] sm:$0xff] }
 0x42b   : > { %1119 = vrot.lane.b32.xlu0 %v1034_v62, %s8119_s30  ;;  %1151 = vrot.lane.b32.xlu1 %v10208_v23, %s8121_s20  ;;  %v1981_v62 = vcombine.high %v10101_v41, %v10083_v16  ;;  %v10239_v52 = vrot.slane %v1756_v53, %v8290_v57  ;;  %v1915_v16 = vcombine.high %v10133_v11, %v10116_v49 }
 0x42d   : > { %v10217_v44 = vpop.permute.xlu0 %1103  ;;  %v10219_v7 = vpop.permute.xlu1 %1365  ;;  %v10256_v53 = vrot.slane %v1981_v62, %v8290_v57  ;;  %v10269_v11 = vrot.slane %v1915_v16, %v8290_v57  ;;  %v10289_v16 = vrot.slane %v2359_v8, %v8290_v57  ;;  %v1035_v8 = vcombine.high %v9776_v9, %v13409_v4 }
 0x42e   : > { %13667 = vst [vmem:[#allocation96_spill] sm:$0xff] %v10219_v7 }
 0x42f   : > { %1349 = vrot.lane.b32.xlu0 %v1264_v31, %s8119_s30  ;;  %1381 = vrot.lane.b32.xlu1 %v10224_v37, %s8121_s20  ;;  %13676 = vst [vmem:[#allocation19_spill] sm:$0xff] %v10289_v16 }
 0x431   : > { %v10232_v5 = vpop.permute.xlu0 %1333  ;;  %v10234_v7 = vpop.permute.xlu1 %2033 }
 0x432   : > { %13668 = vst [vmem:[#allocation26_spill] sm:$0xff] %v10234_v7 }
 0x433   : > { %1785 = vrot.lane.b32.xlu0 %v1707_v3, %s8123_s27  ;;  %1817 = vrot.lane.b32.xlu1 %v10239_v52, %s8122_s21 }
 0x435   : > { %v10248_v41 = vpop.permute.xlu0 %2005  ;;  %v10250_v31 = vpop.permute.xlu1 %2477 }
 0x436   : > { %13669 = vst [vmem:[#allocation18_spill] sm:$0xff] %v10248_v41  ;;  %13670 = vst [vmem:[#allocation108_spill] sm:$0xff] %v10250_v31 }
 0x437   : > { %1789 = vrot.lane.b32.xlu0 %v10253_v60, %s8122_s21  ;;  %2049 = vrot.lane.b32.xlu1 %v10256_v53, %s8121_s20 }
 0x439   : > { %v10264_v19 = vpop.permute.xlu0 %2449  ;;  %v10266_v49 = vpop.permute.xlu1 %1809 }
 0x43a   : > { %13671 = vst [vmem:[#allocation22_spill] sm:$0xff] %v10264_v19  ;;  %13672 = vst [vmem:[#allocation21_spill] sm:$0xff] %v10266_v49  ;;  %v1757_v49 = vcombine.high %v1724_v18, %v1739_v22  ;;  %v10300_v19 = vrot.slane %v13679_v32, %v8290_v57  ;;  %v1691_v22 = vcombine.high %v1658_v26, %v1673_v6  ;;  %v13682_v18 = vld [vmem:[#allocation75_spill] sm:$0xff] }
 0x43b   : > { %2021 = vrot.lane.b32.xlu0 %v10269_v11, %s8121_s20  ;;  %2493 = vrot.lane.b32.xlu1 %v10272_v10, %s8121_s20  ;;  %v13688_v6 = vcombine.low %v9088_v12, %v9092_v36  ;;  %v13693_v12 = vcombine.low %v13574_v30, %v13573_v14  ;;  %v13697_v14 = vcombine.low %v13581_v17, %v13580_v29 }
 0x43c   : > { %13680 = vst [vmem:[#allocation112_spill] sm:$0xff] %v10300_v19  ;;  %v10323_v9 = vrot.slane %v1757_v49, %v8290_v57  ;;  %v2604_v46 = vcombine.high %v10300_v19, %v13409_v4  ;;  %v13700_v17 = vcombine.low %v13586_v55, %v13585_v56 }
 0x43d   : > { %v10284_v62 = vpop.permute.xlu0 %1111  ;;  %v10286_v3 = vpop.permute.xlu1 %3510  ;;  %v10334_v26 = vrot.slane %v13688_v6, %v8290_v57  ;;  %v10358_v36 = vrot.slane %v13693_v12, %v8290_v57  ;;  %v10374_v30 = vrot.slane %v13697_v14, %v8290_v57  ;;  %v3506_v12 = vcombine.high %v9827_v40, %v13409_v4 }
 0x43e   : > { %13675 = vst [vmem:[#allocation109_spill] sm:$0xff] %v10286_v3  ;;  %13687 = vst [vmem:[#allocation113_spill] sm:$0xff] %v10323_v9  ;;  %v10390_v29 = vrot.slane %v13700_v17, %v8290_v57  ;;  %v3736_v40 = vcombine.high %v9843_v28, %v13409_v4 }
 0x43f   : > { %2465 = vrot.lane.b32.xlu0 %v10289_v16, %s8121_s20  ;;  %1357 = vrot.lane.b32.xlu1 %v1265_v42, %s8120_s16  ;;  %v13683_v42 = vld [vmem:[#allocation76_spill] sm:$0xff]  ;;  %13689 = vst [vmem:[#allocation116_spill] sm:$0xff] %v10334_v26  ;;  %13694 = vst [vmem:[#allocation39_spill] sm:$0xff] %v10358_v36  ;;  %v4403_v14 = vcombine.high %v10374_v30, %v13409_v4 }
 0x440   : > { %v13684_v15 = vcombine.low %v13682_v18, %v13683_v42  ;;  %v10347_v42 = vrot.slane %v1691_v22, %v8290_v57  ;;  %v2670_v22 = vcombine.high %v10334_v26, %v13409_v4  ;;  %13698 = vst [vmem:[#allocation44_spill] sm:$0xff] %v10374_v30  ;;  %13701 = vst [vmem:[#allocation38_spill] sm:$0xff] %v10390_v29 }
 0x441   : > { %v10302_v41 = vpop.permute.xlu0 %1341  ;;  %v10304_v31 = vpop.permute.xlu1 %3740 }
 0x442   : > { %13681 = vst [vmem:[#allocation25_spill] sm:$0xff] %v10304_v31  ;;  %v10316_v0 = vrot.slane %v13684_v15, %v8290_v57 }
 0x443   : > { %1127 = vrot.lane.b32.xlu0 %v1035_v8, %s8120_s16  ;;  %3538 = vrot.lane.b32.xlu1 %v3505_v51, %s8125_s7  ;;  %v13690_v8 = vcombine.low %v9281_v58, %v9285_v35 }
 0x444   : > { %13685 = vst [vmem:[#allocation32_spill] sm:$0xff] %v10316_v0 }
 0x445   : > { %v10318_v32 = vpop.permute.xlu0 %1115  ;;  %v10320_v7 = vpop.permute.xlu1 %2679  ;;  %v10340_v49 = vrot.slane %v13690_v8, %v8290_v57 }
 0x446   : > { %13686 = vst [vmem:[#allocation37_spill] sm:$0xff] %v10320_v7 }
 0x447   : > { %1825 = vrot.lane.b32.xlu0 %v10323_v9, %s8121_s20  ;;  %2675 = vrot.lane.b32.xlu1 %v2604_v46, %s8125_s7  ;;  %13691 = vst [vmem:[#allocation28_spill] sm:$0xff] %v10340_v49  ;;  %v4337_v46 = vcombine.high %v10316_v0, %v13409_v4  ;;  %v4781_v15 = vcombine.high %v10340_v49, %v13409_v4  ;;  %v13708_v49 = vld [vmem:[#allocation122_spill] sm:$0xff] }
 0x448   : > { %v2605_v28 = vcombine.high %v13708_v49, %v13409_v4 }
 0x449   : > { %v10342_v51 = vpop.permute.xlu0 %1345  ;;  %v10344_v18 = vpop.permute.xlu1 %4412 }
 0x44a   : > { %13692 = vst [vmem:[#allocation35_spill] sm:$0xff] %v10344_v18 }
 0x44b   : > { %1797 = vrot.lane.b32.xlu0 %v10347_v42, %s8121_s20  ;;  %4408 = vrot.lane.b32.xlu1 %v4337_v46, %s8125_s7  ;;  %v3735_v46 = vcombine.high %v10358_v36, %v13409_v4 }
 0x44d   : > { %v10360_v35 = vpop.permute.xlu0 %1781  ;;  %v10362_v58 = vpop.permute.xlu1 %4856 }
 0x44e   : > { %13695 = vst [vmem:[#allocation31_spill] sm:$0xff] %v10360_v35  ;;  %13696 = vst [vmem:[#allocation34_spill] sm:$0xff] %v10362_v58  ;;  %v4847_v58 = vcombine.high %v10390_v29, %v13409_v4  ;;  %v13714_v29 = vld [vmem:[#allocation133_spill] sm:$0xff] }
 0x44f   : > { %2703 = vrot.lane.b32.xlu0 %v2670_v22, %s8125_s7  ;;  %4852 = vrot.lane.b32.xlu1 %v4781_v15, %s8125_s7  ;;  %v2671_v49 = vcombine.high %v13714_v29, %v13409_v4 }
 0x451   : > { %v10376_v6 = vpop.permute.xlu0 %1123  ;;  %v10378_v8 = vpop.permute.xlu1 %3518 }
 0x452   : > { %13699 = vst [vmem:[#allocation115_spill] sm:$0xff] %v10378_v8 }
 0x453   : > { %3768 = vrot.lane.b32.xlu0 %v3735_v46, %s8125_s7  ;;  %3546 = vrot.lane.b32.xlu1 %v3506_v12, %s8123_s27  ;;  %v13703_v46 = vld [vmem:[#allocation86_spill] sm:$0xff] }
 0x454   : > { %v13704_v55 = vcombine.low %v13576_v27, %v13703_v46  ;;  %v13710_v27 = vcombine.low %v13591_v24, %v13590_v20  ;;  %v13716_v20 = vld [vmem:[#allocation49_spill] sm:$0xff] }
 0x455   : > { %v10392_v22 = vpop.permute.xlu0 %1353  ;;  %v10394_v15 = vpop.permute.xlu1 %3748  ;;  %v2623_v24 = vcombine.high %v13716_v20, %v13409_v4 }
 0x456   : > { %13702 = vst [vmem:[#allocation45_spill] sm:$0xff] %v10394_v15  ;;  %v10406_v56 = vrot.slane %v13704_v55, %v8290_v57  ;;  %v10424_v46 = vrot.slane %v13710_v27, %v8290_v57  ;;  %v13717_v27 = vld [vmem:[#allocation74_spill] sm:$0xff] }
 0x457   : > { %4436 = vrot.lane.b32.xlu0 %v4403_v14, %s8125_s7  ;;  %3776 = vrot.lane.b32.xlu1 %v3736_v40, %s8123_s27  ;;  %v13709_v14 = vld [vmem:[#allocation70_spill] sm:$0xff]  ;;  %v4290_v30 = vcombine.high %v13717_v27, %v13409_v4  ;;  %v10463_v27 = vrot.slane %v2623_v24, %v8285_v38  ;;  %v13727_v24 = vld [vmem:[#allocation127_spill] sm:$0xff] }
 0x458   : > { %13705 = vst [vmem:[#allocation119_spill] sm:$0xff] %v10406_v56  ;;  %v2557_v40 = vcombine.high %v13709_v14, %v13409_v4  ;;  %13711 = vst [vmem:[#allocation72_spill] sm:$0xff] %v10424_v46 }
 0x459   : > { %v10408_v12 = vpop.permute.xlu0 %2707  ;;  %v10410_v17 = vpop.permute.xlu1 %3522 }
 0x45a   : > { %13706 = vst [vmem:[#allocation43_spill] sm:$0xff] %v10408_v12  ;;  %13707 = vst [vmem:[#allocation71_spill] sm:$0xff] %v10410_v17  ;;  %v10441_v14 = vrot.slane %v2557_v40, %v8285_v38  ;;  %v13722_v40 = vld [vmem:[#allocation69_spill] sm:$0xff]  ;;  %v13728_v12 = vld [vmem:[#allocation48_spill] sm:$0xff] }
 0x45b   : > { %4880 = vrot.lane.b32.xlu0 %v4847_v58, %s8125_s7  ;;  %2683 = vrot.lane.b32.xlu1 %v2605_v28, %s8123_s27  ;;  %v4113_v58 = vcombine.high %v10406_v56, %v13409_v4  ;;  %v13715_v28 = vld [vmem:[#allocation64_spill] sm:$0xff]  ;;  %v4275_v36 = vcombine.high %v13722_v40, %v13409_v4 }
 0x45c   : > { %v2542_v0 = vcombine.high %v13715_v28, %v13409_v4  ;;  %v4179_v28 = vcombine.high %v10424_v46, %v13409_v4  ;;  %v13723_v46 = vld [vmem:[#allocation52_spill] sm:$0xff] }
 0x45d   : > { %v10426_v55 = vpop.permute.xlu0 %3542  ;;  %v10428_v18 = vpop.permute.xlu1 %3752  ;;  %v10488_v26 = vrot.slane %v4275_v36, %v8285_v38 }
 0x45e   : > { %13712 = vst [vmem:[#allocation75_spill] sm:$0xff] %v10426_v55  ;;  %13713 = vst [vmem:[#allocation76_spill] sm:$0xff] %v10428_v18  ;;  %v10456_v20 = vrot.slane %v2542_v0, %v8285_v38  ;;  %v13724_v0 = vld [vmem:[#allocation78_spill] sm:$0xff]  ;;  %v4782_v55 = vcombine.high %v13727_v24, %v13409_v4 }
 0x45f   : > { %2711 = vrot.lane.b32.xlu0 %v2671_v49, %s8123_s27  ;;  %4184 = vrot.lane.b32.xlu1 %v4113_v58, %s8125_s7  ;;  %v13720_v49 = vld [vmem:[#allocation124_spill] sm:$0xff]  ;;  %v13721_v58 = vld [vmem:[#allocation46_spill] sm:$0xff] }
 0x460   : > { %v4338_v56 = vcombine.high %v13720_v49, %v13409_v4  ;;  %v2608_v19 = vcombine.high %v13721_v58, %v13409_v4  ;;  %v2588_v49 = vcombine.low %v10456_v20, %v10441_v14  ;;  %v10470_v58 = vrot.slane %v4290_v30, %v8285_v38 }
 0x461   : > { %v10445_v29 = vpop.permute.xlu0 %3772  ;;  %v10447_v7 = vpop.permute.xlu1 %4188  ;;  %v3443_v30 = vcombine.high %v13728_v12, %v13409_v4 }
 0x462   : > { %13718 = vst [vmem:[#allocation86_spill] sm:$0xff] %v10445_v29  ;;  %13719 = vst [vmem:[#allocation122_spill] sm:$0xff] %v10447_v7  ;;  %v3458_v7 = vcombine.high %v13723_v46, %v13409_v4  ;;  %v4734_v29 = vcombine.high %v13724_v0, %v13409_v4  ;;  %v10483_v46 = vrot.slane %v2608_v19, %v8285_v38  ;;  %v13729_v0 = vld [vmem:[#allocation73_spill] sm:$0xff]  ;;  %v13730_v19 = vld [vmem:[#allocation55_spill] sm:$0xff] }
 0x463   : > { %4212 = vrot.lane.b32.xlu0 %v4179_v28, %s8125_s7  ;;  %4416 = vrot.lane.b32.xlu1 %v4338_v56, %s8123_s27  ;;  %v4404_v56 = vcombine.high %v9859_v54, %v13409_v4  ;;  %v3688_v35 = vcombine.high %v13730_v19, %v13409_v4  ;;  %v4321_v36 = vcombine.low %v10488_v26, %v10470_v58  ;;  %v13735_v19 = vld [vmem:[#allocation51_spill] sm:$0xff] }
 0x464   : > { %v2654_v54 = vcombine.low %v10483_v46, %v10463_v27  ;;  %v10497_v24 = vrot.slane %v3458_v7, %v8285_v38  ;;  %v10504_v12 = vrot.slane %v4734_v29, %v8285_v38  ;;  %v10516_v7 = vrot.slane %v3443_v30, %v8285_v38  ;;  %v13736_v30 = vld [vmem:[#allocation60_spill] sm:$0xff] }
 0x465   : > { %v10474_v40 = vpop.permute.xlu0 %4440  ;;  %v10476_v28 = vpop.permute.xlu1 %3530  ;;  %v3673_v17 = vcombine.high %v13735_v19, %v13409_v4  ;;  %v10543_v1 = vrot.slane %v4321_v36, %v8290_v57  ;;  %v13741_v36 = vld [vmem:[#allocation65_spill] sm:$0xff] }
 0x466   : > { %13725 = vst [vmem:[#allocation70_spill] sm:$0xff] %v10474_v40  ;;  %13726 = vst [vmem:[#allocation133_spill] sm:$0xff] %v10476_v28  ;;  %v4719_v40 = vcombine.high %v13729_v0, %v13409_v4  ;;  %v10513_v28 = vrot.slane %v2588_v49, %v8290_v57  ;;  %v3489_v29 = vcombine.low %v10516_v7, %v10497_v24 }
 0x467   : > { %4444 = vrot.lane.b32.xlu0 %v4404_v56, %s8123_s27  ;;  %4860 = vrot.lane.b32.xlu1 %v4782_v55, %s8123_s27  ;;  %v13733_v55 = vld [vmem:[#allocation137_spill] sm:$0xff]  ;;  %v10529_v49 = vrot.slane %v3688_v35, %v8285_v38  ;;  %13739 = vst [vmem:[#allocation69_spill] sm:$0xff] %v10543_v1  ;;  %v10546_v3 = vrot.slane %v3673_v17, %v8285_v38  ;;  %v13740_v35 = vld [vmem:[#allocation54_spill] sm:$0xff] }
 0x468   : > { %v4848_v34 = vcombine.high %v13733_v55, %v13409_v4  ;;  %13734 = vst [vmem:[#allocation74_spill] sm:$0xff] %v10513_v28  ;;  %v10521_v8 = vrot.slane %v4719_v40, %v8285_v38  ;;  %v4356_v55 = vcombine.high %v13736_v30, %v13409_v4 }
 0x469   : > { %v10506_v0 = vpop.permute.xlu0 %4884  ;;  %v10508_v56 = vpop.permute.xlu1 %3760  ;;  %v3719_v30 = vcombine.low %v10546_v3, %v10529_v49 }
 0x46a   : > { %13731 = vst [vmem:[#allocation64_spill] sm:$0xff] %v10506_v0  ;;  %13732 = vst [vmem:[#allocation49_spill] sm:$0xff] %v10508_v56  ;;  %v4765_v19 = vcombine.low %v10521_v8, %v10504_v12  ;;  %v4341_v56 = vcombine.high %v13740_v35, %v13409_v4  ;;  %v10566_v35 = vrot.slane %v3489_v29, %v8290_v57 }
 0x46b   : > { %4888 = vrot.lane.b32.xlu0 %v4848_v34, %s8123_s27  ;;  %2687 = vrot.lane.b32.xlu1 %v10513_v28, %s8122_s21  ;;  %v10540_v34 = vrot.slane %v2654_v54, %v8290_v57  ;;  %v10557_v54 = vrot.slane %v4356_v55, %v8285_v38  ;;  %v4785_v55 = vcombine.high %v13745_v33, %v13409_v4  ;;  %v13748_v33 = vld [vmem:[#allocation134_spill] sm:$0xff]  ;;  %v13753_v28 = vld [vmem:[#allocation79_spill] sm:$0xff] }
 0x46c   : > { %v10569_v18 = vrot.slane %v4765_v19, %v8290_v57  ;;  %v10572_v15 = vrot.slane %v4341_v56, %v8285_v38  ;;  %v10590_v56 = vrot.slane %v3719_v30, %v8290_v57  ;;  %v4051_v9 = vcombine.high %v13753_v28, %v13409_v4  ;;  %v13756_v28 = vld [vmem:[#allocation135_spill] sm:$0xff] }
 0x46d   : > { %v10535_v0 = vpop.permute.xlu0 %4216  ;;  %v10537_v40 = vpop.permute.xlu1 %5086  ;;  %v10595_v31 = vrot.slane %v4785_v55, %v8285_v38  ;;  %v13752_v55 = vld [vmem:[#allocation85_spill] sm:$0xff] }
 0x46e   : > { %13737 = vst [vmem:[#allocation124_spill] sm:$0xff] %v10535_v0  ;;  %13738 = vst [vmem:[#allocation46_spill] sm:$0xff] %v10537_v40  ;;  %v4800_v40 = vcombine.high %v13741_v36, %v13409_v4  ;;  %v4387_v36 = vcombine.low %v10572_v15, %v10557_v54  ;;  %v10633_v16 = vrot.slane %v4051_v9, %v8285_v38 }
 0x46f   : > { %2715 = vrot.lane.b32.xlu0 %v10540_v34, %s8122_s21  ;;  %4420 = vrot.lane.b32.xlu1 %v10543_v1, %s8122_s21  ;;  %13744 = vst [vmem:[#allocation127_spill] sm:$0xff] %v10569_v18  ;;  %v3671_v1 = vcombine.high %v13752_v55, %v13409_v4 }
 0x470   : > { %v10583_v29 = vrot.slane %v4800_v40, %v8285_v38 }
 0x471   : > { %v10561_v17 = vpop.permute.xlu0 %5114  ;;  %v10563_v0 = vpop.permute.xlu1 %1361 }
 0x472   : > { %13742 = vst [vmem:[#allocation52_spill] sm:$0xff] %v10561_v17  ;;  %13743 = vst [vmem:[#allocation78_spill] sm:$0xff] %v10563_v0  ;;  %v3441_v0 = vcombine.high %v13748_v33, %v13409_v4  ;;  %v4831_v40 = vcombine.low %v10595_v31, %v10583_v29  ;;  %v10609_v33 = vrot.slane %v4387_v36, %v8290_v57 }
 0x473   : > { %3550 = vrot.lane.b32.xlu0 %v10566_v35, %s8122_s21  ;;  %4864 = vrot.lane.b32.xlu1 %v10569_v18, %s8122_s21 }
 0x474   : > { %v10628_v55 = vrot.slane %v4831_v40, %v8290_v57  ;;  %v4180_v40 = vcombine.high %v9900_v39, %v13409_v4 }
 0x475   : > { %v10585_v19 = vpop.permute.xlu0 %1131  ;;  %v10587_v17 = vpop.permute.xlu1 %2029 }
 0x476   : > { %13746 = vst [vmem:[#allocation48_spill] sm:$0xff] %v10585_v19  ;;  %13747 = vst [vmem:[#allocation73_spill] sm:$0xff] %v10587_v17  ;;  %v13749_v19 = vld [vmem:[#allocation84_spill] sm:$0xff] }
 0x477   : > { %3780 = vrot.lane.b32.xlu0 %v10590_v56, %s8122_s21  ;;  %3526 = vrot.lane.b32.xlu1 %v3441_v0, %s8119_s30  ;;  %v4066_v17 = vcombine.high %v13749_v19, %v13409_v4  ;;  %v2589_v0 = vcombine.high %v10456_v20, %v10441_v14 }
 0x479   : > { %v10604_v18 = vpop.permute.xlu0 %2001  ;;  %v10606_v30 = vpop.permute.xlu1 %2473  ;;  %v10621_v19 = vrot.slane %v4066_v17, %v8285_v38  ;;  %v10649_v9 = vrot.slane %v2589_v0, %v8290_v57 }
 0x47a   : > { %13750 = vst [vmem:[#allocation55_spill] sm:$0xff] %v10604_v18  ;;  %13751 = vst [vmem:[#allocation137_spill] sm:$0xff] %v10606_v30  ;;  %v4114_v30 = vcombine.high %v13756_v28, %v13409_v4 }
 0x47b   : > { %4448 = vrot.lane.b32.xlu0 %v10609_v33, %s8122_s21  ;;  %3756 = vrot.lane.b32.xlu1 %v3671_v1, %s8119_s30  ;;  %v2655_v1 = vcombine.high %v10483_v46, %v10463_v27  ;;  %v4097_v14 = vcombine.low %v10633_v16, %v10621_v19  ;;  %v3490_v27 = vcombine.high %v10516_v7, %v10497_v24 }
 0x47c   : > { %v4322_v46 = vcombine.high %v10488_v26, %v10470_v58  ;;  %v3720_v26 = vcombine.high %v10546_v3, %v10529_v49  ;;  %v4766_v58 = vcombine.high %v10521_v8, %v10504_v12 }
 0x47d   : > { %v10623_v18 = vpop.permute.xlu0 %2445  ;;  %v10625_v36 = vpop.permute.xlu1 %1805  ;;  %v10665_v0 = vrot.slane %v2655_v1, %v8290_v57 }
 0x47e   : > { %13754 = vst [vmem:[#allocation51_spill] sm:$0xff] %v10623_v18  ;;  %13755 = vst [vmem:[#allocation60_spill] sm:$0xff] %v10625_v36  ;;  %v13762_v18 = vld [vmem:[#allocation77_spill] sm:$0xff]  ;;  %v10701_v49 = vrot.slane %v3720_v26, %v8290_v57 }
 0x47f   : > { %4892 = vrot.lane.b32.xlu0 %v10628_v55, %s8122_s21  ;;  %4192 = vrot.lane.b32.xlu1 %v4114_v30, %s8123_s27  ;;  %v13759_v30 = vld [vmem:[#allocation80_spill] sm:$0xff] }
 0x480   : > { %v4132_v28 = vcombine.high %v13759_v30, %v13409_v4 }
 0x481   : > { %v10642_v20 = vpop.permute.xlu0 %1139  ;;  %v10644_v17 = vpop.permute.xlu1 %2037 }
 0x482   : > { %13757 = vst [vmem:[#allocation54_spill] sm:$0xff] %v10642_v20  ;;  %13758 = vst [vmem:[#allocation65_spill] sm:$0xff] %v10644_v17  ;;  %v4117_v17 = vcombine.high %v13762_v18, %v13409_v4  ;;  %v4146_v24 = vrot.slane %v4132_v28, %v8285_v38  ;;  %v10686_v18 = vrot.slane %v3490_v27, %v8290_v57 }
 0x483   : > { %4220 = vrot.lane.b32.xlu0 %v4180_v40, %s8123_s27  ;;  %2695 = vrot.lane.b32.xlu1 %v10649_v9, %s8121_s20  ;;  %v10668_v40 = vrot.slane %v4097_v14, %v8290_v57  ;;  %v10689_v14 = vrot.slane %v4322_v46, %v8290_v57  ;;  %v10704_v27 = vrot.slane %v4766_v58, %v8290_v57  ;;  %v13767_v46 = vld [vmem:[#allocation89_spill] sm:$0xff] }
 0x484   : > { %v4131_v30 = vrot.slane %v4117_v17, %v8285_v38  ;;  %v4388_v17 = vcombine.high %v10572_v15, %v10557_v54  ;;  %v4964_v28 = vcombine.high %v13767_v46, %v13409_v4  ;;  %v13775_v15 = vld [vmem:[#allocation87_spill] sm:$0xff] }
 0x485   : > { %v10660_v36 = vpop.permute.xlu0 %1369  ;;  %v10662_v39 = vpop.permute.xlu1 %2481  ;;  %v4949_v54 = vcombine.high %v13775_v15, %v13409_v4 }
 0x486   : > { %13760 = vst [vmem:[#allocation59_spill] sm:$0xff] %v10660_v36  ;;  %13761 = vst [vmem:[#allocation134_spill] sm:$0xff] %v10662_v39  ;;  %v4163_v3 = vcombine.low %v4131_v30, %v4146_v24 }
 0x487   : > { %2723 = vrot.lane.b32.xlu0 %v10665_v0, %s8121_s20  ;;  %4196 = vrot.lane.b32.xlu1 %v10668_v40, %s8122_s21  ;;  %v4963_v15 = vrot.slane %v4949_v54, %v8285_v38  ;;  %v4164_v54 = vcombine.high %v4131_v30, %v4146_v24 }
 0x488   : > { %v10725_v36 = vrot.slane %v4163_v3, %v8290_v57 }
 0x489   : > { %v10681_v7 = vpop.permute.xlu0 %1777  ;;  %v10683_v1 = vpop.permute.xlu1 %1143  ;;  %v10777_v30 = vrot.slane %v4164_v54, %v8290_v57 }
 0x48a   : > { %13763 = vst [vmem:[#allocation84_spill] sm:$0xff] %v10681_v7  ;;  %13764 = vst [vmem:[#allocation85_spill] sm:$0xff] %v10683_v1  ;;  %v13769_v7 = vld [vmem:[#allocation91_spill] sm:$0xff]  ;;  %v13774_v1 = vld [vmem:[#allocation138_spill] sm:$0xff] }
 0x48b   : > { %3558 = vrot.lane.b32.xlu0 %v10686_v18, %s8121_s20  ;;  %4428 = vrot.lane.b32.xlu1 %v10689_v14, %s8121_s20  ;;  %v3672_v20 = vcombine.high %v13774_v1, %v13409_v4 }
 0x48d   : > { %v10696_v8 = vpop.permute.xlu0 %2009  ;;  %v10698_v12 = vpop.permute.xlu1 %1373 }
 0x48e   : > { %13765 = vst [vmem:[#allocation79_spill] sm:$0xff] %v10696_v8  ;;  %13766 = vst [vmem:[#allocation135_spill] sm:$0xff] %v10698_v12  ;;  %v13768_v8 = vld [vmem:[#allocation90_spill] sm:$0xff] }
 0x48f   : > { %3788 = vrot.lane.b32.xlu0 %v10701_v49, %s8121_s20  ;;  %4872 = vrot.lane.b32.xlu1 %v10704_v27, %s8121_s20  ;;  %v13770_v26 = vcombine.low %v13768_v8, %v13769_v7  ;;  %v4832_v7 = vcombine.high %v10595_v31, %v10583_v29  ;;  %v4978_v8 = vrot.slane %v4964_v28, %v8285_v38 }
 0x491   : > { %v10718_v39 = vrot.slane %v13770_v26, %v8290_v57  ;;  %v10720_v58 = vpop.permute.xlu0 %2453  ;;  %v10722_v12 = vpop.permute.xlu1 %2041  ;;  %v10742_v26 = vrot.slane %v4388_v17, %v8290_v57  ;;  %v4995_v31 = vcombine.low %v4963_v15, %v4978_v8  ;;  %v10755_v28 = vrot.slane %v4832_v7, %v8290_v57 }
 0x492   : > { %13772 = vst [vmem:[#allocation77_spill] sm:$0xff] %v10720_v58  ;;  %13773 = vst [vmem:[#allocation89_spill] sm:$0xff] %v10722_v12  ;;  %v5012_v17 = vcombine.high %v9903_v2, %v13409_v4  ;;  %v4098_v2 = vcombine.high %v10633_v16, %v10621_v19  ;;  %v13783_v16 = vld [vmem:[#allocation11_spill] sm:$0xff]  ;;  %v13784_v19 = vld [vmem:[#allocation12_spill] sm:$0xff] }
 0x493   : > { %13771 = vst [vmem:[#allocation80_spill] sm:$0xff] %v10718_v39  ;;  %4224 = vrot.lane.b32.xlu0 %v10725_v36, %s8122_s21  ;;  %3764 = vrot.lane.b32.xlu1 %v3672_v20, %s8120_s16  ;;  %v5011_v1 = vcombine.high %v10718_v39, %v13409_v4  ;;  %v4996_v39 = vcombine.high %v4963_v15, %v4978_v8  ;;  %v13788_v12 = vld [vmem:[#allocation83_spill] sm:$0xff] }
 0x495   : > { %v10737_v46 = vpop.permute.xlu0 %2013  ;;  %v10739_v3 = vpop.permute.xlu1 %2485  ;;  %v10780_v8 = vrot.slane %v4996_v39, %v8290_v57  ;;  %v10799_v39 = vrot.slane %v4098_v2, %v8290_v57 }
 0x496   : > { %13776 = vst [vmem:[#allocation90_spill] sm:$0xff] %v10737_v46  ;;  %13777 = vst [vmem:[#allocation91_spill] sm:$0xff] %v10739_v3  ;;  %v1100_v3 = vcombine.high %v10098_v50, %v13409_v4 }
 0x497   : > { %4456 = vrot.lane.b32.xlu0 %v10742_v26, %s8121_s20  ;;  %5082 = vrot.lane.b32.xlu1 %v5011_v1, %s8125_s7 }
 0x499   : > { %v10750_v29 = vpop.permute.xlu0 %2457  ;;  %v10752_v20 = vpop.permute.xlu1 %1813 }
 0x49a   : > { %13778 = vst [vmem:[#allocation138_spill] sm:$0xff] %v10750_v29  ;;  %13779 = vst [vmem:[#allocation87_spill] sm:$0xff] %v10752_v20  ;;  %v13780_v29 = vld [vmem:[#allocation136_spill] sm:$0xff]  ;;  %v10767_v20 = vrot.slane %v4995_v31, %v8290_v57  ;;  %v13785_v31 = vcombine.low %v13783_v16, %v13784_v19 }
 0x49b   : > { %4900 = vrot.lane.b32.xlu0 %v10755_v28, %s8121_s20  ;;  %5090 = vrot.lane.b32.xlu1 %v5012_v17, %s8123_s27  ;;  %v3442_v46 = vcombine.high %v13780_v29, %v13409_v4 }
 0x49c   : > { %v10792_v29 = vrot.slane %v13785_v31, %v8290_v57 }
 0x49d   : > { %v1120_v58 = vpop.permute.xlu0 %1119  ;;  %v10762_v1 = vpop.permute.xlu1 %1151 }
 0x49e   : > { %v5077_v50 = vcombine.high %v10792_v29, %v13409_v4 }
 0x49f   : > { %3534 = vrot.lane.b32.xlu0 %v3442_v46, %s8120_s16  ;;  %5094 = vrot.lane.b32.xlu1 %v10767_v20, %s8122_s21  ;;  %v13782_v46 = vld [vmem:[#allocation88_spill] sm:$0xff] }
 0x4a0   : > { %v5030_v15 = vcombine.high %v13782_v46, %v13409_v4  ;;  %13786 = vst [vmem:[#allocation88_spill] sm:$0xff] %v10792_v29  ;;  %v13789_v46 = vld [vmem:[#allocation110_spill] sm:$0xff] }
 0x4a1   : > { %v1350_v7 = vpop.permute.xlu0 %1349  ;;  %v10774_v24 = vpop.permute.xlu1 %1381  ;;  %v1388_v16 = vsel %vm927_vm6, %v13789_v46, %v10232_v5  ;;  %v13791_v5 = vld [vmem:[#allocation23_spill] sm:$0xff] }
 0x4a2   : > { %13781 = vst [vmem:[#allocation136_spill] sm:$0xff] %v10774_v24  ;;  %v5015_v24 = vcombine.high %v13788_v12, %v13409_v4  ;;  %v5044_v19 = vrot.slane %v5030_v15, %v8285_v38  ;;  %v1330_v12 = vcombine.high %v10127_v47, %v13409_v4  ;;  %v1158_v15 = vsel %vm927_vm6, %v13791_v5, %v10217_v44  ;;  %v13792_v5 = vld [vmem:[#allocation121_spill] sm:$0xff] }
 0x4a3   : > { %4232 = vrot.lane.b32.xlu0 %v10777_v30, %s8121_s20  ;;  %5102 = vrot.lane.b32.xlu1 %v10780_v8, %s8121_s20  ;;  %v1159_v44 = vsel %vm929_vm7, %v1158_v15, %v10166_v45  ;;  %v2442_v45 = vcombine.high %v10172_v43, %v13409_v4 }
 0x4a5   : > { %v10794_v17 = vpop.permute.xlu0 %1785  ;;  %v10796_v54 = vpop.permute.xlu1 %1817 }
 0x4a6   : > { %13787 = vst [vmem:[#allocation11_spill] sm:$0xff] %v10796_v54  ;;  %v5029_v54 = vrot.slane %v5015_v24, %v8285_v38 }
 0x4a7   : > { %4204 = vrot.lane.b32.xlu0 %v10799_v39, %s8121_s20  ;;  %1147 = vrot.lane.b32.xlu1 %v1100_v3, %s8119_s30  ;;  %v1389_v3 = vsel %vm929_vm7, %v1388_v16, %v10184_v25  ;;  %v5078_v25 = vcombine.high %v9931_v59, %v13409_v4  ;;  %v1998_v16 = vcombine.high %v10154_v61, %v13409_v4 }
 0x4a8   : > { %v1390_v46 = vsel %vm931_vm8, %v1389_v3, %v10302_v41  ;;  %v5061_v29 = vcombine.low %v5029_v54, %v5044_v19  ;;  %v5062_v41 = vcombine.high %v5029_v54, %v5044_v19  ;;  %v13793_v54 = vld [vmem:[#allocation56_spill] sm:$0xff] }
 0x4a9   : > { %v10812_v31 = vpop.permute.xlu0 %1789  ;;  %v10814_v2 = vpop.permute.xlu1 %2049  ;;  %v1391_v47 = vsel %vm933_vm9, %v1390_v46, %v10342_v51  ;;  %v1160_v51 = vsel %vm931_vm8, %v1159_v44, %v10284_v62  ;;  %v4009_v19 = vsel %vm927_vm6, %v13793_v54, %v13792_v5 }
 0x4aa   : > { %13790 = vst [vmem:[#allocation12_spill] sm:$0xff] %v10812_v31  ;;  %v10854_v3 = vrot.slane %v5061_v29, %v8290_v57 }
 0x4ab   : > { %5110 = vrot.lane.b32.xlu0 %v5077_v50, %s8125_s7  ;;  %1377 = vrot.lane.b32.xlu1 %v1330_v12, %s8119_s30  ;;  %v1392_v50 = vsel %vm935_vm10, %v1391_v47, %v1350_v7  ;;  %v1161_v12 = vsel %vm933_vm9, %v1160_v51, %v10318_v32  ;;  %v13797_v51 = vld [vmem:[#allocation129_spill] sm:$0xff] }
 0x4ac   : > { %v1393_v61 = vsel %vm937_vm11, %v1392_v50, %v10392_v22  ;;  %v1162_v62 = vsel %vm935_vm10, %v1161_v12, %v1120_v58  ;;  %v13794_v22 = vld [vmem:[#allocation101_spill] sm:$0xff]  ;;  %v10873_v58 = vrot.slane %v5062_v41, %v8290_v57  ;;  %v13796_v50 = vld [vmem:[#allocation16_spill] sm:$0xff] }
 0x4ad   : > { %v10832_v31 = vpop.permute.xlu0 %2021  ;;  %v10834_v24 = vpop.permute.xlu1 %2493  ;;  %v4010_v29 = vsel %vm929_vm7, %v4009_v19, %v13794_v22  ;;  %v1163_v43 = vsel %vm937_vm11, %v1162_v62, %v10376_v6  ;;  %v13799_v41 = vld [vmem:[#allocation93_spill] sm:$0xff]  ;;  %v1932_v62 = vcombine.high %v10169_v21, %v13409_v4 }
 0x4ae   : > { %v4011_v12 = vsel %vm931_vm8, %v4010_v29, %v13797_v51  ;;  %v13801_v29 = vld [vmem:[#allocation104_spill] sm:$0xff]  ;;  %v1774_v51 = vcombine.high %v10239_v52, %v13409_v4  ;;  %v1999_v52 = vcombine.high %v10256_v53, %v13409_v4 }
 0x4af   : > { %5118 = vrot.lane.b32.xlu0 %v5078_v25, %s8123_s27  ;;  %2045 = vrot.lane.b32.xlu1 %v1998_v16, %s8119_s30  ;;  %v1101_v25 = vcombine.high %v10208_v23, %v13409_v4  ;;  %v13795_v16 = vld [vmem:[#allocation100_spill] sm:$0xff] }
 0x4b0   : > { %v3341_v44 = vsel %vm927_vm6, %v13796_v50, %v13795_v16 }
 0x4b1   : > { %v10849_v59 = vpop.permute.xlu0 %2465  ;;  %v1358_v7 = vpop.permute.xlu1 %1357  ;;  %v3342_v5 = vsel %vm929_vm7, %v3341_v44, %v13799_v41  ;;  %v2376_v44 = vcombine.high %v10187_v48, %v13409_v4  ;;  %v1709_v48 = vcombine.high %v10347_v42, %v13409_v4 }
 0x4b2   : > { %v1394_v32 = vsel %vm939_vm12, %v1393_v61, %v1358_v7  ;;  %v13798_v7 = vld [vmem:[#allocation132_spill] sm:$0xff] }
 0x4b3   : > { %v1404_v15 = vrot.slane %v1394_v32, 4  ;;  %5122 = vrot.lane.b32.xlu0 %v10854_v3, %s8122_s21  ;;  %2489 = vrot.lane.b32.xlu1 %v2442_v45, %s8119_s30  ;;  %v4012_v6 = vsel %vm933_vm9, %v4011_v12, %v13798_v7  ;;  %v1331_v32 = vcombine.high %v10224_v37, %v13409_v4  ;;  %v13804_v12 = vld [vmem:[#allocation105_spill] sm:$0xff] }
 0x4b4   : > { %v4013_v23 = vsel %vm935_vm10, %v4012_v6, %v10093_v63  ;;  %v13805_v6 = vld [vmem:[#allocation139_spill] sm:$0xff] }
 0x4b5   : > { %1408 = vst [vmem:[#allocation4] sm:$0x30] %v1404_v15  ;;  %v1128_v46 = vpop.permute.xlu0 %1127  ;;  %v10870_v47 = vpop.permute.xlu1 %3538  ;;  %v13800_v15 = vld [vmem:[#allocation102_spill] sm:$0xff] }
 0x4b6   : > { %v1164_v61 = vsel %vm939_vm12, %v1163_v43, %v1128_v46  ;;  %v3343_v22 = vsel %vm931_vm8, %v3342_v5, %v13800_v15  ;;  %v13802_v46 = vld [vmem:[#allocation62_spill] sm:$0xff]  ;;  %v2443_v15 = vcombine.high %v10272_v10, %v13409_v4 }
 0x4b7   : > { %v1174_v45 = vrot.slane %v1164_v61, 6  ;;  %5130 = vrot.lane.b32.xlu0 %v10873_v58, %s8121_s20  ;;  %1155 = vrot.lane.b32.xlu1 %v1101_v25, %s8120_s16  ;;  %v3344_v63 = vsel %vm933_vm9, %v3343_v22, %v13801_v29  ;;  %v4014_v43 = vsel %vm937_vm11, %v4013_v23, %v13802_v46  ;;  %v13803_v25 = vld [vmem:[#allocation82_spill] sm:$0xff]  ;;  %v3507_v22 = vcombine.high %v10566_v35, %v13409_v4 }
 0x4b8   : > { %v3345_v16 = vsel %vm935_vm10, %v3344_v63, %v13803_v25  ;;  %v4015_v21 = vsel %vm939_vm12, %v4014_v43, %v10147_v13  ;;  %v1708_v29 = vcombine.high %v10253_v60, %v13409_v4  ;;  %v3737_v63 = vcombine.high %v10590_v56, %v13409_v4  ;;  %v13806_v25 = vld [vmem:[#allocation19_spill] sm:$0xff] }
 0x4b9   : > { %1178 = vst [vmem:[#allocation4] sm:$0xc] %v1174_v45  ;;  %v10892_v54 = vpop.permute.xlu0 %1825  ;;  %v10894_v19 = vpop.permute.xlu1 %2675  ;;  %v3346_v61 = vsel %vm937_vm11, %v3345_v16, %v13804_v12  ;;  %v4025_v7 = vrot.slane %v4015_v21, 2  ;;  %v1933_v46 = vcombine.high %v10269_v11, %v13409_v4  ;;  %v4405_v43 = vcombine.high %v10609_v33, %v13409_v4 }
 0x4ba   : > { %v3347_v13 = vsel %vm939_vm12, %v3346_v61, %v13805_v6  ;;  %v2377_v16 = vcombine.high %v13806_v25, %v13409_v4  ;;  %v4849_v21 = vcombine.high %v10628_v55, %v13409_v4  ;;  %v2673_v61 = vcombine.high %v10665_v0, %v13409_v4 }
 0x4bb   : > { %2017 = vrot.lane.b32.xlu0 %v1932_v62, %s8119_s30  ;;  %1385 = vrot.lane.b32.xlu1 %v1331_v32, %s8120_s16  ;;  %v2672_v32 = vcombine.high %v10540_v34, %v13409_v4  ;;  %v2607_v25 = vcombine.high %v10649_v9, %v13409_v4 }
 0x4bd   : > { %v10912_v37 = vpop.permute.xlu0 %1797  ;;  %v10914_v50 = vpop.permute.xlu1 %4408 }
 0x4bf   : > { %2461 = vrot.lane.b32.xlu0 %v2376_v44, %s8119_s30  ;;  %1821 = vrot.lane.b32.xlu1 %v1774_v51, %s8119_s30  ;;  %v13807_v44 = vld [vmem:[#allocation113_spill] sm:$0xff] }
 0x4c0   : > { %v10926_v45 = vld [vmem:[#allocation4] sm:$0xff]  ;;  %v1775_v51 = vcombine.high %v13807_v44, %v13409_v4  ;;  %v4115_v44 = vcombine.high %v10668_v40, %v13409_v4 }
 0x4c1   : > { %v10928_v23 = vpop.permute.xlu0 %2703  ;;  %v10930_v41 = vpop.permute.xlu1 %4852  ;;  %3355 = vst [vmem:[#allocation4] sm:$0x3] %v3347_v13  ;;  %4029 = vst [vmem:[#allocation4] sm:$0xc0] %v4025_v7  ;;  %v13808_v7 = vld [vmem:[#allocation74_spill] sm:$0xff] }
 0x4c2   : > { %v2606_v6 = vcombine.high %v13808_v7, %v13409_v4  ;;  %v4116_v7 = vcombine.high %v10799_v39, %v13409_v4 }
 0x4c3   : > { %1801 = vrot.lane.b32.xlu0 %v1709_v48, %s8120_s16  ;;  %2053 = vrot.lane.b32.xlu1 %v1999_v52, %s8120_s16  ;;  %v3508_v48 = vcombine.high %v10686_v18, %v13409_v4  ;;  %v13809_v52 = vld [vmem:[#allocation69_spill] sm:$0xff] }
 0x4c5   : > { %v10938_v5 = vpop.permute.xlu0 %3768  ;;  %v10940_v62 = vpop.permute.xlu1 %3546 }
 0x4c7   : > { %2719 = vrot.lane.b32.xlu0 %v2672_v32, %s8119_s30  ;;  %2497 = vrot.lane.b32.xlu1 %v2443_v15, %s8120_s16  ;;  %v4339_v32 = vcombine.high %v13809_v52, %v13409_v4  ;;  %v4182_v52 = vcombine.high %v10777_v30, %v13409_v4  ;;  %v13814_v30 = vld [vmem:[#allocation120_spill] sm:$0xff] }
 0x4c9   : > { %v10948_v53 = vpop.permute.xlu0 %4436  ;;  %v10950_v42 = vpop.permute.xlu1 %3776 }
 0x4cb   : > { %3554 = vrot.lane.b32.xlu0 %v3507_v22, %s8119_s30  ;;  %1793 = vrot.lane.b32.xlu1 %v1708_v29, %s8119_s30  ;;  %v3738_v22 = vcombine.high %v10701_v49, %v13409_v4  ;;  %v13810_v29 = vld [vmem:[#allocation127_spill] sm:$0xff] }
 0x4cd   : > { %v10958_v34 = vpop.permute.xlu0 %4880  ;;  %v10960_v10 = vpop.permute.xlu1 %2683 }
 0x4cf   : > { %3784 = vrot.lane.b32.xlu0 %v3737_v63, %s8119_s30  ;;  %2025 = vrot.lane.b32.xlu1 %v1933_v46, %s8120_s16  ;;  %v4783_v63 = vcombine.high %v13810_v29, %v13409_v4 }
 0x4d1   : > { %v10968_v35 = vpop.permute.xlu0 %2711  ;;  %v10970_v60 = vpop.permute.xlu1 %4184 }
 0x4d3   : > { %4452 = vrot.lane.b32.xlu0 %v4405_v43, %s8119_s30  ;;  %2469 = vrot.lane.b32.xlu1 %v2377_v16, %s8120_s16  ;;  %v4181_v43 = vcombine.high %v10725_v36, %v13409_v4 }
 0x4d5   : > { %v10978_v56 = vpop.permute.xlu0 %4212  ;;  %v10980_v11 = vpop.permute.xlu1 %4416 }
 0x4d7   : > { %4896 = vrot.lane.b32.xlu0 %v4849_v21, %s8119_s30  ;;  %1829 = vrot.lane.b32.xlu1 %v1775_v51, %s8120_s16  ;;  %v4406_v21 = vcombine.high %v10742_v26, %v13409_v4  ;;  %v4850_v51 = vcombine.high %v10755_v28, %v13409_v4 }
 0x4d9   : > { %v10988_v33 = vpop.permute.xlu0 %4444  ;;  %v10990_v12 = vpop.permute.xlu1 %4860 }
 0x4db   : > { %2727 = vrot.lane.b32.xlu0 %v2673_v61, %s8120_s16  ;;  %2691 = vrot.lane.b32.xlu1 %v2606_v6, %s8119_s30  ;;  %v4340_v61 = vcombine.high %v10689_v14, %v13409_v4  ;;  %v4784_v6 = vcombine.high %v10704_v27, %v13409_v4 }
 0x4dd   : > { %v10998_v55 = vpop.permute.xlu0 %4888  ;;  %v11000_v13 = vpop.permute.xlu1 %2687 }
 0x4df   : > { %3562 = vrot.lane.b32.xlu0 %v3508_v48, %s8120_s16  ;;  %4424 = vrot.lane.b32.xlu1 %v4339_v32, %s8119_s30  ;;  %v5079_v48 = vcombine.high %v10854_v3, %v13409_v4  ;;  %v5080_v32 = vcombine.high %v10873_v58, %v13409_v4  ;;  %v13813_v3 = vld [vmem:[#allocation25_spill] sm:$0xff] }
 0x4e0   : > { %v3795_v29 = vsel %vm927_vm6, %v13814_v30, %v13813_v3 }
 0x4e1   : > { %v11008_v0 = vpop.permute.xlu0 %2715  ;;  %v11010_v15 = vpop.permute.xlu1 %4420 }
 0x4e3   : > { %3792 = vrot.lane.b32.xlu0 %v3738_v22, %s8120_s16  ;;  %4868 = vrot.lane.b32.xlu1 %v4783_v63, %s8119_s30  ;;  %v5013_v22 = vcombine.high %v10767_v20, %v13409_v4  ;;  %v13817_v20 = vld [vmem:[#allocation45_spill] sm:$0xff] }
 0x4e5   : > { %v11018_v18 = vpop.permute.xlu0 %3550  ;;  %v11020_v46 = vpop.permute.xlu1 %4864 }
 0x4e7   : > { %4228 = vrot.lane.b32.xlu0 %v4181_v43, %s8119_s30  ;;  %2699 = vrot.lane.b32.xlu1 %v2607_v25, %s8120_s16  ;;  %v5014_v25 = vcombine.high %v10780_v8, %v13409_v4  ;;  %v13821_v8 = vld [vmem:[#allocation49_spill] sm:$0xff] }
 0x4e8   : > { %v13843_v4 = vld [vmem:[#allocation85_spill] sm:$0xff] }
 0x4e9   : > { %v11028_v49 = vpop.permute.xlu0 %3780  ;;  %v3527_v16 = vpop.permute.xlu1 %3526 }
 0x4eb   : > { %4460 = vrot.lane.b32.xlu0 %v4406_v21, %s8120_s16  ;;  %4200 = vrot.lane.b32.xlu1 %v4115_v44, %s8119_s30  ;;  %v13816_v21 = vld [vmem:[#allocation107_spill] sm:$0xff] }
 0x4ec   : > { %v3796_v58 = vsel %vm929_vm7, %v3795_v29, %v13816_v21  ;;  %v13822_v29 = vld [vmem:[#allocation109_spill] sm:$0xff] }
 0x4ed   : > { %v11036_v36 = vpop.permute.xlu0 %4448  ;;  %v3757_v9 = vpop.permute.xlu1 %3756  ;;  %v3797_v44 = vsel %vm931_vm8, %v3796_v58, %v13817_v20 }
 0x4ef   : > { %4904 = vrot.lane.b32.xlu0 %v4850_v51, %s8120_s16  ;;  %4432 = vrot.lane.b32.xlu1 %v4340_v61, %s8120_s16  ;;  %v13818_v51 = vld [vmem:[#allocation76_spill] sm:$0xff] }
 0x4f0   : > { %v3798_v61 = vsel %vm933_vm9, %v3797_v44, %v13818_v51  ;;  %v13825_v44 = vld [vmem:[#allocation40_spill] sm:$0xff]  ;;  %v13826_v51 = vld [vmem:[#allocation115_spill] sm:$0xff] }
 0x4f1   : > { %v11044_v26 = vpop.permute.xlu0 %4892  ;;  %v11046_v40 = vpop.permute.xlu1 %4192 }
 0x4f3   : > { %4208 = vrot.lane.b32.xlu0 %v4116_v7, %s8120_s16  ;;  %4876 = vrot.lane.b32.xlu1 %v4784_v6, %s8120_s16 }
 0x4f5   : > { %v11054_v28 = vpop.permute.xlu0 %4220  ;;  %v11056_v14 = vpop.permute.xlu1 %2695 }
 0x4f6   : > { %13811 = vst [vmem:[#allocation83_spill] sm:$0xff] %v11054_v28 }
 0x4f7   : > { %5126 = vrot.lane.b32.xlu0 %v5079_v48, %s8119_s30  ;;  %4236 = vrot.lane.b32.xlu1 %v4182_v52, %s8120_s16  ;;  %v3799_v48 = vsel %vm935_vm10, %v3798_v61, %v3757_v9 }
 0x4f9   : > { %v11064_v39 = vpop.permute.xlu0 %2723  ;;  %v11066_v27 = vpop.permute.xlu1 %4196 }
 0x4fa   : > { %13812 = vst [vmem:[#allocation110_spill] sm:$0xff] %v11066_v27  ;;  %v13879_v27 = vld [vmem:[#allocation42_spill] sm:$0xff] }
 0x4fb   : > { %5134 = vrot.lane.b32.xlu0 %v5080_v32, %s8120_s16  ;;  %5098 = vrot.lane.b32.xlu1 %v5013_v22, %s8119_s30  ;;  %v3800_v32 = vsel %vm937_vm11, %v3799_v48, %v13821_v8  ;;  %v13827_v48 = vld [vmem:[#allocation71_spill] sm:$0xff] }
 0x4fd   : > { %v11077_v63 = vpop.permute.xlu0 %3558  ;;  %v11079_v43 = vpop.permute.xlu1 %4428 }
 0x4fe   : > { %13815 = vst [vmem:[#allocation23_spill] sm:$0xff] %v11079_v43  ;;  %v13855_v43 = vld [vmem:[#allocation123_spill] sm:$0xff] }
 0x4ff   : > { %5106 = vrot.lane.b32.xlu1 %v5014_v25, %s8120_s16  ;;  %v13823_v25 = vld [vmem:[#allocation117_spill] sm:$0xff] }
 0x500   : > { %v3565_v21 = vsel %vm927_vm6, %v13823_v25, %v13822_v29  ;;  %v13830_v25 = vld [vmem:[#allocation133_spill] sm:$0xff] }
 0x501   : > { %v11090_v7 = vpop.permute.xlu0 %3788  ;;  %v11092_v6 = vpop.permute.xlu1 %4872  ;;  %v3566_v9 = vsel %vm929_vm7, %v3565_v21, %v13825_v44 }
 0x502   : > { %13819 = vst [vmem:[#allocation121_spill] sm:$0xff] %v11092_v6  ;;  %v3567_v61 = vsel %vm931_vm8, %v3566_v9, %v13826_v51 }
 0x503   : > { %v3568_v8 = vsel %vm933_vm9, %v3567_v61, %v13827_v48 }
 0x505   : > { %v11095_v52 = vpop.permute.xlu0 %4224  ;;  %v3765_v22 = vpop.permute.xlu1 %3764 }
 0x506   : > { %13820 = vst [vmem:[#allocation56_spill] sm:$0xff] %v11095_v52  ;;  %v3801_v3 = vsel %vm939_vm12, %v3800_v32, %v3765_v22 }
 0x507   : > { %v3811_v30 = vrot.slane %v3801_v3, 4  ;;  %v3569_v3 = vsel %vm935_vm10, %v3568_v8, %v3527_v16  ;;  %v13836_v8 = vld [vmem:[#allocation48_spill] sm:$0xff] }
 0x508   : > { %v3570_v57 = vsel %vm937_vm11, %v3569_v3, %v13830_v25 }
 0x509   : > { %v11103_v58 = vpop.permute.xlu0 %4456  ;;  %v11105_v20 = vpop.permute.xlu1 %5082  ;;  %3815 = vst [vmem:[#allocation4] sm:$0x30] %v3811_v30 }
 0x50a   : > { %13824 = vst [vmem:[#allocation101_spill] sm:$0xff] %v11105_v20 }
 0x50d   : > { %v11113_v32 = vpop.permute.xlu0 %4900  ;;  %v11115_v22 = vpop.permute.xlu1 %5090 }
 0x50e   : > { %13828 = vst [vmem:[#allocation100_spill] sm:$0xff] %v11113_v32  ;;  %13829 = vst [vmem:[#allocation16_spill] sm:$0xff] %v11115_v22  ;;  %v13837_v22 = vld [vmem:[#allocation140_spill] sm:$0xff] }
 0x50f   : > { %v1165_v3 = vsel %vm927_vm6, %v13837_v22, %v13836_v8  ;;  %v13845_v8 = vld [vmem:[#allocation96_spill] sm:$0xff] }
 0x511   : > { %v3535_v29 = vpop.permute.xlu0 %3534  ;;  %v11120_v30 = vpop.permute.xlu1 %5094 }
 0x512   : > { %13831 = vst [vmem:[#allocation129_spill] sm:$0xff] %v11120_v30  ;;  %v3571_v21 = vsel %vm939_vm12, %v3570_v57, %v3535_v29  ;;  %v13839_v57 = vld [vmem:[#allocation106_spill] sm:$0xff] }
 0x513   : > { %v3581_v44 = vrot.slane %v3571_v21, 6  ;;  %v1166_v29 = vsel %vm929_vm7, %v1165_v3, %v13839_v57  ;;  %v13840_v21 = vld [vmem:[#allocation78_spill] sm:$0xff]  ;;  %v13847_v57 = vld [vmem:[#allocation135_spill] sm:$0xff] }
 0x515   : > { %v11123_v38 = vpop.permute.xlu0 %4232  ;;  %v11125_v9 = vpop.permute.xlu1 %5102  ;;  %3585 = vst [vmem:[#allocation4] sm:$0xc] %v3581_v44 }
 0x516   : > { %13832 = vst [vmem:[#allocation132_spill] sm:$0xff] %v11123_v38  ;;  %13833 = vst [vmem:[#allocation93_spill] sm:$0xff] %v11125_v9  ;;  %v13841_v38 = vld [vmem:[#allocation33_spill] sm:$0xff]  ;;  %v13842_v9 = vld [vmem:[#allocation54_spill] sm:$0xff] }
 0x517   : > { %v1395_v44 = vsel %vm927_vm6, %v13841_v38, %v13840_v21  ;;  %v1167_v20 = vsel %vm931_vm8, %v1166_v29, %v13842_v9  ;;  %v13850_v29 = vld [vmem:[#allocation47_spill] sm:$0xff] }
 0x518   : > { %v1168_v6 = vsel %vm933_vm9, %v1167_v20, %v13843_v4  ;;  %v13849_v20 = vld [vmem:[#allocation114_spill] sm:$0xff] }
 0x519   : > { %v11127_v51 = vpop.permute.xlu0 %4204  ;;  %v1148_v61 = vpop.permute.xlu1 %1147 }
 0x51a   : > { %13834 = vst [vmem:[#allocation102_spill] sm:$0xff] %v11127_v51  ;;  %v1169_v22 = vsel %vm935_vm10, %v1168_v6, %v1148_v61 }
 0x51b   : > { %v1170_v9 = vsel %vm937_vm11, %v1169_v22, %v10762_v1  ;;  %v13854_v1 = vld [vmem:[#allocation136_spill] sm:$0xff] }
 0x51d   : > { %v11129_v48 = vpop.permute.xlu0 %5110  ;;  %v1378_v16 = vpop.permute.xlu1 %1377 }
 0x51e   : > { %13835 = vst [vmem:[#allocation104_spill] sm:$0xff] %v11129_v48  ;;  %v13846_v48 = vld [vmem:[#allocation59_spill] sm:$0xff] }
 0x521   : > { %v11134_v25 = vpop.permute.xlu0 %5118  ;;  %v2046_v30 = vpop.permute.xlu1 %2045 }
 0x522   : > { %13838 = vst [vmem:[#allocation62_spill] sm:$0xff] %v11134_v25  ;;  %v1396_v25 = vsel %vm929_vm7, %v1395_v44, %v13845_v8  ;;  %v13851_v8 = vld [vmem:[#allocation73_spill] sm:$0xff] }
 0x523   : > { %v1397_v3 = vsel %vm931_vm8, %v1396_v25, %v13846_v48  ;;  %v13852_v48 = vld [vmem:[#allocation95_spill] sm:$0xff] }
 0x524   : > { %v1398_v38 = vsel %vm933_vm9, %v1397_v3, %v13847_v57  ;;  %v2063_v25 = vsel %vm927_vm6, %v13852_v48, %v13851_v8  ;;  %v13853_v3 = vld [vmem:[#allocation97_spill] sm:$0xff]  ;;  %v13859_v8 = vld [vmem:[#allocation26_spill] sm:$0xff]  ;;  %v13860_v48 = vld [vmem:[#allocation92_spill] sm:$0xff] }
 0x525   : > { %v11145_v51 = vpop.permute.xlu0 %5122  ;;  %v2490_v52 = vpop.permute.xlu1 %2489  ;;  %v1399_v6 = vsel %vm935_vm10, %v1398_v38, %v1378_v16  ;;  %v13857_v38 = vld [vmem:[#allocation126_spill] sm:$0xff] }
 0x526   : > { %13844 = vst [vmem:[#allocation82_spill] sm:$0xff] %v11145_v51  ;;  %v4016_v51 = vsel %vm927_vm6, %v13850_v29, %v13849_v20  ;;  %v1400_v22 = vsel %vm937_vm11, %v1399_v6, %v13854_v1  ;;  %v13856_v20 = vld [vmem:[#allocation66_spill] sm:$0xff]  ;;  %v13858_v29 = vld [vmem:[#allocation128_spill] sm:$0xff]  ;;  %v13862_v1 = vld [vmem:[#allocation17_spill] sm:$0xff] }
 0x527   : > { %v4017_v57 = vsel %vm929_vm7, %v4016_v51, %v13853_v3  ;;  %v3348_v16 = vsel %vm927_vm6, %v13856_v20, %v13855_v43  ;;  %v2064_v51 = vsel %vm929_vm7, %v2063_v25, %v13859_v8  ;;  %v13861_v3 = vld [vmem:[#allocation137_spill] sm:$0xff]  ;;  %v13867_v8 = vld [vmem:[#allocation58_spill] sm:$0xff] }
 0x528   : > { %v2507_v32 = vsel %vm927_vm6, %v13862_v1, %v13861_v3  ;;  %v13863_v43 = vld [vmem:[#allocation65_spill] sm:$0xff]  ;;  %v13868_v3 = vld [vmem:[#allocation63_spill] sm:$0xff]  ;;  %v13869_v1 = vld [vmem:[#allocation108_spill] sm:$0xff] }
 0x529   : > { %v11154_v21 = vpop.permute.xlu0 %5130  ;;  %v1156_v4 = vpop.permute.xlu1 %1155  ;;  %v2065_v20 = vsel %vm931_vm8, %v2064_v51, %v13863_v43  ;;  %v13870_v43 = vld [vmem:[#allocation14_spill] sm:$0xff] }
 0x52a   : > { %13848 = vst [vmem:[#allocation105_spill] sm:$0xff] %v11154_v21  ;;  %v1171_v61 = vsel %vm939_vm12, %v1170_v9, %v1156_v4  ;;  %v4018_v9 = vsel %vm931_vm8, %v4017_v57, %v13857_v38  ;;  %v13864_v57 = vld [vmem:[#allocation103_spill] sm:$0xff] }
 0x52b   : > { %v1175_v44 = vrot.slane %v1171_v61, 6  ;;  %v4019_v61 = vsel %vm933_vm9, %v4018_v9, %v13858_v29 }
 0x52c   : > { %v4020_v6 = vsel %vm935_vm10, %v4019_v61, %v13860_v48 }
 0x52d   : > { %1179 = vst [vmem:[#allocation4 + $0x8] sm:$0xc] %v1175_v44  ;;  %v2018_v21 = vpop.permute.xlu0 %2017  ;;  %v1386_v28 = vpop.permute.xlu1 %1385  ;;  %v4021_v51 = vsel %vm937_vm11, %v4020_v6, %v13868_v3 }
 0x52e   : > { %v1401_v4 = vsel %vm939_vm12, %v1400_v22, %v1386_v28  ;;  %v3349_v28 = vsel %vm929_vm7, %v3348_v16, %v13864_v57  ;;  %v13865_v22 = vld [vmem:[#allocation89_spill] sm:$0xff]  ;;  %v2508_v16 = vsel %vm929_vm7, %v2507_v32, %v13869_v1 }
 0x52f   : > { %v1405_v44 = vrot.slane %v1401_v4, 4  ;;  %v2066_v38 = vsel %vm933_vm9, %v2065_v20, %v13865_v22  ;;  %v13866_v4 = vld [vmem:[#allocation53_spill] sm:$0xff]  ;;  %v13871_v20 = vld [vmem:[#allocation30_spill] sm:$0xff] }
 0x530   : > { %v3350_v29 = vsel %vm931_vm8, %v3349_v28, %v13866_v4  ;;  %v2067_v61 = vsel %vm935_vm10, %v2066_v38, %v2046_v30  ;;  %v4022_v57 = vsel %vm939_vm12, %v4021_v51, %v13871_v20  ;;  %v13872_v22 = vld [vmem:[#allocation134_spill] sm:$0xff]  ;;  %v13873_v4 = vld [vmem:[#allocation91_spill] sm:$0xff] }
 0x531   : > { %1409 = vst [vmem:[#allocation4 + $0x8] sm:$0x30] %v1405_v44  ;;  %v2462_v9 = vpop.permute.xlu0 %2461  ;;  %v11191_v25 = vpop.permute.xlu1 %1821  ;;  %v3351_v48 = vsel %vm933_vm9, %v3350_v29, %v13867_v8  ;;  %v2509_v28 = vsel %vm931_vm8, %v2508_v16, %v13872_v22  ;;  %v2068_v29 = vsel %vm937_vm11, %v2067_v61, %v10814_v2  ;;  %v4026_v3 = vrot.slane %v4022_v57, 2  ;;  %v13876_v20 = vld [vmem:[#allocation55_spill] sm:$0xff]  ;;  %v13877_v22 = vld [vmem:[#allocation36_spill] sm:$0xff] }
 0x532   : > { %v3352_v44 = vsel %vm935_vm10, %v3351_v48, %v13870_v43  ;;  %v2510_v30 = vsel %vm933_vm9, %v2509_v28, %v13873_v4  ;;  %v13874_v48 = vld [vmem:[#allocation81_spill] sm:$0xff]  ;;  %v13875_v43 = vld [vmem:[#allocation24_spill] sm:$0xff]  ;;  %v2056_v28 = vsel %vm927_vm6, %v13877_v22, %v13876_v20  ;;  %v13884_v20 = vld [vmem:[#allocation79_spill] sm:$0xff] }
 0x533   : > { %v2511_v8 = vsel %vm935_vm10, %v2510_v30, %v2490_v52  ;;  %v3353_v1 = vsel %vm937_vm11, %v3352_v44, %v13874_v48  ;;  %v13878_v4 = vld [vmem:[#allocation84_spill] sm:$0xff] }
 0x534   : > { %v3354_v16 = vsel %vm939_vm12, %v3353_v1, %v13875_v43  ;;  %v1832_v2 = vsel %vm927_vm6, %v13879_v27, %v13878_v4  ;;  %v2512_v57 = vsel %vm937_vm11, %v2511_v8, %v10834_v24  ;;  %v13882_v27 = vld [vmem:[#allocation51_spill] sm:$0xff]  ;;  %v13885_v8 = vld [vmem:[#allocation90_spill] sm:$0xff] }
 0x535   : > { %v1802_v38 = vpop.permute.xlu0 %1801  ;;  %v2054_v6 = vpop.permute.xlu1 %2053  ;;  %v13883_v43 = vld [vmem:[#allocation15_spill] sm:$0xff] }
 0x536   : > { %v2069_v32 = vsel %vm939_vm12, %v2068_v29, %v2054_v6  ;;  %v13880_v29 = vld [vmem:[#allocation18_spill] sm:$0xff] }
 0x537   : > { %v2073_v51 = vrot.slane %v2069_v32, 6  ;;  %v2057_v6 = vsel %vm929_vm7, %v2056_v28, %v13880_v29  ;;  %v13881_v32 = vld [vmem:[#allocation31_spill] sm:$0xff] }
 0x538   : > { %v11224_v61 = vld [vmem:[#allocation4 + $0x8] sm:$0xff]  ;;  %v1833_v48 = vsel %vm929_vm7, %v1832_v2, %v13881_v32  ;;  %v2058_v22 = vsel %vm931_vm8, %v2057_v6, %v13884_v20  ;;  %v13889_v32 = vld [vmem:[#allocation27_spill] sm:$0xff]  ;;  %v13891_v20 = vld [vmem:[#allocation138_spill] sm:$0xff] }
 0x539   : > { %2077 = vst [vmem:[#allocation4 + $0x18] sm:$0xc] %v2073_v51  ;;  %v2720_v52 = vpop.permute.xlu0 %2719  ;;  %v2498_v44 = vpop.permute.xlu1 %2497  ;;  %3356 = vst [vmem:[#allocation4 + $0x8] sm:$0x3] %v3354_v16  ;;  %v2500_v51 = vsel %vm927_vm6, %v13883_v43, %v13882_v27  ;;  %v1834_v24 = vsel %vm931_vm8, %v1833_v48, %v10794_v17  ;;  %v13886_v16 = vld [vmem:[#allocation12_spill] sm:$0xff]  ;;  %v13890_v27 = vld [vmem:[#allocation77_spill] sm:$0xff] }
 0x53a   : > { %4030 = vst [vmem:[#allocation4 + $0x8] sm:$0xc0] %v4026_v3  ;;  %v2513_v30 = vsel %vm939_vm12, %v2512_v57, %v2498_v44  ;;  %v2059_v3 = vsel %vm933_vm9, %v2058_v22, %v13885_v8  ;;  %v1835_v28 = vsel %vm933_vm9, %v1834_v24, %v13886_v16  ;;  %v13888_v17 = vld [vmem:[#allocation60_spill] sm:$0xff]  ;;  %v13893_v8 = vld [vmem:[#allocation61_spill] sm:$0xff] }
 0x53b   : > { %v2517_v1 = vrot.slane %v2513_v30, 2  ;;  %v2060_v57 = vsel %vm935_vm10, %v2059_v3, %v2018_v21  ;;  %v13887_v30 = vld [vmem:[#allocation22_spill] sm:$0xff]  ;;  %v1839_v48 = vsel %vm927_vm6, %v13889_v32, %v13888_v17  ;;  %v13897_v17 = vld [vmem:[#allocation87_spill] sm:$0xff] }
 0x53c   : > { %v2501_v29 = vsel %vm929_vm7, %v2500_v51, %v13887_v30  ;;  %v2061_v51 = vsel %vm937_vm11, %v2060_v57, %v10832_v31  ;;  %v13895_v30 = vld [vmem:[#allocation118_spill] sm:$0xff]  ;;  %v13898_v57 = vld [vmem:[#allocation116_spill] sm:$0xff] }
 0x53d   : > { %2521 = vst [vmem:[#allocation4 + $0x18] sm:$0xc0] %v2517_v1  ;;  %v3555_v4 = vpop.permute.xlu0 %3554  ;;  %v1794_v2 = vpop.permute.xlu1 %1793  ;;  %v2502_v43 = vsel %vm931_vm8, %v2501_v29, %v13890_v27  ;;  %v13896_v29 = vld [vmem:[#allocation50_spill] sm:$0xff]  ;;  %v2737_v32 = vsel %vm927_vm6, %v13898_v57, %v10928_v23 }
 0x53e   : > { %v1836_v44 = vsel %vm935_vm10, %v1835_v28, %v1794_v2  ;;  %v2503_v21 = vsel %vm933_vm9, %v2502_v43, %v13891_v20  ;;  %v13894_v2 = vld [vmem:[#allocation21_spill] sm:$0xff]  ;;  %v13899_v27 = vld [vmem:[#allocation98_spill] sm:$0xff]  ;;  %v13900_v43 = vld [vmem:[#allocation11_spill] sm:$0xff] }
 0x53f   : > { %v1837_v6 = vsel %vm937_vm11, %v1836_v44, %v10912_v37  ;;  %v13892_v37 = vld [vmem:[#allocation13_spill] sm:$0xff]  ;;  %v2504_v16 = vsel %vm935_vm10, %v2503_v21, %v2462_v9  ;;  %v13908_v57 = vld [vmem:[#allocation130_spill] sm:$0xff] }
 0x540   : > { %v1838_v1 = vsel %vm939_vm12, %v1837_v6, %v1802_v38  ;;  %v4677_v3 = vsel %vm927_vm6, %v13893_v8, %v13892_v37  ;;  %v1840_v38 = vsel %vm929_vm7, %v1839_v48, %v13894_v2  ;;  %v4684_v6 = vsel %vm927_vm6, %v13896_v29, %v13895_v30  ;;  %v13902_v8 = vld [vmem:[#allocation99_spill] sm:$0xff] }
 0x541   : > { %1846 = vst [vmem:[#allocation4 + $0x10] sm:$0x3] %v1838_v1  ;;  %v11258_v22 = vpop.permute.xlu0 %3784  ;;  %v2026_v24 = vpop.permute.xlu1 %2025  ;;  %v1841_v31 = vsel %vm931_vm8, %v1840_v38, %v13897_v17  ;;  %v4678_v9 = vsel %vm929_vm7, %v4677_v3, %v13899_v27  ;;  %v2505_v20 = vsel %vm937_vm11, %v2504_v16, %v10849_v59  ;;  %v4685_v3 = vsel %vm929_vm7, %v4684_v6, %v13902_v8  ;;  %v13904_v38 = vld [vmem:[#allocation43_spill] sm:$0xff]  ;;  %v13905_v59 = vld [vmem:[#allocation125_spill] sm:$0xff]  ;;  %v13912_v8 = vld [vmem:[#allocation20_spill] sm:$0xff] }
 0x542   : > { %v2062_v28 = vsel %vm939_vm12, %v2061_v51, %v2026_v24  ;;  %v1842_v1 = vsel %vm933_vm9, %v1841_v31, %v13900_v43  ;;  %v13901_v51 = vld [vmem:[#allocation131_spill] sm:$0xff]  ;;  %v4686_v16 = vsel %vm931_vm8, %v4685_v3, %v13905_v59 }
 0x543   : > { %v2072_v44 = vrot.slane %v2062_v28, 6  ;;  %v4679_v24 = vsel %vm931_vm8, %v4678_v9, %v13901_v51  ;;  %v1843_v37 = vsel %vm935_vm10, %v1842_v1, %v11191_v25  ;;  %v13903_v28 = vld [vmem:[#allocation57_spill] sm:$0xff]  ;;  %v13906_v29 = vld [vmem:[#allocation111_spill] sm:$0xff]  ;;  %v4687_v27 = vsel %vm933_vm9, %v4686_v16, %v13908_v57  ;;  %v13915_v16 = vld [vmem:[#allocation94_spill] sm:$0xff] }
 0x544   : > { %v4680_v2 = vsel %vm933_vm9, %v4679_v24, %v13903_v28  ;;  %v13907_v25 = vld [vmem:[#allocation29_spill] sm:$0xff]  ;;  %v1844_v43 = vsel %vm937_vm11, %v1843_v37, %v10892_v54  ;;  %v13910_v51 = vld [vmem:[#allocation67_spill] sm:$0xff] }
 0x545   : > { %2076 = vst [vmem:[#allocation4 + $0x10] sm:$0xc] %v2072_v44  ;;  %v11281_v48 = vpop.permute.xlu0 %4452  ;;  %v2470_v21 = vpop.permute.xlu1 %2469  ;;  %v2738_v44 = vsel %vm929_vm7, %v2737_v32, %v13904_v38  ;;  %v4681_v17 = vsel %vm935_vm10, %v4680_v2, %v13906_v29  ;;  %v3572_v31 = vsel %vm927_vm6, %v13907_v25, %v10870_v47  ;;  %v13913_v54 = vld [vmem:[#allocation39_spill] sm:$0xff] }
 0x546   : > { %v2506_v23 = vsel %vm939_vm12, %v2505_v20, %v2470_v21  ;;  %v2739_v6 = vsel %vm931_vm8, %v2738_v44, %v10968_v35  ;;  %v13909_v20 = vld [vmem:[#allocation41_spill] sm:$0xff]  ;;  %v4682_v24 = vsel %vm937_vm11, %v4681_v17, %v13910_v51  ;;  %v3802_v37 = vsel %vm927_vm6, %v13913_v54, %v10938_v5 }
 0x547   : > { %v2516_v30 = vrot.slane %v2506_v23, 2  ;;  %v2740_v32 = vsel %vm933_vm9, %v2739_v6, %v11008_v0  ;;  %v4688_v21 = vsel %vm935_vm10, %v4687_v27, %v13909_v20  ;;  %v13911_v23 = vld [vmem:[#allocation75_spill] sm:$0xff]  ;;  %v4683_v3 = vsel %vm939_vm12, %v4682_v24, %v13912_v8  ;;  %v13917_v6 = vld [vmem:[#allocation112_spill] sm:$0xff] }
 0x548   : > { %v2741_v47 = vsel %vm935_vm10, %v2740_v32, %v2720_v52  ;;  %v3573_v0 = vsel %vm929_vm7, %v3572_v31, %v13911_v23  ;;  %v13914_v52 = vld [vmem:[#allocation68_spill] sm:$0xff]  ;;  %v4693_v25 = vrot.slane %v4683_v3, 4 }
 0x549   : > { %2520 = vst [vmem:[#allocation4 + $0x10] sm:$0xc0] %v2516_v30  ;;  %v11309_v9 = vpop.permute.xlu0 %4896  ;;  %v1830_v1 = vpop.permute.xlu1 %1829  ;;  %v3574_v28 = vsel %vm931_vm8, %v3573_v0, %v10940_v62  ;;  %v4689_v2 = vsel %vm937_vm11, %v4688_v21, %v13914_v52  ;;  %v2742_v44 = vsel %vm937_vm11, %v2741_v47, %v11064_v39  ;;  %v13916_v62 = vld [vmem:[#allocation86_spill] sm:$0xff]  ;;  %v13918_v47 = vld [vmem:[#allocation37_spill] sm:$0xff] }
 0x54a   : > { %v1845_v35 = vsel %vm939_vm12, %v1844_v43, %v1830_v1  ;;  %v3575_v38 = vsel %vm933_vm9, %v3574_v28, %v11018_v18  ;;  %v4690_v29 = vsel %vm939_vm12, %v4689_v2, %v13915_v16  ;;  %v3803_v31 = vsel %vm929_vm7, %v3802_v37, %v13916_v62  ;;  %v13922_v28 = vld [vmem:[#allocation38_spill] sm:$0xff] }
 0x54b   : > { %1847 = vst [vmem:[#allocation4 + $0x18] sm:$0x3] %v1845_v35  ;;  %v3576_v17 = vsel %vm935_vm10, %v3575_v38, %v3555_v4  ;;  %v2730_v18 = vsel %vm927_vm6, %v13917_v6, %v10894_v19  ;;  %v3804_v39 = vsel %vm931_vm8, %v3803_v31, %v10950_v42  ;;  %v4694_v27 = vrot.slane %v4690_v29, 4  ;;  %v13923_v29 = vld [vmem:[#allocation35_spill] sm:$0xff] }
 0x54c   : > { %v3805_v32 = vsel %vm933_vm9, %v3804_v39, %v11028_v49  ;;  %v3577_v43 = vsel %vm937_vm11, %v3576_v17, %v11077_v63  ;;  %v2731_v42 = vsel %vm929_vm7, %v2730_v18, %v13918_v47  ;;  %v13919_v49 = vld [vmem:[#allocation44_spill] sm:$0xff]  ;;  %v4914_v52 = vsel %vm927_vm6, %v13922_v28, %v10958_v34 }
 0x54d   : > { %v2728_v30 = vpop.permute.xlu0 %2727  ;;  %v2692_v59 = vpop.permute.xlu1 %2691  ;;  %v3806_v20 = vsel %vm935_vm10, %v3805_v32, %v11258_v22  ;;  %v4470_v24 = vsel %vm927_vm6, %v13919_v49, %v10948_v53  ;;  %v2732_v63 = vsel %vm931_vm8, %v2731_v42, %v10960_v10  ;;  %v13920_v10 = vld [vmem:[#allocation70_spill] sm:$0xff]  ;;  %v13924_v17 = vld [vmem:[#allocation64_spill] sm:$0xff] }
 0x54e   : > { %v2743_v5 = vsel %vm939_vm12, %v2742_v44, %v2728_v30  ;;  %v2733_v22 = vsel %vm933_vm9, %v2732_v63, %v11000_v13  ;;  %v3807_v8 = vsel %vm937_vm11, %v3806_v20, %v11090_v7  ;;  %v13921_v13 = vld [vmem:[#allocation32_spill] sm:$0xff]  ;;  %v13930_v20 = vld [vmem:[#allocation110_spill] sm:$0xff] }
 0x54f   : > { %2745 = vst [vmem:[#allocation4 + $0x28] sm:$0x3] %v2743_v5  ;;  %v2734_v3 = vsel %vm935_vm10, %v2733_v22, %v2692_v59  ;;  %v4463_v7 = vsel %vm927_vm6, %v13921_v13, %v10914_v50  ;;  %v2746_v49 = vld [vmem:[%s11415_s12] sm:$0x3] }
 0x550   : > { %v2749_v57 = vld [vmem:[#allocation4 + $0x10] sm:$0xff]  ;;  %v2735_v30 = vsel %vm937_vm11, %v2734_v3, %v11056_v14  ;;  %v4464_v34 = vsel %vm929_vm7, %v4463_v7, %v13923_v29  ;;  %v13926_v14 = vld [vmem:[#allocation119_spill] sm:$0xff]  ;;  %v13941_v29 = vld [vmem:[#allocation52_spill] sm:$0xff] }
 0x551   : > { %v3563_v4 = vpop.permute.xlu0 %3562  ;;  %v4425_v1 = vpop.permute.xlu1 %4424  ;;  %4697 = vst [vmem:[#allocation4 + $0x10] sm:$0x30] %v4693_v25  ;;  %v7967_v23 = vpack.c.bf16 %v2749_v57, %v10926_v45  ;;  %v4471_v45 = vsel %vm929_vm7, %v4470_v24, %v13920_v10  ;;  %v4239_v25 = vsel %vm927_vm6, %v13926_v14, %v10970_v60  ;;  %v13934_v3 = vld [vmem:[#allocation83_spill] sm:$0xff]  ;;  %v13936_v10 = vld [vmem:[#allocation88_spill] sm:$0xff]  ;;  %v13938_v7 = vld [vmem:[#allocation102_spill] sm:$0xff] }
 0x552   : > { %v3578_v21 = vsel %vm939_vm12, %v3577_v43, %v3563_v4  ;;  %v2750_v19 = vld [vmem:[#allocation4 + $0x18] sm:$0xff]  ;;  %v4472_v2 = vsel %vm931_vm8, %v4471_v45, %v10988_v33  ;;  %v4915_v33 = vsel %vm929_vm7, %v4914_v52, %v13924_v17  ;;  %v13937_v45 = vld [vmem:[#allocation56_spill] sm:$0xff]  ;;  %v13939_v52 = vld [vmem:[#allocation121_spill] sm:$0xff] }
 0x553   : > { %v3582_v35 = vrot.slane %v3578_v21, 6  ;;  %v7965_v51 = vpack.c.bf16 %v2750_v19, %v11224_v61  ;;  %4698 = vst [vmem:[#allocation4 + $0x18] sm:$0x30] %v4694_v27  ;;  %v4473_v38 = vsel %vm933_vm9, %v4472_v2, %v11036_v36  ;;  %v13925_v36 = vld [vmem:[#allocation28_spill] sm:$0xff]  ;;  %v4916_v62 = vsel %vm931_vm8, %v4915_v33, %v10998_v55  ;;  %v13927_v55 = vld [vmem:[#allocation34_spill] sm:$0xff]  ;;  %v13942_v33 = vld [vmem:[#allocation101_spill] sm:$0xff] }
 0x554   : > { %v4474_v16 = vsel %vm935_vm10, %v4473_v38, %v11281_v48  ;;  %v4907_v5 = vsel %vm927_vm6, %v13925_v36, %v10930_v41  ;;  %v4465_v48 = vsel %vm931_vm8, %v4464_v34, %v10980_v11  ;;  %v4917_v6 = vsel %vm933_vm9, %v4916_v62, %v11044_v26  ;;  %v13928_v26 = vld [vmem:[#allocation122_spill] sm:$0xff]  ;;  %v13931_v19 = vld [vmem:[#allocation100_spill] sm:$0xff] }
 0x555   : > { %v3793_v0 = vpop.permute.xlu0 %3792  ;;  %7966 = vmatprep.subr.bf16.mxu0 %v7965_v51  ;;  %3586 = vst [vmem:[#allocation4 + $0x8] sm:$0xc] %v3582_v35  ;;  %v4869_v61 = vpop.permute.xlu1 %4868  ;;  %v4466_v31 = vsel %vm933_vm9, %v4465_v48, %v11010_v15  ;;  %v4475_v18 = vsel %vm937_vm11, %v4474_v16, %v11103_v58  ;;  %v4918_v60 = vsel %vm935_vm10, %v4917_v6, %v11309_v9  ;;  %v13929_v9 = vld [vmem:[#allocation72_spill] sm:$0xff]  ;;  %v13932_v35 = vld [vmem:[#allocation23_spill] sm:$0xff]  ;;  %v13944_v14 = vld [vmem:[#allocation62_spill] sm:$0xff] }
 0x556   : > { %v3808_v53 = vsel %vm939_vm12, %v3807_v8, %v3793_v0  ;;  %7968 = vmatpush1.bf16.msra.mxu0 %v7967_v23  ;;  %v2752_v54 = vld [vmem:[#allocation4 + $0x28] sm:$0x3]  ;;  %v4467_v57 = vsel %vm935_vm10, %v4466_v31, %v4425_v1  ;;  %v4908_v15 = vsel %vm929_vm7, %v4907_v5, %v13927_v55  ;;  %v4240_v58 = vsel %vm929_vm7, %v4239_v25, %v13928_v26  ;;  %v13933_v23 = vld [vmem:[#allocation124_spill] sm:$0xff]  ;;  %v13945_v48 = vld [vmem:[#allocation82_spill] sm:$0xff] }
 0x557   : > { %v3812_v37 = vrot.slane %v3808_v53, 4  ;;  %7940 = vmatprep.subr.msk.mxu0 %vm2756_vm13, %v2752_v54  ;;  %v4246_v32 = vsel %vm927_vm6, %v13929_v9, %v10978_v56  ;;  %v4909_v4 = vsel %vm931_vm8, %v4908_v15, %v10990_v12  ;;  %v4241_v43 = vsel %vm931_vm8, %v4240_v58, %v11046_v40  ;;  %v13935_v54 = vld [vmem:[#allocation104_spill] sm:$0xff]  ;;  %v13949_v15 = vld [vmem:[#allocation129_spill] sm:$0xff] }
 0x558   : > { %v4910_v1 = vsel %vm933_vm9, %v4909_v4, %v11020_v46  ;;  %v4242_v21 = vsel %vm933_vm9, %v4241_v43, %v13930_v20  ;;  %v4919_v47 = vsel %vm937_vm11, %v4918_v60, %v13931_v19  ;;  %v4468_v56 = vsel %vm937_vm11, %v4467_v57, %v13932_v35  ;;  %v13943_v36 = vld [vmem:[#allocation80_spill] sm:$0xff]  ;;  %v13947_v60 = vld [vmem:[#allocation46_spill] sm:$0xff]  ;;  %v13950_v58 = vld [vmem:[#allocation105_spill] sm:$0xff] }
 0x559   : > { %3816 = vst [vmem:[#allocation4 + $0x8] sm:$0x30] %v3812_v37  ;;  %v4229_v44 = vpop.permute.xlu0 %4228  ;;  %v2700_v59 = vpop.permute.xlu1 %2699  ;;  %v4911_v12 = vsel %vm935_vm10, %v4910_v1, %v4869_v61  ;;  %v4247_v22 = vsel %vm929_vm7, %v4246_v32, %v13933_v23  ;;  %v5144_v61 = vsel %vm927_vm6, %v13936_v10, %v13935_v54  ;;  %v5137_v5 = vsel %vm927_vm6, %v13943_v36, %v13942_v33  ;;  %v13946_v31 = vld [vmem:[#allocation132_spill] sm:$0xff]  ;;  %v13951_v1 = vld [vmem:[#allocation93_spill] sm:$0xff] }
 0x55a   : > { %v2736_v50 = vsel %vm939_vm12, %v2735_v30, %v2700_v59  ;;  %v4248_v53 = vsel %vm931_vm8, %v4247_v22, %v13934_v3  ;;  %v4912_v2 = vsel %vm937_vm11, %v4911_v12, %v13939_v52  ;;  %v13940_v30 = vmov 0.0   ;;  %v7951_v23 = vld [vmem:[%s326_s18 + $0x2] sm:$0x3] }
 0x55b   : > { %2744 = vst [vmem:[#allocation4 + $0x20] sm:$0x3] %v2736_v50  ;;  %v4249_v37 = vsel %vm933_vm9, %v4248_v53, %v13937_v45  ;;  %v5145_v34 = vsel %vm929_vm7, %v5144_v61, %v13941_v29  ;;  %v5138_v57 = vsel %vm929_vm7, %v5137_v5, %v13947_v60  ;;  %v7950_v54 = vld [vmem:[%s268_s19 + $0x2] sm:$0x3]  ;;  %v13952_v5 = vld [vmem:[#allocation9_spill] sm:$0xff] }
 0x55c   : > { %v4250_v59 = vsel %vm935_vm10, %v4249_v37, %v4229_v44  ;;  %v5146_v25 = vsel %vm931_vm8, %v5145_v34, %v13944_v14 }
 0x55d   : > { %v4461_v41 = vpop.permute.xlu0 %4460  ;;  %v4201_v39 = vpop.permute.xlu1 %4200  ;;  %v5147_v62 = vsel %vm933_vm9, %v5146_v25, %v13945_v48  ;;  %v4251_v6 = vsel %vm937_vm11, %v4250_v59, %v13946_v31 }
 0x55e   : > { %v4476_v11 = vsel %vm939_vm12, %v4475_v18, %v4461_v41  ;;  %v4243_v40 = vsel %vm935_vm10, %v4242_v21, %v4201_v39 }
 0x55f   : > { %v4480_v27 = vrot.slane %v4476_v11, 6  ;;  %v4244_v28 = vsel %vm937_vm11, %v4243_v40, %v13938_v7  ;;  %v13948_v11 = vld [vmem:[#allocation16_spill] sm:$0xff] }
 0x560   : > { %v5139_v55 = vsel %vm931_vm8, %v5138_v57, %v13948_v11  ;;  %v7946_v40 = vld [vmem:[%s11415_s12 + $0x2] sm:$0x3]  ;;  %v13953_v11 = vld [vmem:[#allocation10_spill] sm:$0xff] }
 0x561   : > { %4484 = vst [vmem:[#allocation4 + $0x18] sm:$0xc] %v4480_v27  ;;  %v4905_v42 = vpop.permute.xlu0 %4904  ;;  %v4433_v51 = vpop.permute.xlu1 %4432  ;;  %v5140_v26 = vsel %vm933_vm9, %v5139_v55, %v13949_v15 }
 0x562   : > { %v4920_v24 = vsel %vm939_vm12, %v4919_v47, %v4905_v42  ;;  %v4469_v46 = vsel %vm939_vm12, %v4468_v56, %v4433_v51  ;;  %v2751_v63 = vld [vmem:[#allocation4 + $0x20] sm:$0x3]  ;;  %v5156_v42 = vld [vmem:[#allocation4 + $0x8] sm:$0xff] }
 0x563   : > { %v4924_v0 = vrot.slane %v4920_v24, 2  ;;  %v4479_v8 = vrot.slane %v4469_v46, 6  ;;  %7941 = vmatpush1.msk.msra.mxu0 %vm2756_vm13, %v2751_v63  ;;  %v5155_v51 = vld [vmem:[#allocation4] sm:$0xff]  ;;  %v8133_v46 = vmov 0  }
 0x564   : > { %7942 = vmatmul.mubr.msk.f32.vlgmr.msra.gmra.mrb[0].mxu0 %vm721_vm4, %v2746_v49  ;;  %8038 = vset.pattern.permute.xlu0 %v8133_v46  ;;  %v2835_v63 = vld [vmem:[%s326_s18] sm:$0x3] }
 0x565   : > { %4928 = vst [vmem:[#allocation4 + $0x18] sm:$0xc0] %v4924_v0  ;;  %4483 = vst [vmem:[#allocation4 + $0x10] sm:$0xc] %v4479_v8  ;;  %v4209_v13 = vpop.permute.xlu0 %4208  ;;  %v4877_v38 = vpop.permute.xlu1 %4876  ;;  %2915 = vmatprep.mubr.f32.mxu0 %v13940_v30  ;;  %8039 = vset.pattern.permute.xlu1 %v8133_v46  ;;  %v2834_v8 = vld [vmem:[%s268_s19] sm:$0x3] }
 0x566   : > { %v4245_v16 = vsel %vm939_vm12, %v4244_v28, %v4209_v13  ;;  %v4913_v50 = vsel %vm939_vm12, %v4912_v2, %v4877_v38  ;;  %2838 = vperm.xlu0 %8038, %v2835_v63   ;;  %5247 = vperm.xlu1 %8039, %v7951_v23  }
 0x567   : > { %4253 = vst [vmem:[#allocation4 + $0x10] sm:$0x3] %v4245_v16  ;;  %v4923_v17 = vrot.slane %v4913_v50, 2 }
 0x569   : > { %4927 = vst [vmem:[#allocation4 + $0x10] sm:$0xc0] %v4923_v17  ;;  %v5127_v44 = vpop.permute.xlu0 %5126  ;;  %v4237_v18 = vpop.permute.xlu1 %4236 }
 0x56a   : > { %v5148_v41 = vsel %vm935_vm10, %v5147_v62, %v5127_v44  ;;  %v4252_v39 = vsel %vm939_vm12, %v4251_v6, %v4237_v18 }
 0x56b   : > { %4254 = vst [vmem:[#allocation4 + $0x18] sm:$0x3] %v4252_v39  ;;  %v5149_v27 = vsel %vm937_vm11, %v5148_v41, %v13950_v58 }
 0x56d   : > { %v5135_v9 = vpop.permute.xlu0 %5134  ;;  %v5099_v32 = vpop.permute.xlu1 %5098 }
 0x56e   : > { %v5150_v4 = vsel %vm939_vm12, %v5149_v27, %v5135_v9  ;;  %v5141_v43 = vsel %vm935_vm10, %v5140_v26, %v5099_v32 }
 0x56f   : > { %5152 = vst [vmem:[#allocation4 + $0x28] sm:$0x3] %v5150_v4  ;;  %v5142_v20 = vsel %vm937_vm11, %v5141_v43, %v13951_v1 }
 0x570   : > { %v5157_v19 = vld [vmem:[#allocation4 + $0x10] sm:$0xff] }
 0x571   : > { %v5107_v21 = vpop.permute.xlu1 %5106  ;;  %v7971_v49 = vpack.c.bf16 %v5157_v19, %v5155_v51 }
 0x572   : > { %v5143_v47 = vsel %vm939_vm12, %v5142_v20, %v5107_v21  ;;  %v5158_v35 = vld [vmem:[#allocation4 + $0x18] sm:$0xff] }
 0x573   : > { %5151 = vst [vmem:[#allocation4 + $0x20] sm:$0x3] %v5143_v47  ;;  %v7969_v56 = vpack.c.bf16 %v5158_v35, %v5156_v42 }
 0x575   : > { %7970 = vmatprep.subr.bf16.mxu1 %v7969_v56 }
 0x576   : > { %7972 = vmatpush1.bf16.msra.mxu1 %v7971_v49  ;;  %v5160_v12 = vld [vmem:[#allocation4 + $0x28] sm:$0x3] }
 0x577   : > { %7947 = vmatprep.subr.msk.mxu1 %vm2756_vm13, %v5160_v12 }
 0x57a   : > { %v5159_v24 = vld [vmem:[#allocation4 + $0x20] sm:$0x3] }
 0x57b   : > { %7948 = vmatpush1.msk.msra.mxu1 %vm2756_vm13, %v5159_v24 }
 0x57c   : > { %7949 = vmatmul.mubr.msk.f32.vlgmr.msra.gmra.mrb[0].mxu1 %vm721_vm4, %v7946_v40 }
 0x57d   : > { %7808 = vmatprep.mubr.f32.mxu1 %v13940_v30 }
 0x5e5   : > { %v2839_v10 = vpop.permute.xlu0 %2838  ;;  %v5248_v28 = vpop.permute.xlu1 %5247 }
 0x637   : > { %v2829_v22 = vpop.f32.mrb[0].mxu0 }
 0x638   : > { %v2831_v0 = vpop.f32.mrb[1].mxu0 }
 0x639   : > { %7943 = vmatprep.subr.msk.mxu0 %vm2756_vm13, %v2831_v0 }
 0x63a   : > { %7944 = vmatpush1.msk.msra.mxu0 %vm2756_vm13, %v2829_v22 }
 0x63b   : > { %7945 = vmatmul.mubr.msk.f32.vlgmr.msra.gmra.mrb[2].mxu0 %vm2841_vm14, %v2834_v8 }
 0x63c   : > { %5323 = vmatprep.mubr.f32.mxu0 %v13940_v30 }
 0x64f   : > { %v5236_v3 = vpop.f32.mrb[0].mxu1 }
 0x650   : > { %v5238_v53 = vpop.f32.mrb[1].mxu1 }
 0x651   : > { %7952 = vmatprep.subr.msk.mxu0 %vm2756_vm13, %v5238_v53 }
 0x652   : > { %7953 = vmatpush1.msk.msra.mxu0 %vm2756_vm13, %v5236_v3 }
 0x653   : > { %7954 = vmatmul.mubr.msk.f32.vlgmr.msra.gmra.mrb[4].mxu0 %vm2841_vm14, %v7950_v54 }
 0x70e   : > { %v2917_v61 = vpop.f32.mrb[2].mxu0 }
 0x70f   : > { %v2918_v45 = vadd.f32 %v2917_v61, %v2839_v10  ;;  %v2919_v37 = vpop.f32.mrb[3].mxu0 }
 0x710   : > { %v2920_v13 = vadd.f32 %v2919_v37, %v2839_v10 }
 0x711   : > { %2926 = vrot.lane.b32.xlu0 %v2918_v45, %s8121_s20  ;;  %2923 = vrot.lane.b32.xlu1 %v2918_v45, %s8120_s16 }
 0x715   : > { %2932 = vrot.lane.b32.xlu0 %v2918_v45, %s8122_s21  ;;  %2929 = vrot.lane.b32.xlu1 %v2918_v45, %s8119_s30 }
 0x719   : > { %2938 = vrot.lane.b32.xlu0 %v2918_v45, %s8124_s28  ;;  %2935 = vrot.lane.b32.xlu1 %v2918_v45, %s8123_s27 }
 0x71d   : > { %2945 = vrot.lane.b32.xlu0 %v2920_v13, %s8120_s16  ;;  %2941 = vrot.lane.b32.xlu1 %v2918_v45, %s8125_s7 }
 0x721   : > { %2951 = vrot.lane.b32.xlu0 %v2920_v13, %s8119_s30  ;;  %2948 = vrot.lane.b32.xlu1 %v2920_v13, %s8121_s20 }
 0x725   : > { %2957 = vrot.lane.b32.xlu0 %v2920_v13, %s8123_s27  ;;  %2954 = vrot.lane.b32.xlu1 %v2920_v13, %s8122_s21 }
 0x726   : > { %v5325_v7 = vpop.f32.mrb[4].mxu0 }
 0x727   : > { %v5327_v52 = vpop.f32.mrb[5].mxu0  ;;  %v11519_v2 = vadd.f32 %v5325_v7, %v5248_v28 }
 0x728   : > { %v11533_v38 = vadd.f32 %v5327_v52, %v5248_v28 }
 0x729   : > { %2963 = vrot.lane.b32.xlu0 %v2920_v13, %s8125_s7  ;;  %2960 = vrot.lane.b32.xlu1 %v2920_v13, %s8124_s28 }
 0x72d   : > { %5334 = vrot.lane.b32.xlu0 %v11519_v2, %s8121_s20  ;;  %5331 = vrot.lane.b32.xlu1 %v11519_v2, %s8120_s16 }
 0x731   : > { %5340 = vrot.lane.b32.xlu0 %v11519_v2, %s8122_s21  ;;  %5337 = vrot.lane.b32.xlu1 %v11519_v2, %s8119_s30 }
 0x735   : > { %5346 = vrot.lane.b32.xlu0 %v11519_v2, %s8124_s28  ;;  %5343 = vrot.lane.b32.xlu1 %v11519_v2, %s8123_s27 }
 0x739   : > { %5353 = vrot.lane.b32.xlu0 %v11533_v38, %s8120_s16  ;;  %5349 = vrot.lane.b32.xlu1 %v11519_v2, %s8125_s7 }
 0x73d   : > { %5359 = vrot.lane.b32.xlu0 %v11533_v38, %s8119_s30  ;;  %5356 = vrot.lane.b32.xlu1 %v11533_v38, %s8121_s20 }
 0x741   : > { %5365 = vrot.lane.b32.xlu0 %v11533_v38, %s8123_s27  ;;  %5362 = vrot.lane.b32.xlu1 %v11533_v38, %s8122_s21 }
 0x745   : > { %5371 = vrot.lane.b32.xlu0 %v11533_v38, %s8125_s7  ;;  %5368 = vrot.lane.b32.xlu1 %v11533_v38, %s8124_s28 }
 0x783   : > { %v2927_v59 = vpop.permute.xlu0 %2926  ;;  %v2924_v16 = vpop.permute.xlu1 %2923 }
 0x784   : > { %v2966_v36 = vcombine.low %v2918_v45, %v2927_v59 }
 0x786   : > { %v2973_v44 = vrot.slane %v2966_v36, %v13952_v5 }
 0x787   : > { %v2933_v50 = vpop.permute.xlu0 %2932  ;;  %v2930_v29 = vpop.permute.xlu1 %2929 }
 0x788   : > { %v2974_v34 = vcombine.low %v2924_v16, %v2930_v29 }
 0x78a   : > { %v2981_v14 = vrot.slane %v2974_v34, %v13952_v5 }
 0x78b   : > { %v2939_v17 = vpop.permute.xlu0 %2938  ;;  %v2936_v33 = vpop.permute.xlu1 %2935 }
 0x78c   : > { %v2982_v25 = vcombine.low %v2933_v50, %v2939_v17  ;;  %v2998_v6 = vcombine.low %v2973_v44, %v2981_v14 }
 0x78e   : > { %v2989_v18 = vrot.slane %v2982_v25, %v13952_v5  ;;  %v3005_v55 = vrot.slane %v2998_v6, %v13953_v11 }
 0x78f   : > { %v2946_v48 = vpop.permute.xlu0 %2945  ;;  %v2942_v62 = vpop.permute.xlu1 %2941 }
 0x790   : > { %v2990_v31 = vcombine.low %v2936_v33, %v2942_v62 }
 0x792   : > { %v2997_v41 = vrot.slane %v2990_v31, %v13952_v5 }
 0x793   : > { %v2952_v39 = vpop.permute.xlu0 %2951  ;;  %v2949_v60 = vpop.permute.xlu1 %2948 }
 0x794   : > { %v3006_v57 = vcombine.low %v2989_v18, %v2997_v41  ;;  %v3024_v26 = vcombine.low %v2946_v48, %v2952_v39  ;;  %v3016_v58 = vcombine.low %v2920_v13, %v2949_v60 }
 0x796   : > { %v3013_v15 = vrot.slane %v3006_v57, %v13953_v11  ;;  %v3031_v4 = vrot.slane %v3024_v26, %v13952_v5  ;;  %v3023_v43 = vrot.slane %v3016_v58, %v13952_v5 }
 0x797   : > { %v2958_v27 = vpop.permute.xlu0 %2957  ;;  %v2955_v9 = vpop.permute.xlu1 %2954 }
 0x798   : > { %v3014_v32 = vcombine.low %v3005_v55, %v3013_v15  ;;  %v3015_v47 = vcombine.high %v3005_v55, %v3013_v15  ;;  %v3048_v42 = vcombine.low %v3023_v43, %v3031_v4 }
 0x79a   : > { %3070 = vrot.lane.b32.xlu1 %v3014_v32, %s8128_s8  ;;  %v3055_v40 = vrot.slane %v3048_v42, %v13953_v11 }
 0x79b   : > { %v2964_v1 = vpop.permute.xlu0 %2963  ;;  %v2961_v20 = vpop.permute.xlu1 %2960 }
 0x79c   : > { %v3040_v21 = vcombine.low %v2958_v27, %v2964_v1  ;;  %v3032_v19 = vcombine.low %v2955_v9, %v2961_v20 }
 0x79e   : > { %v3047_v35 = vrot.slane %v3040_v21, %v13952_v5  ;;  %v3039_v56 = vrot.slane %v3032_v19, %v13952_v5  ;;  %3074 = vrot.lane.b32.xlu1 %v3015_v47, %s8128_s8 }
 0x79f   : > { %v5335_v51 = vpop.permute.xlu0 %5334  ;;  %v5332_v49 = vpop.permute.xlu1 %5331 }
 0x7a0   : > { %v3056_v12 = vcombine.low %v3039_v56, %v3047_v35  ;;  %v5374_v3 = vcombine.low %v11519_v2, %v5335_v51 }
 0x7a2   : > { %v3063_v24 = vrot.slane %v3056_v12, %v13953_v11  ;;  %3082 = vrot.lane.b32.xlu1 %v3014_v32, %s8129_s9  ;;  %v5381_v37 = vrot.slane %v5374_v3, %v13952_v5 }
 0x7a3   : > { %v5341_v46 = vpop.permute.xlu0 %5340  ;;  %v5338_v63 = vpop.permute.xlu1 %5337 }
 0x7a4   : > { %v3064_v23 = vcombine.low %v3055_v40, %v3063_v24  ;;  %v5382_v22 = vcombine.low %v5332_v49, %v5338_v63  ;;  %v3065_v54 = vcombine.high %v3055_v40, %v3063_v24 }
 0x7a6   : > { %3086 = vrot.lane.b32.xlu1 %v3015_v47, %s8129_s9  ;;  %3072 = vrot.lane.b32.xlu0 %v3064_v23, %s8128_s8  ;;  %v5389_v10 = vrot.slane %v5382_v22, %v13952_v5 }
 0x7a7   : > { %v5347_v0 = vpop.permute.xlu0 %5346  ;;  %v5344_v8 = vpop.permute.xlu1 %5343 }
 0x7a8   : > { %v5390_v53 = vcombine.low %v5341_v46, %v5347_v0  ;;  %v5406_v28 = vcombine.low %v5381_v37, %v5389_v10 }
 0x7aa   : > { %3094 = vrot.lane.b32.xlu1 %v3014_v32, %s8130_s10  ;;  %3076 = vrot.lane.b32.xlu0 %v3065_v54, %s8128_s8  ;;  %v5397_v13 = vrot.slane %v5390_v53, %v13952_v5  ;;  %v5413_v50 = vrot.slane %v5406_v28, %v13953_v11 }
 0x7ab   : > { %v5354_v61 = vpop.permute.xlu0 %5353  ;;  %v5350_v45 = vpop.permute.xlu1 %5349 }
 0x7ac   : > { %v5398_v7 = vcombine.low %v5344_v8, %v5350_v45 }
 0x7ae   : > { %v5405_v52 = vrot.slane %v5398_v7, %v13952_v5  ;;  %3098 = vrot.lane.b32.xlu1 %v3015_v47, %s8130_s10  ;;  %3084 = vrot.lane.b32.xlu0 %v3064_v23, %s8129_s9 }
 0x7af   : > { %v5360_v2 = vpop.permute.xlu0 %5359  ;;  %v5357_v59 = vpop.permute.xlu1 %5356 }
 0x7b0   : > { %v5414_v16 = vcombine.low %v5397_v13, %v5405_v52  ;;  %v5432_v34 = vcombine.low %v5354_v61, %v5360_v2  ;;  %v5424_v17 = vcombine.low %v11533_v38, %v5357_v59 }
 0x7b2   : > { %v5421_v29 = vrot.slane %v5414_v16, %v13953_v11  ;;  %3088 = vrot.lane.b32.xlu0 %v3065_v54, %s8129_s9  ;;  %v5439_v25 = vrot.slane %v5432_v34, %v13952_v5  ;;  %v5431_v48 = vrot.slane %v5424_v17, %v13952_v5 }
 0x7b3   : > { %v5366_v33 = vpop.permute.xlu0 %5365  ;;  %v5363_v36 = vpop.permute.xlu1 %5362 }
 0x7b4   : > { %v5422_v14 = vcombine.low %v5413_v50, %v5421_v29  ;;  %v5423_v18 = vcombine.high %v5413_v50, %v5421_v29  ;;  %v5456_v41 = vcombine.low %v5431_v48, %v5439_v25 }
 0x7b6   : > { %3096 = vrot.lane.b32.xlu0 %v3064_v23, %s8130_s10  ;;  %5478 = vrot.lane.b32.xlu1 %v5422_v14, %s8128_s8  ;;  %v5463_v57 = vrot.slane %v5456_v41, %v13953_v11 }
 0x7b7   : > { %v5372_v62 = vpop.permute.xlu0 %5371  ;;  %v5369_v44 = vpop.permute.xlu1 %5368 }
 0x7b8   : > { %v5448_v31 = vcombine.low %v5366_v33, %v5372_v62  ;;  %v5440_v6 = vcombine.low %v5363_v36, %v5369_v44 }
 0x7ba   : > { %v5455_v38 = vrot.slane %v5448_v31, %v13952_v5  ;;  %v5447_v39 = vrot.slane %v5440_v6, %v13952_v5  ;;  %3100 = vrot.lane.b32.xlu0 %v3065_v54, %s8130_s10  ;;  %5482 = vrot.lane.b32.xlu1 %v5423_v18, %s8128_s8 }
 0x7bc   : > { %v5464_v60 = vcombine.low %v5447_v39, %v5455_v38 }
 0x7be   : > { %v5471_v55 = vrot.slane %v5464_v60, %v13953_v11  ;;  %5490 = vrot.lane.b32.xlu1 %v5422_v14, %s8129_s9 }
 0x7c0   : > { %v5472_v15 = vcombine.low %v5463_v57, %v5471_v55  ;;  %v5473_v26 = vcombine.high %v5463_v57, %v5471_v55 }
 0x7c2   : > { %5494 = vrot.lane.b32.xlu1 %v5423_v18, %s8129_s9  ;;  %5480 = vrot.lane.b32.xlu0 %v5472_v15, %s8128_s8 }
 0x7c6   : > { %5502 = vrot.lane.b32.xlu1 %v5422_v14, %s8130_s10  ;;  %5484 = vrot.lane.b32.xlu0 %v5473_v26, %s8128_s8 }
 0x7ca   : > { %5506 = vrot.lane.b32.xlu1 %v5423_v18, %s8130_s10  ;;  %5492 = vrot.lane.b32.xlu0 %v5472_v15, %s8129_s9 }
 0x7ce   : > { %5496 = vrot.lane.b32.xlu0 %v5473_v26, %s8129_s9 }
 0x7d2   : > { %5504 = vrot.lane.b32.xlu0 %v5472_v15, %s8130_s10 }
 0x7d6   : > { %5508 = vrot.lane.b32.xlu0 %v5473_v26, %s8130_s10 }
 0x80c   : > { %v3071_v58 = vpop.permute.xlu1 %3070 }
 0x810   : > { %v3075_v27 = vpop.permute.xlu1 %3074 }
 0x814   : > { %v3083_v9 = vpop.permute.xlu1 %3082 }
 0x815   : > { %v3106_v43 = vsel %vm646_vm1, %v3071_v58, %v3083_v9 }
 0x818   : > { %v3073_v32 = vpop.permute.xlu0 %3072  ;;  %v3087_v4 = vpop.permute.xlu1 %3086 }
 0x819   : > { %v3108_v42 = vsel %vm646_vm1, %v3075_v27, %v3087_v4 }
 0x81c   : > { %v3077_v1 = vpop.permute.xlu0 %3076  ;;  %v3095_v20 = vpop.permute.xlu1 %3094 }
 0x81d   : > { %v3110_v21 = vsel %vm655_vm2, %v3106_v43, %v3095_v20 }
 0x81e   : > { %v3116_v19 = vrot.slane %v3110_v21, 1  ;;  %v3122_v47 = vrot.slane %v3110_v21, 7 }
 0x820   : > { %v3138_v35 = vsel %vm680_vm3, %v3116_v19, %v3122_v47  ;;  %v3085_v56 = vpop.permute.xlu0 %3084  ;;  %v3099_v51 = vpop.permute.xlu1 %3098 }
 0x821   : > { %3142 = vst.msk [vmem:[#allocation3] sm:$0xff] %vm721_vm4, %v3138_v35  ;;  %v3112_v49 = vsel %vm655_vm2, %v3108_v42, %v3099_v51  ;;  %v3107_v63 = vsel %vm646_vm1, %v3073_v32, %v3085_v56 }
 0x822   : > { %v3117_v12 = vrot.slane %v3112_v49, 1  ;;  %v3125_v40 = vrot.slane %v3112_v49, 7 }
 0x824   : > { %v3139_v24 = vsel %vm680_vm3, %v3117_v12, %v3125_v40  ;;  %v3089_v46 = vpop.permute.xlu0 %3088 }
 0x825   : > { %3145 = vst.msk [vmem:[#allocation3 + $0x18] sm:$0xff] %vm721_vm4, %v3139_v24  ;;  %v3109_v54 = vsel %vm646_vm1, %v3077_v1, %v3089_v46 }
 0x828   : > { %v3097_v23 = vpop.permute.xlu0 %3096  ;;  %v5479_v22 = vpop.permute.xlu1 %5478  ;;  %v11610_v0 = vld [vmem:[#allocation3] sm:$0xff] }
 0x829   : > { %v3111_v8 = vsel %vm655_vm2, %v3107_v63, %v3097_v23  ;;  %5789 = vrot.lane.b32.xlu1 %v11610_v0, %s8128_s8 }
 0x82a   : > { %v3123_v3 = vrot.slane %v3111_v8, 7  ;;  %v3134_v53 = vrot.slane %v3111_v8, 5 }
 0x82c   : > { %v3124_v10 = vsel %vm680_vm3, %v3122_v47, %v3123_v3  ;;  %v3140_v61 = vsel %vm680_vm3, %v3123_v3, %v3134_v53  ;;  %v3101_v45 = vpop.permute.xlu0 %3100  ;;  %v5483_v37 = vpop.permute.xlu1 %5482  ;;  %v11618_v13 = vld [vmem:[#allocation3 + $0x18] sm:$0xff] }
 0x82d   : > { %3143 = vst.msk [vmem:[#allocation3 + $0x8] sm:$0xff] %vm721_vm4, %v3124_v10  ;;  %v3113_v7 = vsel %vm655_vm2, %v3109_v54, %v3101_v45  ;;  %6043 = vrot.lane.b32.xlu1 %v11610_v0, %s8132_s11  ;;  %5793 = vrot.lane.b32.xlu0 %v11618_v13, %s8128_s8 }
 0x82e   : > { %3144 = vst.msk [vmem:[#allocation3 + $0x10] sm:$0x3] %vm724_vm5, %v3140_v61  ;;  %v3126_v28 = vrot.slane %v3113_v7, 7  ;;  %v3135_v52 = vrot.slane %v3113_v7, 5 }
 0x830   : > { %v3127_v2 = vsel %vm680_vm3, %v3125_v40, %v3126_v28  ;;  %v3141_v59 = vsel %vm680_vm3, %v3126_v28, %v3135_v52  ;;  %v5491_v16 = vpop.permute.xlu1 %5490 }
 0x831   : > { %3146 = vst.msk [vmem:[#allocation3 + $0x20] sm:$0xff] %vm721_vm4, %v3127_v2  ;;  %6047 = vrot.lane.b32.xlu0 %v11618_v13, %s8132_s11  ;;  %v5514_v17 = vsel %vm646_vm1, %v5479_v22, %v5491_v16 }
 0x832   : > { %3147 = vst.msk [vmem:[#allocation3 + $0x28] sm:$0x3] %vm724_vm5, %v3141_v59 }
 0x834   : > { %v5481_v50 = vpop.permute.xlu0 %5480  ;;  %v5495_v29 = vpop.permute.xlu1 %5494  ;;  %v11633_v34 = vld [vmem:[#allocation3 + $0x8] sm:$0xff] }
 0x835   : > { %5791 = vrot.lane.b32.xlu1 %v11633_v34, %s8128_s8  ;;  %v5516_v44 = vsel %vm646_vm1, %v5483_v37, %v5495_v29  ;;  %v11647_v41 = vld [vmem:[#allocation3 + $0x9] sm:$0xff]  ;;  %v11666_v9 = vld [vmem:[#allocation3 + $0x1] sm:$0xff] }
 0x836   : > { %v11656_v15 = vld [vmem:[#allocation3 + $0xa] sm:$0xff]  ;;  %v11684_v51 = vld [vmem:[#allocation3 + $0x2] sm:$0xff] }
 0x838   : > { %v5485_v33 = vpop.permute.xlu0 %5484  ;;  %v5503_v36 = vpop.permute.xlu1 %5502  ;;  %v11638_v14 = vld [vmem:[#allocation3 + $0x20] sm:$0xff] }
 0x839   : > { %v5518_v25 = vsel %vm655_vm2, %v5514_v17, %v5503_v36  ;;  %6045 = vrot.lane.b32.xlu1 %v11633_v34, %s8132_s11  ;;  %5795 = vrot.lane.b32.xlu0 %v11638_v14, %s8128_s8  ;;  %v11658_v26 = vld [vmem:[#allocation3 + $0x21] sm:$0xff]  ;;  %v11686_v49 = vld [vmem:[#allocation3 + $0x19] sm:$0xff] }
 0x83a   : > { %v5524_v48 = vrot.slane %v5518_v25, 1  ;;  %v5530_v62 = vrot.slane %v5518_v25, 7  ;;  %v11668_v32 = vld [vmem:[#allocation3 + $0x22] sm:$0xff]  ;;  %v11715_v10 = vld [vmem:[#allocation3 + $0x1a] sm:$0xff] }
 0x83c   : > { %v5546_v31 = vsel %vm680_vm3, %v5524_v48, %v5530_v62  ;;  %v5493_v6 = vpop.permute.xlu0 %5492  ;;  %v5507_v18 = vpop.permute.xlu1 %5506 }
 0x83d   : > { %5551 = vst.msk [vmem:[#allocation3 + $0x30] sm:$0xff] %vm721_vm4, %v5546_v31  ;;  %v5520_v38 = vsel %vm655_vm2, %v5516_v44, %v5507_v18  ;;  %6763 = vrot.lane.b32.xlu1 %v11647_v41, %s8132_s11  ;;  %6049 = vrot.lane.b32.xlu0 %v11638_v14, %s8132_s11  ;;  %v5515_v58 = vsel %vm646_vm1, %v5481_v50, %v5493_v6 }
 0x83e   : > { %v5525_v39 = vrot.slane %v5520_v38, 1  ;;  %v5533_v60 = vrot.slane %v5520_v38, 7 }
 0x840   : > { %v5547_v57 = vsel %vm680_vm3, %v5525_v39, %v5533_v60  ;;  %v5497_v55 = vpop.permute.xlu0 %5496 }
 0x841   : > { %5554 = vst.msk [vmem:[#allocation3 + $0x48] sm:$0xff] %vm721_vm4, %v5547_v57  ;;  %7233 = vrot.lane.b32.xlu1 %v11656_v15, %s8128_s8  ;;  %6767 = vrot.lane.b32.xlu0 %v11658_v26, %s8132_s11  ;;  %v5517_v47 = vsel %vm646_vm1, %v5485_v33, %v5497_v55 }
 0x844   : > { %v5505_v27 = vpop.permute.xlu0 %5504  ;;  %v11670_v4 = vld [vmem:[#allocation3 + $0x30] sm:$0xff] }
 0x845   : > { %v5519_v43 = vsel %vm655_vm2, %v5515_v58, %v5505_v27  ;;  %6761 = vrot.lane.b32.xlu1 %v11666_v9, %s8132_s11  ;;  %7237 = vrot.lane.b32.xlu0 %v11668_v32, %s8128_s8  ;;  %v5565_v21 = vcombine.low %v11610_v0, %v11670_v4  ;;  %v5566_v19 = vcombine.high %v11610_v0, %v11670_v4 }
 0x846   : > { %v5531_v1 = vrot.slane %v5519_v43, 7  ;;  %v5542_v20 = vrot.slane %v5519_v43, 5 }
 0x847   : > { %v11702_v22 = vrot.slane %v5565_v21, %v13952_v5  ;;  %v11708_v8 = vrot.slane %v5566_v19, %v13952_v5 }
 0x848   : > { %v5532_v42 = vsel %vm680_vm3, %v5530_v62, %v5531_v1  ;;  %v5548_v35 = vsel %vm680_vm3, %v5531_v1, %v5542_v20  ;;  %v5509_v56 = vpop.permute.xlu0 %5508  ;;  %v11688_v12 = vld [vmem:[#allocation3 + $0x48] sm:$0xff] }
 0x849   : > { %5552 = vst.msk [vmem:[#allocation3 + $0x38] sm:$0xff] %vm721_vm4, %v5532_v42  ;;  %v5521_v40 = vsel %vm655_vm2, %v5517_v47, %v5509_v56  ;;  %7231 = vrot.lane.b32.xlu1 %v11684_v51, %s8128_s8  ;;  %6765 = vrot.lane.b32.xlu0 %v11686_v49, %s8132_s11  ;;  %v5581_v24 = vcombine.low %v11618_v13, %v11688_v12 }
 0x84a   : > { %5553 = vst.msk [vmem:[#allocation3 + $0x40] sm:$0x3] %vm724_vm5, %v5548_v35  ;;  %v5582_v46 = vcombine.high %v11618_v13, %v11688_v12  ;;  %v5534_v63 = vrot.slane %v5521_v40, 7  ;;  %v5543_v23 = vrot.slane %v5521_v40, 5 }
 0x84b   : > { %v11705_v0 = vrot.slane %v5581_v24, %v13952_v5 }
 0x84c   : > { %v11711_v3 = vrot.slane %v5582_v46, %v13952_v5  ;;  %v5535_v53 = vsel %vm680_vm3, %v5533_v60, %v5534_v63  ;;  %v5549_v54 = vsel %vm680_vm3, %v5534_v63, %v5543_v23 }
 0x84d   : > { %5555 = vst.msk [vmem:[#allocation3 + $0x50] sm:$0xff] %vm721_vm4, %v5535_v53  ;;  %6515 = vrot.lane.b32.xlu1 %v11647_v41, %s8128_s8  ;;  %7235 = vrot.lane.b32.xlu0 %v11715_v10, %s8128_s8  ;;  %v5598_v61 = vcombine.high %v11702_v22, %v11705_v0  ;;  %v5597_v13 = vcombine.low %v11702_v22, %v11705_v0 }
 0x84e   : > { %5556 = vst.msk [vmem:[#allocation3 + $0x58] sm:$0x3] %vm724_vm5, %v5549_v54  ;;  %v5613_v45 = vcombine.low %v11708_v8, %v11711_v3  ;;  %v5614_v37 = vcombine.high %v11708_v8, %v11711_v3 }
 0x850   : > { %v11731_v7 = vld [vmem:[#allocation3 + $0x38] sm:$0xff] }
 0x851   : > { %v11733_v28 = vld [vmem:[#allocation3 + $0x39] sm:$0xff]  ;;  %6513 = vrot.lane.b32.xlu1 %v11666_v9, %s8128_s8  ;;  %6519 = vrot.lane.b32.xlu0 %v11658_v26, %s8128_s8  ;;  %v11739_v52 = vld [vmem:[#allocation3 + $0x31] sm:$0xff]  ;;  %v5633_v16 = vcombine.low %v11633_v34, %v11731_v7  ;;  %v5634_v17 = vcombine.high %v11633_v34, %v11731_v7 }
 0x852   : > { %v11741_v2 = vld [vmem:[#allocation3 + $0x32] sm:$0xff]  ;;  %v6351_v59 = vcombine.low %v11647_v41, %v11733_v28  ;;  %v6352_v50 = vcombine.high %v11647_v41, %v11733_v28  ;;  %v6283_v29 = vcombine.low %v11666_v9, %v11739_v52  ;;  %v6284_v36 = vcombine.high %v11666_v9, %v11739_v52  ;;  %v7220_v47 = vld [vmem:[#allocation3 + $0x3a] sm:$0xff] }
 0x853   : > { %v7007_v25 = vcombine.low %v11684_v51, %v11741_v2  ;;  %v11765_v44 = vrot.slane %v5633_v16, %v13952_v5  ;;  %v11774_v6 = vrot.slane %v5634_v17, %v13952_v5  ;;  %v7075_v54 = vcombine.low %v11656_v15, %v7220_v47 }
 0x854   : > { %v11754_v33 = vrot.slane %v6351_v59, %v13952_v5  ;;  %v11760_v48 = vld [vmem:[#allocation3 + $0x50] sm:$0xff]  ;;  %v11768_v31 = vrot.slane %v6352_v50, %v13952_v5  ;;  %v11771_v34 = vrot.slane %v6283_v29, %v13952_v5  ;;  %v11808_v1 = vrot.slane %v6284_v36, %v13952_v5 }
 0x855   : > { %v11762_v62 = vld [vmem:[#allocation3 + $0x51] sm:$0xff]  ;;  %7487 = vrot.lane.b32.xlu1 %v11656_v15, %s8132_s11  ;;  %6517 = vrot.lane.b32.xlu0 %v11686_v49, %s8128_s8  ;;  %v11780_v18 = vld [vmem:[#allocation3 + $0x49] sm:$0xff]  ;;  %v5649_v39 = vcombine.low %v11638_v14, %v11760_v48  ;;  %v5650_v55 = vcombine.high %v11638_v14, %v11760_v48  ;;  %v11843_v53 = vrot.slane %v7007_v25, %v13952_v5 }
 0x856   : > { %v11782_v41 = vld [vmem:[#allocation3 + $0x4a] sm:$0xff]  ;;  %v6367_v38 = vcombine.low %v11658_v26, %v11762_v62  ;;  %v6368_v60 = vcombine.high %v11658_v26, %v11762_v62  ;;  %v6299_v57 = vcombine.low %v11686_v49, %v11780_v18  ;;  %v6300_v58 = vcombine.high %v11686_v49, %v11780_v18  ;;  %v7222_v63 = vld [vmem:[#allocation3 + $0x52] sm:$0xff] }
 0x857   : > { %v7023_v27 = vcombine.low %v11715_v10, %v11782_v41  ;;  %v11802_v43 = vrot.slane %v5649_v39, %v13952_v5  ;;  %v11814_v20 = vrot.slane %v5650_v55, %v13952_v5  ;;  %v7091_v50 = vcombine.low %v11668_v32, %v7222_v63 }
 0x858   : > { %v11799_v9 = vrot.slane %v6367_v38, %v13952_v5  ;;  %v11805_v26 = vrot.slane %v6368_v60, %v13952_v5  ;;  %v11811_v14 = vrot.slane %v6299_v57, %v13952_v5  ;;  %v11817_v21 = vrot.slane %v6300_v58, %v13952_v5 }
 0x859   : > { %v11820_v19 = vrot.slane %v7023_v27, %v13952_v5  ;;  %7485 = vrot.lane.b32.xlu1 %v11684_v51, %s8132_s11  ;;  %7491 = vrot.lane.b32.xlu0 %v11668_v32, %s8132_s11  ;;  %v5666_v35 = vcombine.high %v11765_v44, %v11802_v43  ;;  %v5681_v40 = vcombine.low %v11774_v6, %v11814_v20 }
 0x85a   : > { %v6384_v42 = vcombine.high %v11754_v33, %v11799_v9  ;;  %v6399_v56 = vcombine.low %v11768_v31, %v11805_v26  ;;  %v6316_v49 = vcombine.high %v11771_v34, %v11811_v14  ;;  %v6331_v24 = vcombine.low %v11808_v1, %v11817_v21 }
 0x85b   : > { %v6400_v46 = vcombine.high %v11768_v31, %v11805_v26  ;;  %v6332_v23 = vcombine.high %v11808_v1, %v11817_v21  ;;  %v5682_v59 = vcombine.high %v11774_v6, %v11814_v20  ;;  %v7040_v16 = vcombine.high %v11843_v53, %v11820_v19 }
 0x85c   : > { %v7008_v29 = vcombine.high %v11684_v51, %v11741_v2  ;;  %v7024_v17 = vcombine.high %v11715_v10, %v11782_v41  ;;  %v7076_v36 = vcombine.high %v11656_v15, %v7220_v47  ;;  %v7092_v25 = vcombine.high %v11668_v32, %v7222_v63 }
 0x85d   : > { %7489 = vrot.lane.b32.xlu0 %v11715_v10, %s8132_s11  ;;  %5797 = vrot.lane.b32.xlu1 %v11670_v4, %s8128_s8  ;;  %v6383_v38 = vcombine.low %v11754_v33, %v11799_v9  ;;  %v11864_v39 = vrot.slane %v7075_v54, %v13952_v5  ;;  %v11867_v60 = vrot.slane %v7091_v50, %v13952_v5 }
 0x85e   : > { %v11870_v57 = vrot.slane %v7008_v29, %v13952_v5  ;;  %v11873_v51 = vrot.slane %v7024_v17, %v13952_v5  ;;  %v11880_v15 = vrot.slane %v7076_v36, %v13952_v5  ;;  %v11883_v32 = vrot.slane %v7092_v25, %v13952_v5 }
 0x85f   : > { %v7108_v10 = vcombine.high %v11864_v39, %v11867_v60  ;;  %v6315_v54 = vcombine.low %v11771_v34, %v11811_v14  ;;  %v7107_v50 = vcombine.low %v11864_v39, %v11867_v60  ;;  %v5665_v29 = vcombine.low %v11765_v44, %v11802_v43 }
 0x860   : > { %v7055_v55 = vcombine.low %v11870_v57, %v11873_v51  ;;  %v7056_v58 = vcombine.high %v11870_v57, %v11873_v51  ;;  %v7124_v27 = vcombine.high %v11880_v15, %v11883_v32  ;;  %v7039_v17 = vcombine.low %v11843_v53, %v11820_v19 }
 0x861   : > { %6051 = vrot.lane.b32.xlu1 %v11670_v4, %s8132_s11  ;;  %5801 = vrot.lane.b32.xlu0 %v11688_v12, %s8128_s8  ;;  %v7123_v4 = vcombine.low %v11880_v15, %v11883_v32  ;;  %v5689_v8 = vrot.slane %v5681_v40, %v13953_v11  ;;  %v11987_v3 = vrot.slane %v6331_v24, %v13953_v11 }
 0x862   : > { %v12015_v31 = vrot.slane %v5682_v59, %v13953_v11  ;;  %v12021_v26 = vrot.slane %v7040_v16, %v13953_v11  ;;  %v12032_v6 = vrot.slane %v7108_v10, %v13953_v11  ;;  %v12035_v20 = vrot.slane %v7055_v55, %v13953_v11 }
 0x863   : > { %v12077_v33 = vrot.slane %v7056_v58, %v13953_v11  ;;  %v12083_v9 = vrot.slane %v5597_v13, %v13953_v11  ;;  %v5699_v10 = vcombine.high %v5689_v8, %v13940_v30  ;;  %v12124_v58 = vrot.slane %v6315_v54, %v13953_v11 }
 0x864   : > { %v12139_v34 = vrot.slane %v7107_v50, %v13953_v11  ;;  %v12145_v14 = vrot.slane %v5665_v29, %v13953_v11 }
 0x865   : > { %5799 = vrot.lane.b32.xlu1 %v11731_v7, %s8128_s8  ;;  %6055 = vrot.lane.b32.xlu0 %v11688_v12, %s8132_s11  ;;  %v5612_v12 = vrot.slane %v5598_v61, %v13953_v11  ;;  %v5680_v61 = vrot.slane %v5666_v35, %v13953_v11  ;;  %v12049_v35 = vrot.slane %v7123_v4, %v13953_v11 }
 0x866   : > { %v5629_v16 = vcombine.high %v12083_v9, %v13940_v30  ;;  %13954 = vst [vmem:[#allocation139_spill] sm:$0xff] %v12124_v58  ;;  %13955 = vst [vmem:[#allocation19_spill] sm:$0xff] %v12139_v34  ;;  %v5697_v39 = vcombine.high %v12145_v14, %v13940_v30 }
 0x867   : > { %v5698_v13 = vcombine.high %v5680_v61, %v13940_v30  ;;  %v5630_v36 = vcombine.high %v5612_v12, %v13940_v30  ;;  %13956 = vst [vmem:[#allocation113_spill] sm:$0xff] %v12145_v14 }
 0x869   : > { %6053 = vrot.lane.b32.xlu1 %v11731_v7, %s8132_s11  ;;  %5803 = vrot.lane.b32.xlu0 %v11760_v48, %s8128_s8  ;;  %v6398_v7 = vrot.slane %v6384_v42, %v13953_v11 }
 0x86b   : > { %v6416_v59 = vcombine.high %v6398_v7, %v13940_v30 }
 0x86d   : > { %6771 = vrot.lane.b32.xlu1 %v11733_v28, %s8132_s11  ;;  %6057 = vrot.lane.b32.xlu0 %v11760_v48, %s8132_s11  ;;  %v6414_v48 = vrot.slane %v6400_v46, %v13953_v11 }
 0x871   : > { %7241 = vrot.lane.b32.xlu1 %v7220_v47, %s8128_s8  ;;  %6775 = vrot.lane.b32.xlu0 %v11762_v62, %s8132_s11 }
 0x875   : > { %6769 = vrot.lane.b32.xlu1 %v11739_v52, %s8132_s11  ;;  %7245 = vrot.lane.b32.xlu0 %v7222_v63, %s8128_s8 }
 0x879   : > { %7239 = vrot.lane.b32.xlu1 %v11741_v2, %s8128_s8  ;;  %6773 = vrot.lane.b32.xlu0 %v11780_v18, %s8132_s11 }
 0x87d   : > { %6523 = vrot.lane.b32.xlu1 %v11733_v28, %s8128_s8  ;;  %7243 = vrot.lane.b32.xlu0 %v11782_v41, %s8128_s8  ;;  %v5621_v28 = vrot.slane %v5613_v45, %v13953_v11  ;;  %v6407_v45 = vrot.slane %v6399_v56, %v13953_v11  ;;  %v12055_v56 = vrot.slane %v7124_v27, %v13953_v11 }
 0x87f   : > { %v6417_v57 = vcombine.high %v6407_v45, %v13940_v30  ;;  %v5631_v51 = vcombine.high %v5621_v28, %v13940_v30 }
 0x881   : > { %6521 = vrot.lane.b32.xlu1 %v11739_v52, %s8128_s8  ;;  %6527 = vrot.lane.b32.xlu0 %v11762_v62, %s8128_s8  ;;  %v11961_v52 = vrot.slane %v5614_v37, %v13953_v11  ;;  %v12002_v62 = vrot.slane %v6332_v23, %v13953_v11 }
 0x883   : > { %v5632_v55 = vcombine.high %v11961_v52, %v13940_v30  ;;  %v6350_v60 = vcombine.high %v12002_v62, %v13940_v30 }
 0x885   : > { %7495 = vrot.lane.b32.xlu1 %v7220_v47, %s8132_s11  ;;  %6525 = vrot.lane.b32.xlu0 %v11780_v18, %s8128_s8 }
 0x889   : > { %7493 = vrot.lane.b32.xlu1 %v11741_v2, %s8132_s11  ;;  %7499 = vrot.lane.b32.xlu0 %v7222_v63, %s8132_s11  ;;  %v11974_v2 = vrot.slane %v6316_v49, %v13953_v11  ;;  %v12061_v49 = vrot.slane %v6383_v38, %v13953_v11 }
 0x88b   : > { %v6415_v46 = vcombine.high %v12061_v49, %v13940_v30  ;;  %v6348_v50 = vcombine.high %v11974_v2, %v13940_v30 }
 0x88d   : > { %7497 = vrot.lane.b32.xlu0 %v11782_v41, %s8132_s11  ;;  %5706 = vrot.lane.b32.xlu1 %v5612_v12, %s8124_s28  ;;  %v6418_v12 = vcombine.high %v6414_v48, %v13940_v30 }
 0x891   : > { %6452 = vrot.lane.b32.xlu0 %v6398_v7, %s8124_s28  ;;  %5714 = vrot.lane.b32.xlu1 %v5621_v28, %s8122_s21  ;;  %v6347_v7 = vcombine.high %v12124_v58, %v13940_v30 }
 0x895   : > { %5734 = vrot.lane.b32.xlu0 %v5680_v61, %s8124_s28  ;;  %5722 = vrot.lane.b32.xlu1 %v11961_v52, %s8121_s20  ;;  %v7139_v61 = vcombine.high %v12139_v34, %v13940_v30 }
 0x899   : > { %6460 = vrot.lane.b32.xlu0 %v6407_v45, %s8122_s21  ;;  %6424 = vrot.lane.b32.xlu1 %v11974_v2, %s8124_s28  ;;  %v5700_v45 = vcombine.high %v12015_v31, %v13940_v30 }
 0x89b   : > { %v11989_v37 = vpop.permute.xlu1 %5789 }
 0x89d   : > { %5742 = vrot.lane.b32.xlu0 %v5689_v8, %s8122_s21  ;;  %6432 = vrot.lane.b32.xlu1 %v11987_v3, %s8122_s21  ;;  %v6349_v8 = vcombine.high %v11987_v3, %v13940_v30 }
 0x89f   : > { %v12004_v18 = vpop.permute.xlu0 %5793  ;;  %v12009_v41 = vpop.permute.xlu1 %6043 }
 0x8a1   : > { %6468 = vrot.lane.b32.xlu0 %v6414_v48, %s8121_s20  ;;  %6440 = vrot.lane.b32.xlu1 %v12002_v62, %s8121_s20  ;;  %v12179_v48 = vrot.slane %v7039_v17, %v13953_v11 }
 0x8a3   : > { %v12027_v1 = vpop.permute.xlu0 %6047  ;;  %13957 = vst [vmem:[#allocation74_spill] sm:$0xff] %v12179_v48  ;;  %v7071_v3 = vcombine.high %v12179_v48, %v13940_v30 }
 0x8a5   : > { %5750 = vrot.lane.b32.xlu0 %v12015_v31, %s8121_s20  ;;  %7148 = vrot.lane.b32.xlu1 %v12021_v26, %s8124_s28  ;;  %v7140_v31 = vcombine.high %v12032_v6, %v13940_v30 }
 0x8a7   : > { %v12029_v21 = vpop.permute.xlu1 %5791 }
 0x8a9   : > { %7176 = vrot.lane.b32.xlu0 %v12032_v6, %s8124_s28  ;;  %7156 = vrot.lane.b32.xlu1 %v12035_v20, %s8122_s21 }
 0x8ab   : > { %v12041_v47 = vpop.permute.xlu0 %5795  ;;  %v12043_v42 = vpop.permute.xlu1 %6045 }
 0x8ad   : > { %7184 = vrot.lane.b32.xlu0 %v12049_v35, %s8122_s21  ;;  %7192 = vrot.lane.b32.xlu1 %v12055_v56, %s8121_s20 }
 0x8af   : > { %v12067_v40 = vpop.permute.xlu0 %6049  ;;  %v12069_v24 = vpop.permute.xlu1 %6763 }
 0x8b1   : > { %6448 = vrot.lane.b32.xlu0 %v6415_v46, %s8125_s7  ;;  %7164 = vrot.lane.b32.xlu1 %v12077_v33, %s8121_s20 }
 0x8b3   : > { %v12088_v63 = vpop.permute.xlu0 %6767  ;;  %v12090_v23 = vpop.permute.xlu1 %7233 }
 0x8b5   : > { %6456 = vrot.lane.b32.xlu0 %v6416_v59, %s8123_s27  ;;  %5702 = vrot.lane.b32.xlu1 %v5629_v16, %s8125_s7 }
 0x8b7   : > { %v12097_v22 = vpop.permute.xlu0 %7237  ;;  %v12099_v0 = vpop.permute.xlu1 %6761 }
 0x8b9   : > { %5738 = vrot.lane.b32.xlu0 %v5698_v13, %s8123_s27  ;;  %5710 = vrot.lane.b32.xlu1 %v5630_v36, %s8123_s27 }
 0x8bb   : > { %v12105_v25 = vpop.permute.xlu0 %6765  ;;  %v12107_v38 = vpop.permute.xlu1 %7231 }
 0x8bd   : > { %6464 = vrot.lane.b32.xlu0 %v6417_v57, %s8119_s30  ;;  %5718 = vrot.lane.b32.xlu1 %v5631_v51, %s8119_s30  ;;  %v7072_v51 = vcombine.high %v12021_v26, %v13940_v30  ;;  %v7073_v26 = vcombine.high %v12035_v20, %v13940_v30 }
 0x8bf   : > { %v12113_v15 = vpop.permute.xlu0 %7235  ;;  %v12115_v32 = vpop.permute.xlu1 %6515 }
 0x8c1   : > { %5746 = vrot.lane.b32.xlu0 %v5699_v10, %s8119_s30  ;;  %5726 = vrot.lane.b32.xlu1 %v5632_v55, %s8120_s16 }
 0x8c3   : > { %v12128_v4 = vpop.permute.xlu0 %6519  ;;  %v12130_v27 = vpop.permute.xlu1 %6513 }
 0x8c5   : > { %6472 = vrot.lane.b32.xlu0 %v6418_v12, %s8120_s16  ;;  %6420 = vrot.lane.b32.xlu1 %v6347_v7, %s8125_s7 }
 0x8c7   : > { %v12149_v54 = vpop.permute.xlu0 %6517  ;;  %v12151_v28 = vpop.permute.xlu1 %7487 }
 0x8c9   : > { %7172 = vrot.lane.b32.xlu0 %v7139_v61, %s8125_s7  ;;  %5730 = vrot.lane.b32.xlu1 %v5697_v39, %s8125_s7 }
 0x8cb   : > { %v12159_v44 = vpop.permute.xlu0 %7491  ;;  %v12161_v43 = vpop.permute.xlu1 %7485 }
 0x8cd   : > { %6444 = vrot.lane.b32.xlu0 %v6350_v60, %s8120_s16  ;;  %6428 = vrot.lane.b32.xlu1 %v6348_v50, %s8123_s27 }
 0x8cf   : > { %v12169_v29 = vpop.permute.xlu0 %7489  ;;  %v5798_v52 = vpop.permute.xlu1 %5797 }
 0x8d0   : > { %v5813_v2 = vcombine.low %v11989_v37, %v5798_v52  ;;  %v5814_v53 = vcombine.high %v11989_v37, %v5798_v52  ;;  %v7074_v52 = vcombine.high %v12077_v33, %v13940_v30 }
 0x8d1   : > { %5754 = vrot.lane.b32.xlu0 %v5700_v45, %s8120_s16  ;;  %6436 = vrot.lane.b32.xlu1 %v6349_v8, %s8119_s30 }
 0x8d2   : > { %v12196_v17 = vrot.slane %v5813_v2, %v13952_v5  ;;  %v5828_v55 = vrot.slane %v5814_v53, %v13952_v5 }
 0x8d3   : > { %v5802_v62 = vpop.permute.xlu0 %5801  ;;  %v12184_v46 = vpop.permute.xlu1 %6051 }
 0x8d4   : > { %v5829_v59 = vcombine.low %v12004_v18, %v5802_v62  ;;  %v5830_v19 = vcombine.high %v12004_v18, %v5802_v62  ;;  %v6067_v6 = vcombine.low %v12009_v41, %v12184_v46  ;;  %v7141_v18 = vcombine.high %v12049_v35, %v13940_v30 }
 0x8d5   : > { %7180 = vrot.lane.b32.xlu0 %v7140_v31, %s8123_s27  ;;  %7144 = vrot.lane.b32.xlu1 %v7071_v3, %s8125_s7 }
 0x8d6   : > { %v12199_v16 = vrot.slane %v5829_v59, %v13952_v5  ;;  %v12206_v57 = vrot.slane %v5830_v19, %v13952_v5  ;;  %v12218_v35 = vrot.slane %v6067_v6, %v13952_v5  ;;  %v7142_v59 = vcombine.high %v12055_v56, %v13940_v30 }
 0x8d7   : > { %v6056_v13 = vpop.permute.xlu0 %6055  ;;  %v5800_v36 = vpop.permute.xlu1 %5799  ;;  %v6068_v56 = vcombine.high %v12009_v41, %v12184_v46 }
 0x8d8   : > { %v6083_v10 = vcombine.low %v12027_v1, %v6056_v13  ;;  %v5881_v12 = vcombine.low %v12029_v21, %v5800_v36  ;;  %v5861_v60 = vcombine.low %v5828_v55, %v12206_v57  ;;  %v5846_v8 = vcombine.high %v12196_v17, %v12199_v16 }
 0x8d9   : > { %7188 = vrot.lane.b32.xlu0 %v7141_v18, %s8119_s30  ;;  %7152 = vrot.lane.b32.xlu1 %v7072_v51, %s8123_s27  ;;  %v6084_v19 = vcombine.high %v12027_v1, %v6056_v13  ;;  %v5882_v18 = vcombine.high %v12029_v21, %v5800_v36 }
 0x8da   : > { %v12221_v7 = vrot.slane %v6083_v10, %v13952_v5  ;;  %v12237_v2 = vrot.slane %v5881_v12, %v13952_v5  ;;  %v12271_v13 = vrot.slane %v5846_v8, %v13953_v11 }
 0x8db   : > { %v5804_v61 = vpop.permute.xlu0 %5803  ;;  %v12223_v39 = vpop.permute.xlu1 %6053 }
 0x8dc   : > { %v5897_v50 = vcombine.low %v12041_v47, %v5804_v61  ;;  %13958 = vst [vmem:[#allocation69_spill] sm:$0xff] %v12237_v2  ;;  %v5898_v62 = vcombine.high %v12041_v47, %v5804_v61  ;;  %v6135_v33 = vcombine.low %v12043_v42, %v12223_v39  ;;  %v6100_v53 = vcombine.high %v12218_v35, %v12221_v7 }
 0x8dd   : > { %7160 = vrot.lane.b32.xlu0 %v7073_v26, %s8119_s30  ;;  %7168 = vrot.lane.b32.xlu1 %v7074_v52, %s8120_s16  ;;  %v12258_v47 = vrot.slane %v5861_v60, %v13953_v11  ;;  %v5862_v61 = vcombine.high %v5828_v55, %v12206_v57  ;;  %v6098_v26 = vrot.slane %v6084_v19, %v13952_v5 }
 0x8de   : > { %v12240_v20 = vrot.slane %v5897_v50, %v13952_v5  ;;  %v12274_v10 = vrot.slane %v5898_v62, %v13952_v5  ;;  %v12279_v36 = vrot.slane %v6135_v33, %v13952_v5  ;;  %v12293_v50 = vrot.slane %v6100_v53, %v13953_v11 }
 0x8df   : > { %v12246_v31 = vpop.permute.xlu0 %6057  ;;  %v12248_v3 = vpop.permute.xlu1 %6771  ;;  %v5896_v52 = vrot.slane %v5882_v18, %v13952_v5  ;;  %v6082_v62 = vrot.slane %v6068_v56, %v13952_v5 }
 0x8e0   : > { %13959 = vst [vmem:[#allocation127_spill] sm:$0xff] %v12240_v20  ;;  %v6151_v51 = vcombine.low %v12067_v40, %v12246_v31  ;;  %v6853_v1 = vcombine.low %v12069_v24, %v12248_v3  ;;  %v5914_v21 = vcombine.high %v12237_v2, %v12240_v20  ;;  %13960 = vst [vmem:[#allocation25_spill] sm:$0xff] %v12293_v50 }
 0x8e1   : > { %7196 = vrot.lane.b32.xlu0 %v7142_v59, %s8120_s16  ;;  %5962 = vrot.lane.b32.xlu1 %v12258_v47, %s8122_s21  ;;  %v5929_v33 = vcombine.low %v5896_v52, %v12274_v10  ;;  %v6116_v48 = vcombine.high %v6082_v62, %v6098_v26  ;;  %v6152_v34 = vcombine.high %v12067_v40, %v12246_v31 }
 0x8e2   : > { %v12282_v41 = vrot.slane %v6151_v51, %v13952_v5  ;;  %v12302_v57 = vrot.slane %v6853_v1, %v13952_v5  ;;  %v12317_v18 = vrot.slane %v5914_v21, %v13953_v11  ;;  %v6115_v51 = vcombine.low %v6082_v62, %v6098_v26 }
 0x8e3   : > { %v12284_v46 = vpop.permute.xlu0 %6775  ;;  %v12286_v12 = vpop.permute.xlu1 %7241  ;;  %v12322_v1 = vrot.slane %v5862_v61, %v13953_v11  ;;  %v12343_v37 = vrot.slane %v5929_v33, %v13953_v11  ;;  %v5930_v40 = vcombine.high %v5896_v52, %v12274_v10 }
 0x8e4   : > { %v6869_v60 = vcombine.low %v12088_v63, %v12284_v46  ;;  %v7323_v59 = vcombine.low %v12090_v23, %v12286_v12  ;;  %13961 = vst [vmem:[#allocation120_spill] sm:$0xff] %v12317_v18  ;;  %v6168_v21 = vcombine.high %v12279_v36, %v12282_v41  ;;  %v12349_v14 = vrot.slane %v6115_v51, %v13953_v11 }
 0x8e5   : > { %5954 = vrot.lane.b32.xlu0 %v12271_v13, %s8124_s28  ;;  %6208 = vrot.lane.b32.xlu1 %v12293_v50, %s8124_s28  ;;  %13962 = vst [vmem:[#allocation107_spill] sm:$0xff] %v12322_v1  ;;  %13963 = vst [vmem:[#allocation45_spill] sm:$0xff] %v12343_v37 }
 0x8e6   : > { %v12305_v55 = vrot.slane %v6869_v60, %v13952_v5  ;;  %v12335_v56 = vrot.slane %v7323_v59, %v13952_v5  ;;  %v12371_v59 = vrot.slane %v6168_v21, %v13953_v11 }
 0x8e7   : > { %v12312_v19 = vpop.permute.xlu0 %7245  ;;  %v12314_v53 = vpop.permute.xlu1 %6769 }
 0x8e8   : > { %v7339_v60 = vcombine.low %v12097_v22, %v12312_v19  ;;  %v6785_v6 = vcombine.low %v12099_v0, %v12314_v53  ;;  %13964 = vst [vmem:[#allocation76_spill] sm:$0xff] %v12371_v59 }
 0x8e9   : > { %5982 = vrot.lane.b32.xlu0 %v12317_v18, %s8124_s28  ;;  %5970 = vrot.lane.b32.xlu1 %v12322_v1, %s8121_s20 }
 0x8ea   : > { %v12338_v61 = vrot.slane %v7339_v60, %v13952_v5  ;;  %v6136_v60 = vcombine.high %v12043_v42, %v12223_v39  ;;  %v12358_v33 = vrot.slane %v6785_v6, %v13952_v5  ;;  %v6166_v42 = vrot.slane %v6152_v34, %v13952_v5 }
 0x8eb   : > { %v6774_v8 = vpop.permute.xlu0 %6773  ;;  %v12340_v45 = vpop.permute.xlu1 %7239  ;;  %v12377_v6 = vrot.slane %v6116_v48, %v13953_v11 }
 0x8ec   : > { %v6801_v18 = vcombine.low %v12105_v25, %v6774_v8  ;;  %v7255_v31 = vcombine.low %v12107_v38, %v12340_v45  ;;  %v6150_v10 = vrot.slane %v6136_v60, %v13952_v5 }
 0x8ed   : > { %5990 = vrot.lane.b32.xlu0 %v12343_v37, %s8122_s21  ;;  %6216 = vrot.lane.b32.xlu1 %v12349_v14, %s8122_s21 }
 0x8ee   : > { %v12361_v26 = vrot.slane %v6801_v18, %v13952_v5  ;;  %v12388_v34 = vrot.slane %v7255_v31, %v13952_v5  ;;  %v6183_v60 = vcombine.low %v6150_v10, %v6166_v42  ;;  %v6184_v2 = vcombine.high %v6150_v10, %v6166_v42 }
 0x8ef   : > { %v7244_v62 = vpop.permute.xlu0 %7243  ;;  %v12368_v51 = vpop.permute.xlu1 %6523 }
 0x8f0   : > { %v7271_v18 = vcombine.low %v12113_v15, %v7244_v62  ;;  %v6605_v52 = vcombine.low %v12115_v32, %v12368_v51  ;;  %13965 = vst [vmem:[#allocation49_spill] sm:$0xff] %v12388_v34 }
 0x8f1   : > { %6236 = vrot.lane.b32.xlu0 %v12371_v59, %s8124_s28  ;;  %6224 = vrot.lane.b32.xlu1 %v12377_v6, %s8121_s20  ;;  %v12398_v59 = vrot.slane %v5930_v40, %v13953_v11 }
 0x8f2   : > { %v12391_v21 = vrot.slane %v7271_v18, %v13952_v5  ;;  %v6802_v18 = vcombine.high %v12105_v25, %v6774_v8  ;;  %v12410_v20 = vrot.slane %v6605_v52, %v13952_v5  ;;  %v6786_v25 = vcombine.high %v12099_v0, %v12314_v53 }
 0x8f3   : > { %v12393_v48 = vpop.permute.xlu0 %6527  ;;  %v12395_v39 = vpop.permute.xlu1 %6521  ;;  %13967 = vst [vmem:[#allocation117_spill] sm:$0xff] %v12398_v59  ;;  %v12429_v8 = vrot.slane %v6183_v60, %v13953_v11  ;;  %v7272_v0 = vcombine.high %v12113_v15, %v7244_v62  ;;  %v7256_v62 = vcombine.high %v12107_v38, %v12340_v45 }
 0x8f4   : > { %13966 = vst [vmem:[#allocation109_spill] sm:$0xff] %v12391_v21  ;;  %v6621_v37 = vcombine.low %v12128_v4, %v12393_v48  ;;  %v7288_v31 = vcombine.high %v12388_v34, %v12391_v21  ;;  %v6537_v1 = vcombine.low %v12130_v27, %v12395_v39  ;;  %v6886_v34 = vcombine.high %v12302_v57, %v12305_v55 }
 0x8f5   : > { %5998 = vrot.lane.b32.xlu0 %v12398_v59, %s8121_s20  ;;  %13970 = vst [vmem:[#allocation71_spill] sm:$0xff] %v12429_v8  ;;  %v12435_v10 = vrot.slane %v6802_v18, %v13952_v5  ;;  %v12453_v18 = vrot.slane %v6184_v2, %v13953_v11  ;;  %v12484_v38 = vrot.slane %v7272_v0, %v13952_v5 }
 0x8f6   : > { %v12413_v40 = vrot.slane %v6621_v37, %v13952_v5  ;;  %v12420_v21 = vrot.slane %v7288_v31, %v13953_v11  ;;  %v12443_v53 = vrot.slane %v6537_v1, %v13952_v5  ;;  %v12463_v1 = vrot.slane %v6886_v34, %v13953_v11 }
 0x8f7   : > { %v6526_v50 = vpop.permute.xlu0 %6525  ;;  %v12417_v58 = vpop.permute.xlu1 %7495  ;;  %13973 = vst [vmem:[#allocation140_spill] sm:$0xff] %v12453_v18 }
 0x8f8   : > { %13968 = vst [vmem:[#allocation40_spill] sm:$0xff] %v12413_v40  ;;  %13969 = vst [vmem:[#allocation115_spill] sm:$0xff] %v12420_v21  ;;  %v6553_v42 = vcombine.low %v12149_v54, %v6526_v50  ;;  %7396 = vrot.lane.b32.xlu1 %v12420_v21, %s8124_s28  ;;  %v7577_v52 = vcombine.low %v12151_v28, %v12417_v58  ;;  %v7356_v21 = vcombine.high %v12335_v56, %v12338_v61 }
 0x8f9   : > { %6244 = vrot.lane.b32.xlu0 %v12429_v8, %s8122_s21  ;;  %13971 = vst [vmem:[#allocation133_spill] sm:$0xff] %v12443_v53  ;;  %v12458_v8 = vrot.slane %v6786_v25, %v13952_v5  ;;  %13974 = vst [vmem:[#allocation106_spill] sm:$0xff] %v12463_v1  ;;  %v6554_v45 = vcombine.high %v12149_v54, %v6526_v50  ;;  %v7270_v50 = vrot.slane %v7256_v62, %v13952_v5 }
 0x8fa   : > { %v12446_v60 = vrot.slane %v6553_v42, %v13952_v5  ;;  %v12476_v59 = vrot.slane %v7577_v52, %v13952_v5  ;;  %v12503_v54 = vrot.slane %v7356_v21, %v13953_v11 }
 0x8fb   : > { %v12448_v31 = vpop.permute.xlu0 %7499  ;;  %v12450_v37 = vpop.permute.xlu1 %7493  ;;  %v6833_v25 = vcombine.low %v12458_v8, %v12435_v10  ;;  %v7303_v21 = vcombine.low %v7270_v50, %v12484_v38  ;;  %v6568_v62 = vrot.slane %v6554_v45, %v13952_v5 }
 0x8fc   : > { %13972 = vst [vmem:[#allocation48_spill] sm:$0xff] %v12446_v60  ;;  %v7593_v15 = vcombine.low %v12159_v44, %v12448_v31  ;;  %v6570_v2 = vcombine.high %v12443_v53, %v12446_v60  ;;  %6252 = vrot.lane.b32.xlu1 %v12453_v18, %s8121_s20  ;;  %v7509_v42 = vcombine.low %v12161_v43, %v12450_v37  ;;  %13977 = vst [vmem:[#allocation54_spill] sm:$0xff] %v12503_v54 }
 0x8fd   : > { %6954 = vrot.lane.b32.xlu0 %v12463_v1, %s8124_s28  ;;  %v6818_v1 = vcombine.high %v12358_v33, %v12361_v26  ;;  %v6538_v18 = vcombine.high %v12130_v27, %v12395_v39 }
 0x8fe   : > { %v12479_v34 = vrot.slane %v7593_v15, %v13952_v5  ;;  %v12494_v52 = vrot.slane %v6570_v2, %v13953_v11  ;;  %v6870_v15 = vcombine.high %v12088_v63, %v12284_v46  ;;  %v6854_v63 = vcombine.high %v12069_v24, %v12248_v3 }
 0x8ff   : > { %v12489_v60 = vpop.permute.xlu0 %7497  ;;  %v12491_v53 = vpop.permute.xlu1 %5706  ;;  %v12517_v46 = vrot.slane %v6833_v25, %v13953_v11  ;;  %v12522_v27 = vrot.slane %v7509_v42, %v13952_v5  ;;  %v7340_v3 = vcombine.high %v12097_v22, %v12312_v19  ;;  %v6638_v25 = vcombine.high %v12410_v20, %v12413_v40 }
 0x900   : > { %13975 = vst [vmem:[#allocation78_spill] sm:$0xff] %v12479_v34  ;;  %13976 = vst [vmem:[#allocation33_spill] sm:$0xff] %v12494_v52  ;;  %v7525_v2 = vcombine.low %v12169_v29, %v12489_v60  ;;  %6678 = vrot.lane.b32.xlu1 %v12494_v52, %s8124_s28  ;;  %v6884_v24 = vrot.slane %v6870_v15, %v13952_v5  ;;  %v12537_v45 = vrot.slane %v6818_v1, %v13953_v11 }
 0x901   : > { %7424 = vrot.lane.b32.xlu0 %v12503_v54, %s8124_s28  ;;  %13978 = vst [vmem:[#allocation85_spill] sm:$0xff] %v12517_v46  ;;  %v6552_v42 = vrot.slane %v6538_v18, %v13952_v5  ;;  %v6868_v54 = vrot.slane %v6854_v63, %v13952_v5  ;;  %v7324_v15 = vcombine.high %v12090_v23, %v12286_v12 }
 0x902   : > { %v12525_v39 = vrot.slane %v7525_v2, %v13952_v5  ;;  %13979 = vst [vmem:[#allocation96_spill] sm:$0xff] %v12537_v45  ;;  %v12554_v18 = vrot.slane %v7303_v21, %v13953_v11  ;;  %v7354_v40 = vrot.slane %v7340_v3, %v13952_v5  ;;  %v6622_v63 = vcombine.high %v12128_v4, %v12393_v48 }
 0x903   : > { %v12527_v0 = vpop.permute.xlu0 %6452  ;;  %v12529_v52 = vpop.permute.xlu1 %5714  ;;  %v6585_v22 = vcombine.low %v6552_v42, %v6568_v62  ;;  %v6901_v2 = vcombine.low %v6868_v54, %v6884_v24  ;;  %v7338_v23 = vrot.slane %v7324_v15, %v13952_v5  ;;  %v6606_v12 = vcombine.high %v12115_v32, %v12368_v51 }
 0x904   : > { %6934 = vrot.lane.b32.xlu1 %v12517_v46, %s8122_s21  ;;  %13980 = vst [vmem:[#allocation59_spill] sm:$0xff] %v12554_v18  ;;  %v12560_v46 = vrot.slane %v6638_v25, %v13953_v11  ;;  %v6834_v21 = vcombine.high %v12458_v8, %v12435_v10  ;;  %v7304_v51 = vcombine.high %v7270_v50, %v12484_v38 }
 0x905   : > { %6926 = vrot.lane.b32.xlu0 %v12537_v45, %s8124_s28  ;;  %v12576_v48 = vrot.slane %v6585_v22, %v13953_v11  ;;  %v7371_v25 = vcombine.low %v7338_v23, %v7354_v40  ;;  %v12580_v15 = vrot.slane %v6901_v2, %v13953_v11  ;;  %v6620_v32 = vrot.slane %v6606_v12, %v13952_v5 }
 0x906   : > { %v12593_v22 = vrot.slane %v6834_v21, %v13953_v11  ;;  %v6586_v12 = vcombine.high %v6552_v42, %v6568_v62  ;;  %v7594_v38 = vcombine.high %v12159_v44, %v12448_v31  ;;  %v12609_v21 = vrot.slane %v7304_v51, %v13953_v11 }
 0x907   : > { %v12549_v19 = vpop.permute.xlu0 %5734  ;;  %v12551_v1 = vpop.permute.xlu1 %5722  ;;  %13981 = vst [vmem:[#allocation135_spill] sm:$0xff] %v12576_v48  ;;  %v12596_v2 = vrot.slane %v7371_v25, %v13953_v11  ;;  %v6902_v45 = vcombine.high %v6868_v54, %v6884_v24  ;;  %v7610_v31 = vcombine.high %v12476_v59, %v12479_v34  ;;  %v7372_v42 = vcombine.high %v7338_v23, %v7354_v40 }
 0x908   : > { %7404 = vrot.lane.b32.xlu1 %v12554_v18, %s8122_s21  ;;  %v6636_v18 = vrot.slane %v6622_v63, %v13952_v5  ;;  %13982 = vst [vmem:[#allocation114_spill] sm:$0xff] %v12593_v22  ;;  %v7608_v44 = vrot.slane %v7594_v38, %v13952_v5  ;;  %v12628_v24 = vrot.slane %v6586_v12, %v13953_v11 }
 0x909   : > { %6706 = vrot.lane.b32.xlu0 %v12560_v46, %s8124_s28  ;;  %v12643_v12 = vrot.slane %v7610_v31, %v13953_v11  ;;  %v12648_v23 = vrot.slane %v7372_v42, %v13953_v11 }
 0x90a   : > { %v6653_v63 = vcombine.low %v6620_v32, %v6636_v18  ;;  %13983 = vst [vmem:[#allocation47_spill] sm:$0xff] %v12628_v24  ;;  %v6654_v40 = vcombine.high %v6620_v32, %v6636_v18 }
 0x90b   : > { %v12571_v3 = vpop.permute.xlu0 %6460  ;;  %v12573_v4 = vpop.permute.xlu1 %6424 }
 0x90c   : > { %6686 = vrot.lane.b32.xlu1 %v12576_v48, %s8122_s21  ;;  %v12612_v25 = vrot.slane %v6653_v63, %v13953_v11  ;;  %v12667_v32 = vrot.slane %v6654_v40, %v13953_v11 }
 0x90d   : > { %6962 = vrot.lane.b32.xlu0 %v12580_v15, %s8122_s21 }
 0x90f   : > { %v12588_v8 = vpop.permute.xlu0 %5742  ;;  %v12590_v10 = vpop.permute.xlu1 %6432 }
 0x910   : > { %6942 = vrot.lane.b32.xlu1 %v12593_v22, %s8121_s20  ;;  %v7578_v22 = vcombine.high %v12151_v28, %v12417_v58  ;;  %v12631_v58 = vrot.slane %v6902_v45, %v13953_v11  ;;  %v7526_v45 = vcombine.high %v12169_v29, %v12489_v60  ;;  %v7542_v60 = vcombine.high %v12522_v27, %v12525_v39 }
 0x911   : > { %7432 = vrot.lane.b32.xlu0 %v12596_v2, %s8122_s21 }
 0x912   : > { %v7592_v28 = vrot.slane %v7578_v22, %v13952_v5  ;;  %v7510_v22 = vcombine.high %v12161_v43, %v12450_v37  ;;  %v7540_v29 = vrot.slane %v7526_v45, %v13952_v5  ;;  %v12686_v45 = vrot.slane %v7542_v60, %v13953_v11 }
 0x913   : > { %v12604_v50 = vpop.permute.xlu0 %6468  ;;  %v12606_v48 = vpop.permute.xlu1 %6440 }
 0x914   : > { %7412 = vrot.lane.b32.xlu1 %v12609_v21, %s8121_s20  ;;  %v7625_v51 = vcombine.low %v7592_v28, %v7608_v44  ;;  %v7524_v43 = vrot.slane %v7510_v22, %v13952_v5 }
 0x915   : > { %6714 = vrot.lane.b32.xlu0 %v12612_v25, %s8122_s21 }
 0x916   : > { %v12661_v18 = vrot.slane %v7625_v51, %v13953_v11  ;;  %v7557_v40 = vcombine.low %v7524_v43, %v7540_v29 }
 0x917   : > { %v12623_v62 = vpop.permute.xlu0 %5750  ;;  %v12625_v54 = vpop.permute.xlu1 %7148 }
 0x918   : > { %6694 = vrot.lane.b32.xlu1 %v12628_v24, %s8121_s20  ;;  %v7626_v24 = vcombine.high %v7592_v28, %v7608_v44  ;;  %13984 = vst [vmem:[#allocation73_spill] sm:$0xff] %v12661_v18  ;;  %v13986_v28 = vcombine.low %v12196_v17, %v12199_v16  ;;  %v12697_v16 = vrot.slane %v7557_v40, %v13953_v11 }
 0x919   : > { %6970 = vrot.lane.b32.xlu0 %v12631_v58, %s8121_s20 }
 0x91a   : > { %v12677_v42 = vrot.slane %v7626_v24, %v13953_v11  ;;  %v12683_v51 = vrot.slane %v13986_v28, %v13953_v11 }
 0x91b   : > { %v12638_v63 = vpop.permute.xlu0 %7176  ;;  %v12640_v38 = vpop.permute.xlu1 %7156 }
 0x91c   : > { %7678 = vrot.lane.b32.xlu1 %v12643_v12, %s8124_s28  ;;  %13985 = vst [vmem:[#allocation95_spill] sm:$0xff] %v12677_v42  ;;  %13987 = vst [vmem:[#allocation97_spill] sm:$0xff] %v12683_v51  ;;  %v5877_v24 = vcombine.high %v12683_v51, %v13940_v30  ;;  %v5878_v51 = vcombine.high %v12271_v13, %v13940_v30 }
 0x91d   : > { %7440 = vrot.lane.b32.xlu0 %v12648_v23, %s8121_s20 }
 0x91f   : > { %v12656_v34 = vpop.permute.xlu0 %7184  ;;  %v12658_v31 = vpop.permute.xlu1 %7192 }
 0x920   : > { %7686 = vrot.lane.b32.xlu1 %v12661_v18, %s8122_s21  ;;  %v7558_v18 = vcombine.high %v7524_v43, %v7540_v29 }
 0x921   : > { %6722 = vrot.lane.b32.xlu0 %v12667_v32, %s8121_s20 }
 0x923   : > { %v6449_v37 = vpop.permute.xlu0 %6448  ;;  %v12674_v44 = vpop.permute.xlu1 %7164 }
 0x924   : > { %7694 = vrot.lane.b32.xlu1 %v12677_v42, %s8121_s20  ;;  %v6482_v43 = vsel %vm927_vm6, %v12061_v49, %v6449_v37 }
 0x925   : > { %7650 = vrot.lane.b32.xlu0 %v12686_v45, %s8124_s28  ;;  %v6483_v13 = vsel %vm929_vm7, %v6482_v43, %v12527_v0 }
 0x927   : > { %v6457_v5 = vpop.permute.xlu0 %6456  ;;  %v5703_v22 = vpop.permute.xlu1 %5702 }
 0x928   : > { %v5757_v17 = vsel %vm927_vm6, %v12083_v9, %v5703_v22  ;;  %5950 = vrot.lane.b32.xlu1 %v5877_v24, %s8125_s7  ;;  %v13988_v9 = vcombine.low %v12218_v35, %v12221_v7  ;;  %v12716_v22 = vrot.slane %v7558_v18, %v13953_v11  ;;  %v6484_v37 = vsel %vm931_vm8, %v6483_v13, %v6457_v5 }
 0x929   : > { %7658 = vrot.lane.b32.xlu0 %v12697_v16, %s8122_s21  ;;  %v5758_v28 = vsel %vm929_vm7, %v5757_v17, %v12491_v53  ;;  %v6485_v0 = vsel %vm933_vm9, %v6484_v37, %v12571_v3  ;;  %v5879_v5 = vcombine.high %v12258_v47, %v13940_v30  ;;  %v13993_v37 = vld [vmem:[#allocation127_spill] sm:$0xff] }
 0x92a   : > { %v12710_v29 = vrot.slane %v13988_v9, %v13953_v11  ;;  %v13989_v9 = vcombine.low %v12279_v36, %v12282_v41 }
 0x92b   : > { %v5739_v60 = vpop.permute.xlu0 %5738  ;;  %v5711_v42 = vpop.permute.xlu1 %5710 }
 0x92c   : > { %v5759_v40 = vsel %vm931_vm8, %v5758_v28, %v5711_v42  ;;  %5958 = vrot.lane.b32.xlu1 %v5878_v51, %s8123_s27  ;;  %v6131_v49 = vcombine.high %v12710_v29, %v13940_v30  ;;  %v6133_v42 = vcombine.high %v12349_v14, %v13940_v30  ;;  %v6134_v14 = vcombine.high %v12377_v6, %v13940_v30 }
 0x92d   : > { %7666 = vrot.lane.b32.xlu0 %v12716_v22, %s8121_s20  ;;  %v5760_v35 = vsel %vm933_vm9, %v5759_v40, %v12529_v52  ;;  %v12747_v3 = vrot.slane %v13989_v9, %v13953_v11  ;;  %v13990_v40 = vld [vmem:[#allocation25_spill] sm:$0xff]  ;;  %s7964_s20 = sshll.u32 %s14037_s25, 4 }
 0x92e   : > { %v6132_v13 = vcombine.high %v13990_v40, %v13940_v30  ;;  %s331_s28 = scalar_lea.vmem %s13213_s6, %s7964_s20 }
 0x92f   : > { %v6465_v53 = vpop.permute.xlu0 %6464  ;;  %v5719_v7 = vpop.permute.xlu1 %5718  ;;  %v6199_v36 = vcombine.high %v12747_v3, %v13940_v30 }
 0x930   : > { %v5761_v18 = vsel %vm935_vm10, %v5760_v35, %v5719_v7  ;;  %6204 = vrot.lane.b32.xlu1 %v6131_v49, %s8125_s7  ;;  %v6486_v17 = vsel %vm935_vm10, %v6485_v0, %v6465_v53  ;;  %v13992_v49 = vld [vmem:[#allocation69_spill] sm:$0xff]  ;;  %v13995_v0 = vld [vmem:[#allocation139_spill] sm:$0xff] }
 0x931   : > { %6220 = vrot.lane.b32.xlu0 %v6133_v42, %s8119_s30  ;;  %v5762_v52 = vsel %vm937_vm11, %v5761_v18, %v12551_v1  ;;  %v6487_v47 = vsel %vm937_vm11, %v6486_v17, %v12604_v50  ;;  %v13991_v50 = vld [vmem:[#allocation107_spill] sm:$0xff]  ;;  %v13994_v18 = vcombine.low %v13992_v49, %v13993_v37  ;;  %v13997_v17 = vld [vmem:[#allocation45_spill] sm:$0xff] }
 0x932   : > { %v5880_v7 = vcombine.high %v13991_v50, %v13940_v30 }
 0x933   : > { %v5747_v51 = vpop.permute.xlu0 %5746  ;;  %v5727_v24 = vpop.permute.xlu1 %5726  ;;  %v12766_v42 = vrot.slane %v13994_v18, %v13953_v11 }
 0x934   : > { %v5763_v28 = vsel %vm939_vm12, %v5762_v52, %v5727_v24  ;;  %5966 = vrot.lane.b32.xlu1 %v5879_v5, %s8119_s30  ;;  %v13996_v24 = vld [vmem:[#allocation113_spill] sm:$0xff] }
 0x935   : > { %5771 = vst [vmem:[#allocation5] sm:$0xf] %v5763_v28  ;;  %6228 = vrot.lane.b32.xlu0 %v6134_v14, %s8120_s16  ;;  %v5947_v28 = vcombine.high %v13997_v17, %v13940_v30  ;;  %v5945_v40 = vcombine.high %v12766_v42, %v13940_v30 }
 0x937   : > { %v6473_v1 = vpop.permute.xlu0 %6472  ;;  %v6421_v43 = vpop.permute.xlu1 %6420 }
 0x938   : > { %v6488_v6 = vsel %vm939_vm12, %v6487_v47, %v6473_v1  ;;  %6212 = vrot.lane.b32.xlu1 %v6132_v13, %s8123_s27  ;;  %v6475_v52 = vsel %vm927_vm6, %v13995_v0, %v6421_v43 }
 0x939   : > { %v6492_v41 = vrot.slane %v6488_v6, 4  ;;  %6232 = vrot.lane.b32.xlu0 %v6199_v36, %s8125_s7  ;;  %v6476_v1 = vsel %vm929_vm7, %v6475_v52, %v12573_v4 }
 0x93b   : > { %6496 = vst [vmem:[#allocation5 + $0x18] sm:$0xf0] %v6492_v41  ;;  %v7173_v53 = vpop.permute.xlu0 %7172  ;;  %v5731_v35 = vpop.permute.xlu1 %5730  ;;  %v13999_v41 = vcombine.low %v12335_v56, %v12338_v61  ;;  %v14001_v56 = vcombine.low %v12302_v57, %v12305_v55 }
 0x93c   : > { %v5764_v5 = vsel %vm927_vm6, %v13996_v24, %v5731_v35  ;;  %5974 = vrot.lane.b32.xlu1 %v5880_v7, %s8120_s16 }
 0x93d   : > { %v5765_v14 = vsel %vm929_vm7, %v5764_v5, %v12549_v19  ;;  %5994 = vrot.lane.b32.xlu0 %v5947_v28, %s8119_s30  ;;  %v13998_v19 = vld [vmem:[#allocation76_spill] sm:$0xff]  ;;  %v12793_v35 = vrot.slane %v13999_v41, %v13953_v11  ;;  %v12807_v61 = vrot.slane %v14001_v56, %v13953_v11  ;;  %v14002_v5 = vcombine.low %v12358_v33, %v12361_v26  ;;  %v14003_v28 = vld [vmem:[#allocation19_spill] sm:$0xff] }
 0x93e   : > { %v5766_v9 = vsel %vm931_vm8, %v5765_v14, %v5739_v60  ;;  %v6200_v36 = vcombine.high %v13998_v19, %v13940_v30  ;;  %v14004_v14 = vld [vmem:[#allocation117_spill] sm:$0xff]  ;;  %v14009_v41 = vld [vmem:[#allocation71_spill] sm:$0xff] }
 0x93f   : > { %v6445_v47 = vpop.permute.xlu0 %6444  ;;  %v6429_v43 = vpop.permute.xlu1 %6428  ;;  %v5767_v13 = vsel %vm933_vm9, %v5766_v9, %v12588_v8  ;;  %v6917_v24 = vcombine.high %v12807_v61, %v13940_v30  ;;  %v12824_v17 = vrot.slane %v14002_v5, %v13953_v11  ;;  %v5948_v9 = vcombine.high %v14004_v14, %v13940_v30  ;;  %v14015_v14 = vld [vmem:[#allocation133_spill] sm:$0xff] }
 0x940   : > { %v6477_v6 = vsel %vm931_vm8, %v6476_v1, %v6429_v43  ;;  %v5768_v60 = vsel %vm935_vm10, %v5767_v13, %v5747_v51  ;;  %5978 = vrot.lane.b32.xlu1 %v5945_v40, %s8125_s7  ;;  %v14000_v51 = vld [vmem:[#allocation120_spill] sm:$0xff]  ;;  %v14007_v40 = vld [vmem:[#allocation109_spill] sm:$0xff] }
 0x941   : > { %6240 = vrot.lane.b32.xlu0 %v6200_v36, %s8123_s27  ;;  %v5769_v8 = vsel %vm937_vm11, %v5768_v60, %v12623_v62  ;;  %v6478_v50 = vsel %vm933_vm9, %v6477_v6, %v12590_v10  ;;  %v5946_v49 = vcombine.high %v14000_v51, %v13940_v30  ;;  %v7387_v62 = vcombine.high %v12793_v35, %v13940_v30  ;;  %v14010_v51 = vld [vmem:[#allocation40_spill] sm:$0xff] }
 0x942   : > { %v6849_v26 = vcombine.high %v12824_v17, %v13940_v30 }
 0x943   : > { %v5755_v4 = vpop.permute.xlu0 %5754  ;;  %v6437_v7 = vpop.permute.xlu1 %6436 }
 0x944   : > { %v5770_v37 = vsel %vm939_vm12, %v5769_v8, %v5755_v4  ;;  %v6479_v18 = vsel %vm935_vm10, %v6478_v50, %v6437_v7  ;;  %5986 = vrot.lane.b32.xlu1 %v5946_v49, %s8123_s27  ;;  %v6201_v4 = vcombine.high %v14009_v41, %v13940_v30  ;;  %v14011_v49 = vcombine.low %v12410_v20, %v14010_v51 }
 0x945   : > { %5772 = vst [vmem:[#allocation5 + $0x8] sm:$0xf] %v5770_v37  ;;  %v6480_v10 = vsel %vm937_vm11, %v6479_v18, %v12606_v48  ;;  %7420 = vrot.lane.b32.xlu0 %v7387_v62, %s8125_s7  ;;  %v7206_v48 = vsel %vm927_vm6, %v14003_v28, %v7173_v53  ;;  %v14006_v53 = vld [vmem:[#allocation49_spill] sm:$0xff]  ;;  %v6920_v51 = vcombine.high %v12631_v58, %v13940_v30  ;;  %v14022_v58 = vld [vmem:[#allocation59_spill] sm:$0xff] }
 0x946   : > { %v6481_v0 = vsel %vm939_vm12, %v6480_v10, %v6445_v47  ;;  %v14005_v47 = vld [vmem:[#allocation74_spill] sm:$0xff]  ;;  %v7207_v43 = vsel %vm929_vm7, %v7206_v48, %v12638_v63  ;;  %v14008_v13 = vcombine.low %v14006_v53, %v14007_v40  ;;  %v12862_v56 = vrot.slane %v14011_v49, %v13953_v11 }
 0x947   : > { %v6491_v57 = vrot.slane %v6481_v0, 4  ;;  %v7181_v55 = vpop.permute.xlu0 %7180  ;;  %v7145_v52 = vpop.permute.xlu1 %7144  ;;  %v14014_v48 = vld [vmem:[#allocation106_spill] sm:$0xff] }
 0x948   : > { %v7199_v1 = vsel %vm927_vm6, %v14005_v47, %v7145_v52  ;;  %6950 = vrot.lane.b32.xlu1 %v6917_v24, %s8125_s7  ;;  %v12842_v6 = vrot.slane %v14008_v13, %v13953_v11  ;;  %v7208_v19 = vsel %vm931_vm8, %v7207_v43, %v7181_v55  ;;  %v6669_v55 = vcombine.high %v12862_v56, %v13940_v30 }
 0x949   : > { %6495 = vst [vmem:[#allocation5 + $0x10] sm:$0xf0] %v6491_v57  ;;  %6002 = vrot.lane.b32.xlu0 %v5948_v9, %s8120_s16  ;;  %v7200_v36 = vsel %vm929_vm7, %v7199_v1, %v12625_v54  ;;  %v7209_v8 = vsel %vm933_vm9, %v7208_v19, %v12656_v34  ;;  %v14012_v34 = vld [vmem:[#allocation54_spill] sm:$0xff]  ;;  %v14016_v9 = vld [vmem:[#allocation48_spill] sm:$0xff]  ;;  %v6919_v13 = vcombine.high %v12580_v15, %v13940_v30  ;;  %v14019_v15 = vld [vmem:[#allocation115_spill] sm:$0xff] }
 0x94a   : > { %v7319_v54 = vcombine.high %v12842_v6, %v13940_v30  ;;  %v7388_v10 = vcombine.high %v14012_v34, %v13940_v30  ;;  %v14017_v47 = vcombine.low %v14015_v14, %v14016_v9 }
 0x94b   : > { %v7189_v33 = vpop.permute.xlu0 %7188  ;;  %v7153_v60 = vpop.permute.xlu1 %7152 }
 0x94c   : > { %v7201_v63 = vsel %vm931_vm8, %v7200_v36, %v7153_v60  ;;  %6922 = vrot.lane.b32.xlu1 %v6849_v26, %s8125_s7  ;;  %v7210_v37 = vsel %vm935_vm10, %v7209_v8, %v7189_v33  ;;  %v12892_v1 = vrot.slane %v14017_v47, %v13953_v11  ;;  %v6670_v33 = vcombine.high %v12560_v46, %v13940_v30  ;;  %v14018_v46 = vld [vmem:[#allocation96_spill] sm:$0xff]  ;;  %v14027_v47 = vld [vmem:[#allocation47_spill] sm:$0xff] }
 0x94d   : > { %6248 = vrot.lane.b32.xlu0 %v6201_v4, %s8119_s30  ;;  %v7202_v7 = vsel %vm933_vm9, %v7201_v63, %v12640_v38  ;;  %v7211_v57 = vsel %vm937_vm11, %v7210_v37, %v12658_v31  ;;  %v6918_v31 = vcombine.high %v14014_v48, %v13940_v30  ;;  %v6850_v36 = vcombine.high %v14018_v46, %v13940_v30  ;;  %v14025_v48 = vld [vmem:[#allocation78_spill] sm:$0xff] }
 0x94e   : > { %v6601_v53 = vcombine.high %v12892_v1, %v13940_v30  ;;  %v7389_v60 = vcombine.high %v12596_v2, %v13940_v30  ;;  %v7320_v63 = vcombine.high %v14019_v15, %v13940_v30  ;;  %v6671_v8 = vcombine.high %v12612_v25, %v13940_v30  ;;  %v14021_v25 = vld [vmem:[#allocation85_spill] sm:$0xff] }
 0x94f   : > { %v7161_v50 = vpop.permute.xlu0 %7160  ;;  %v7169_v62 = vpop.permute.xlu1 %7168  ;;  %v6851_v37 = vcombine.high %v14021_v25, %v13940_v30 }
 0x950   : > { %v7203_v18 = vsel %vm935_vm10, %v7202_v7, %v7161_v50  ;;  %7392 = vrot.lane.b32.xlu1 %v7319_v54, %s8125_s7  ;;  %v14020_v7 = vld [vmem:[#allocation33_spill] sm:$0xff] }
 0x951   : > { %v7204_v38 = vsel %vm937_vm11, %v7203_v18, %v12674_v44  ;;  %7428 = vrot.lane.b32.xlu0 %v7388_v10, %s8123_s27  ;;  %v14013_v44 = vld [vmem:[#allocation140_spill] sm:$0xff]  ;;  %v6602_v54 = vcombine.high %v14020_v7, %v13940_v30  ;;  %v7321_v10 = vcombine.high %v14022_v58, %v13940_v30 }
 0x952   : > { %v7205_v0 = vsel %vm939_vm12, %v7204_v38, %v7169_v62  ;;  %v6202_v5 = vcombine.high %v14013_v44, %v13940_v30  ;;  %v7390_v62 = vcombine.high %v12648_v23, %v13940_v30  ;;  %v14023_v23 = vld [vmem:[#allocation135_spill] sm:$0xff] }
 0x953   : > { %7213 = vst [vmem:[#allocation5 + $0x30] sm:$0xf] %v7205_v0  ;;  %v7197_v20 = vpop.permute.xlu0 %7196  ;;  %v12878_v24 = vpop.permute.xlu1 %5962  ;;  %v7322_v0 = vcombine.high %v12609_v21, %v13940_v30  ;;  %v14024_v21 = vld [vmem:[#allocation114_spill] sm:$0xff] }
 0x954   : > { %v7212_v52 = vsel %vm939_vm12, %v7211_v57, %v7197_v20  ;;  %6702 = vrot.lane.b32.xlu1 %v6669_v55, %s8125_s7  ;;  %v6603_v57 = vcombine.high %v14023_v23, %v13940_v30 }
 0x955   : > { %7214 = vst [vmem:[#allocation5 + $0x38] sm:$0xf] %v7212_v52  ;;  %6256 = vrot.lane.b32.xlu0 %v6202_v5, %s8120_s16  ;;  %v6672_v52 = vcombine.high %v12667_v32, %v13940_v30  ;;  %v6852_v5 = vcombine.high %v14024_v21, %v13940_v30  ;;  %v6604_v32 = vcombine.high %v14027_v47, %v13940_v30  ;;  %v14031_v47 = vld [vmem:[#allocation97_spill] sm:$0xff] }
 0x957   : > { %v12884_v28 = vpop.permute.xlu0 %5954  ;;  %v12894_v43 = vpop.permute.xlu1 %6208 }
 0x958   : > { %6958 = vrot.lane.b32.xlu1 %v6918_v31, %s8123_s27  ;;  %v14026_v31 = vcombine.low %v12476_v59, %v14025_v48 }
 0x959   : > { %6710 = vrot.lane.b32.xlu0 %v6670_v33, %s8123_s27  ;;  %v14028_v33 = vcombine.low %v12522_v27, %v12525_v39  ;;  %v7642_v27 = vcombine.high %v12643_v12, %v13940_v30 }
 0x95a   : > { %v12976_v14 = vrot.slane %v14026_v31, %v13953_v11 }
 0x95b   : > { %v12900_v26 = vpop.permute.xlu0 %5982  ;;  %v12904_v40 = vpop.permute.xlu1 %5970 }
 0x95c   : > { %6674 = vrot.lane.b32.xlu1 %v6601_v53, %s8125_s7  ;;  %v12986_v53 = vrot.slane %v14028_v33, %v13953_v11  ;;  %v7641_v59 = vcombine.high %v12976_v14, %v13940_v30 }
 0x95d   : > { %6966 = vrot.lane.b32.xlu0 %v6919_v13, %s8119_s30 }
 0x95f   : > { %v12910_v19 = vpop.permute.xlu0 %5990  ;;  %v12916_v41 = vpop.permute.xlu1 %6216 }
 0x960   : > { %6930 = vrot.lane.b32.xlu1 %v6850_v36, %s8123_s27  ;;  %v7573_v36 = vcombine.high %v12986_v53, %v13940_v30 }
 0x961   : > { %7436 = vrot.lane.b32.xlu0 %v7389_v60, %s8119_s30  ;;  %v7574_v60 = vcombine.high %v12686_v45, %v13940_v30  ;;  %v14030_v45 = vld [vmem:[#allocation95_spill] sm:$0xff] }
 0x963   : > { %v12920_v4 = vpop.permute.xlu0 %6236  ;;  %v12928_v50 = vpop.permute.xlu1 %6224 }
 0x964   : > { %7400 = vrot.lane.b32.xlu1 %v7320_v63, %s8123_s27  ;;  %v14029_v63 = vld [vmem:[#allocation73_spill] sm:$0xff] }
 0x965   : > { %6718 = vrot.lane.b32.xlu0 %v6671_v8, %s8119_s30  ;;  %v7643_v8 = vcombine.high %v14029_v63, %v13940_v30 }
 0x967   : > { %v12930_v2 = vpop.permute.xlu0 %5998 }
 0x968   : > { %6682 = vrot.lane.b32.xlu1 %v6602_v54, %s8123_s27  ;;  %v7575_v54 = vcombine.high %v12697_v16, %v13940_v30  ;;  %v7728_v16 = vld [vmem:[%s13212_s5] sm:$0x3f] }
 0x969   : > { %6974 = vrot.lane.b32.xlu0 %v6920_v51, %s8120_s16  ;;  %v7644_v51 = vcombine.high %v14030_v45, %v13940_v30 }
 0x96a   : > { %v12938_v49 = vpop.permute.xlu1 %7396 }
 0x96b   : > { %v12942_v18 = vpop.permute.xlu0 %6244 }
 0x96c   : > { %6938 = vrot.lane.b32.xlu1 %v6851_v37, %s8119_s30  ;;  %v7576_v37 = vcombine.high %v12716_v22, %v13940_v30 }
 0x96d   : > { %7444 = vrot.lane.b32.xlu0 %v7390_v62, %s8120_s16 }
 0x96e   : > { %v12948_v34 = vpop.permute.xlu1 %6252 }
 0x96f   : > { %v12952_v38 = vpop.permute.xlu0 %6954 }
 0x970   : > { %7408 = vrot.lane.b32.xlu1 %v7321_v10, %s8119_s30 }
 0x971   : > { %7416 = vrot.lane.b32.xlu0 %v7322_v0, %s8120_s16 }
 0x972   : > { %v12958_v20 = vpop.permute.xlu1 %6678 }
 0x973   : > { %v12962_v55 = vpop.permute.xlu0 %7424 }
 0x974   : > { %6690 = vrot.lane.b32.xlu1 %v6603_v57, %s8119_s30 }
 0x975   : > { %6726 = vrot.lane.b32.xlu0 %v6672_v52, %s8120_s16 }
 0x976   : > { %v12968_v44 = vpop.permute.xlu1 %6934 }
 0x977   : > { %v12978_v9 = vpop.permute.xlu0 %6926 }
 0x978   : > { %6946 = vrot.lane.b32.xlu1 %v6852_v5, %s8120_s16 }
 0x979   : > { %6698 = vrot.lane.b32.xlu0 %v6604_v32, %s8120_s16 }
 0x97a   : > { %v12990_v13 = vpop.permute.xlu1 %7404 }
 0x97b   : > { %v12994_v46 = vpop.permute.xlu0 %6706 }
 0x97c   : > { %7674 = vrot.lane.b32.xlu1 %v7641_v59, %s8125_s7 }
 0x97d   : > { %7646 = vrot.lane.b32.xlu0 %v7573_v36, %s8125_s7 }
 0x97e   : > { %v13000_v11 = vpop.permute.xlu1 %6686 }
 0x97f   : > { %v13004_v39 = vpop.permute.xlu0 %6962 }
 0x980   : > { %7682 = vrot.lane.b32.xlu1 %v7642_v27, %s8123_s27 }
 0x981   : > { %7654 = vrot.lane.b32.xlu0 %v7574_v60, %s8123_s27 }
 0x982   : > { %v13010_v15 = vpop.permute.xlu1 %6942 }
 0x983   : > { %v13014_v7 = vpop.permute.xlu0 %7432 }
 0x984   : > { %7690 = vrot.lane.b32.xlu1 %v7643_v8, %s8119_s30 }
 0x985   : > { %7662 = vrot.lane.b32.xlu0 %v7575_v54, %s8119_s30 }
 0x986   : > { %v13020_v12 = vpop.permute.xlu1 %7412 }
 0x987   : > { %v13024_v25 = vpop.permute.xlu0 %6714 }
 0x988   : > { %7698 = vrot.lane.b32.xlu1 %v7644_v51, %s8120_s16 }
 0x989   : > { %7670 = vrot.lane.b32.xlu0 %v7576_v37, %s8120_s16 }
 0x98a   : > { %v13033_v62 = vpop.permute.xlu1 %6694 }
 0x98b   : > { %v13035_v58 = vpop.permute.xlu0 %6970 }
 0x98c   : > { %7731 = vperm.xlu1 %8039, %v7728_v16  }
 0x98e   : > { %v13037_v10 = vpop.permute.xlu1 %7678 }
 0x98f   : > { %v13039_v0 = vpop.permute.xlu0 %7440 }
 0x992   : > { %v13041_v23 = vpop.permute.xlu1 %7686 }
 0x993   : > { %v13043_v30 = vpop.permute.xlu0 %6722 }
 0x996   : > { %v13045_v22 = vpop.permute.xlu1 %7694 }
 0x997   : > { %v13047_v57 = vpop.permute.xlu0 %7650 }
 0x99a   : > { %v5951_v52 = vpop.permute.xlu1 %5950 }
 0x99b   : > { %v13049_v21 = vpop.permute.xlu0 %7658  ;;  %v6005_v32 = vsel %vm927_vm6, %v14031_v47, %v5951_v52 }
 0x99c   : > { %v6006_v59 = vsel %vm929_vm7, %v6005_v32, %v12884_v28 }
 0x99e   : > { %v5959_v5 = vpop.permute.xlu1 %5958 }
 0x99f   : > { %v13051_v48 = vpop.permute.xlu0 %7666  ;;  %v6007_v27 = vsel %vm931_vm8, %v6006_v59, %v5959_v5 }
 0x9a0   : > { %v6008_v8 = vsel %vm933_vm9, %v6007_v27, %v12878_v24 }
 0x9a2   : > { %v6205_v31 = vpop.permute.xlu1 %6204 }
 0x9a3   : > { %v6221_v33 = vpop.permute.xlu0 %6220  ;;  %v6259_v60 = vsel %vm927_vm6, %v12710_v29, %v6205_v31 }
 0x9a4   : > { %v6260_v54 = vsel %vm929_vm7, %v6259_v60, %v12894_v43 }
 0x9a6   : > { %v5967_v36 = vpop.permute.xlu1 %5966 }
 0x9a7   : > { %v6229_v63 = vpop.permute.xlu0 %6228  ;;  %v6009_v51 = vsel %vm935_vm10, %v6008_v8, %v5967_v36 }
 0x9a8   : > { %v6010_v24 = vsel %vm937_vm11, %v6009_v51, %v12904_v40 }
 0x9aa   : > { %v6213_v45 = vpop.permute.xlu1 %6212 }
 0x9ab   : > { %v6261_v37 = vsel %vm931_vm8, %v6260_v54, %v6213_v45  ;;  %v6233_v16 = vpop.permute.xlu0 %6232 }
 0x9ac   : > { %v6262_v28 = vsel %vm933_vm9, %v6261_v37, %v12916_v41 }
 0x9ad   : > { %v6263_v52 = vsel %vm935_vm10, %v6262_v28, %v6221_v33 }
 0x9ae   : > { %v6264_v29 = vsel %vm937_vm11, %v6263_v52, %v12928_v50  ;;  %v5975_v5 = vpop.permute.xlu1 %5974 }
 0x9af   : > { %v6265_v43 = vsel %vm939_vm12, %v6264_v29, %v6229_v63  ;;  %v6011_v31 = vsel %vm939_vm12, %v6010_v24, %v5975_v5  ;;  %v5995_v47 = vpop.permute.xlu0 %5994 }
 0x9b0   : > { %6273 = vst [vmem:[#allocation5 + $0x10] sm:$0xf] %v6265_v43  ;;  %v6021_v32 = vrot.slane %v6011_v31, 4 }
 0x9b2   : > { %6025 = vst [vmem:[#allocation5] sm:$0xf0] %v6021_v32  ;;  %v5979_v59 = vpop.permute.xlu1 %5978 }
 0x9b3   : > { %v6012_v41 = vsel %vm927_vm6, %v12766_v42, %v5979_v59  ;;  %v6241_v33 = vpop.permute.xlu0 %6240  ;;  %v6266_v42 = vsel %vm927_vm6, %v12747_v3, %v6233_v16 }
 0x9b4   : > { %v6013_v50 = vsel %vm929_vm7, %v6012_v41, %v12900_v26  ;;  %v6267_v28 = vsel %vm929_vm7, %v6266_v42, %v12920_v4 }
 0x9b6   : > { %v5987_v36 = vpop.permute.xlu1 %5986 }
 0x9b7   : > { %v6014_v40 = vsel %vm931_vm8, %v6013_v50, %v5987_v36  ;;  %v7421_v27 = vpop.permute.xlu0 %7420 }
 0x9b8   : > { %v6015_v60 = vsel %vm933_vm9, %v6014_v40, %v12910_v19  ;;  %v6268_v19 = vsel %vm931_vm8, %v6267_v28, %v6241_v33  ;;  %v7720_v40 = vld [vmem:[#allocation5 + $0x10] sm:$0xff] }
 0x9b9   : > { %v6016_v63 = vsel %vm935_vm10, %v6015_v60, %v5995_v47  ;;  %v6269_v24 = vsel %vm933_vm9, %v6268_v19, %v12942_v18  ;;  %v7718_v41 = vld [vmem:[#allocation5] sm:$0xff] }
 0x9ba   : > { %v6951_v8 = vpop.permute.xlu1 %6950  ;;  %v6017_v54 = vsel %vm937_vm11, %v6016_v63, %v12930_v2  ;;  %v7975_v63 = vpack.c.bf16 %v7720_v40, %v7718_v41 }
 0x9bb   : > { %v6003_v45 = vpop.permute.xlu0 %6002  ;;  %v6984_v33 = vsel %vm927_vm6, %v12807_v61, %v6951_v8 }
 0x9bc   : > { %v6018_v51 = vsel %vm939_vm12, %v6017_v54, %v6003_v45  ;;  %v7454_v45 = vsel %vm927_vm6, %v12793_v35, %v7421_v27 }
 0x9bd   : > { %v6022_v26 = vrot.slane %v6018_v51, 4  ;;  %v7455_v61 = vsel %vm929_vm7, %v7454_v45, %v12962_v55 }
 0x9be   : > { %v6923_v37 = vpop.permute.xlu1 %6922 }
 0x9bf   : > { %6026 = vst [vmem:[#allocation5 + $0x8] sm:$0xf0] %v6022_v26  ;;  %v6249_v52 = vpop.permute.xlu0 %6248 }
 0x9c0   : > { %v6270_v5 = vsel %vm935_vm10, %v6269_v24, %v6249_v52 }
 0x9c1   : > { %v6271_v16 = vsel %vm937_vm11, %v6270_v5, %v12948_v34  ;;  %v6985_v34 = vsel %vm929_vm7, %v6984_v33, %v12952_v38 }
 0x9c2   : > { %v7393_v29 = vpop.permute.xlu1 %7392 }
 0x9c3   : > { %v7429_v2 = vpop.permute.xlu0 %7428  ;;  %v7447_v19 = vsel %vm927_vm6, %v12842_v6, %v7393_v29  ;;  %v6977_v6 = vsel %vm927_vm6, %v12824_v17, %v6923_v37 }
 0x9c4   : > { %v7456_v28 = vsel %vm931_vm8, %v7455_v61, %v7429_v2  ;;  %v6978_v17 = vsel %vm929_vm7, %v6977_v6, %v12978_v9 }
 0x9c5   : > { %v7457_v35 = vsel %vm933_vm9, %v7456_v28, %v13014_v7 }
 0x9c6   : > { %v6703_v43 = vpop.permute.xlu1 %6702  ;;  %v7719_v18 = vld [vmem:[#allocation5 + $0x8] sm:$0xff] }
 0x9c7   : > { %v6257_v3 = vpop.permute.xlu0 %6256  ;;  %v6736_v55 = vsel %vm927_vm6, %v12862_v56, %v6703_v43 }
 0x9c8   : > { %v6272_v31 = vsel %vm939_vm12, %v6271_v16, %v6257_v3  ;;  %v7448_v3 = vsel %vm929_vm7, %v7447_v19, %v12938_v49  ;;  %v6737_v7 = vsel %vm929_vm7, %v6736_v55, %v12994_v46 }
 0x9c9   : > { %6274 = vst [vmem:[#allocation5 + $0x18] sm:$0xf] %v6272_v31 }
 0x9ca   : > { %v6959_v4 = vpop.permute.xlu1 %6958 }
 0x9cb   : > { %v6711_v47 = vpop.permute.xlu0 %6710  ;;  %v6986_v42 = vsel %vm931_vm8, %v6985_v34, %v6959_v4 }
 0x9cc   : > { %v6987_v8 = vsel %vm933_vm9, %v6986_v42, %v13004_v39  ;;  %v6738_v43 = vsel %vm931_vm8, %v6737_v7, %v6711_v47 }
 0x9ce   : > { %v6675_v32 = vpop.permute.xlu1 %6674 }
 0x9cf   : > { %v6967_v59 = vpop.permute.xlu0 %6966  ;;  %v6729_v31 = vsel %vm927_vm6, %v12892_v1, %v6675_v32 }
 0x9d0   : > { %v7721_v50 = vld [vmem:[#allocation5 + $0x18] sm:$0xff]  ;;  %v6988_v38 = vsel %vm935_vm10, %v6987_v8, %v6967_v59  ;;  %v6730_v47 = vsel %vm929_vm7, %v6729_v31, %v12958_v20 }
 0x9d1   : > { %v7973_v36 = vpack.c.bf16 %v7721_v50, %v7719_v18  ;;  %v6989_v24 = vsel %vm937_vm11, %v6988_v38, %v13035_v58 }
 0x9d2   : > { %v6931_v60 = vpop.permute.xlu1 %6930 }
 0x9d3   : > { %v7437_v54 = vpop.permute.xlu0 %7436  ;;  %7974 = vmatprep.subr.bf16.mxu1 %v7973_v36  ;;  %v6979_v59 = vsel %vm931_vm8, %v6978_v17, %v6931_v60 }
 0x9d4   : > { %7976 = vmatpush1.bf16.msra.mxu1 %v7975_v63  ;;  %v7458_v39 = vsel %vm935_vm10, %v7457_v35, %v7437_v54  ;;  %v6980_v18 = vsel %vm933_vm9, %v6979_v59, %v12968_v44 }
 0x9d5   : > { %v7459_v56 = vsel %vm937_vm11, %v7458_v39, %v13039_v0  ;;  %v6739_v0 = vsel %vm933_vm9, %v6738_v43, %v13024_v25 }
 0x9d6   : > { %v7401_v51 = vpop.permute.xlu1 %7400 }
 0x9d7   : > { %v6719_v26 = vpop.permute.xlu0 %6718  ;;  %v7449_v58 = vsel %vm931_vm8, %v7448_v3, %v7401_v51 }
 0x9d8   : > { %v7450_v46 = vsel %vm933_vm9, %v7449_v58, %v12990_v13  ;;  %v6740_v41 = vsel %vm935_vm10, %v6739_v0, %v6719_v26 }
 0x9d9   : > { %v6741_v60 = vsel %vm937_vm11, %v6740_v41, %v13043_v30 }
 0x9da   : > { %v6683_v52 = vpop.permute.xlu1 %6682 }
 0x9db   : > { %v6975_v27 = vpop.permute.xlu0 %6974  ;;  %v6731_v9 = vsel %vm931_vm8, %v6730_v47, %v6683_v52 }
 0x9dc   : > { %v6990_v2 = vsel %vm939_vm12, %v6989_v24, %v6975_v27  ;;  %v6732_v36 = vsel %vm933_vm9, %v6731_v9, %v13000_v11 }
 0x9dd   : > { %v6994_v5 = vrot.slane %v6990_v2, 4 }
 0x9de   : > { %v6939_v16 = vpop.permute.xlu1 %6938 }
 0x9df   : > { %6998 = vst [vmem:[#allocation5 + $0x28] sm:$0xf0] %v6994_v5  ;;  %v7445_v29 = vpop.permute.xlu0 %7444  ;;  %v6981_v20 = vsel %vm935_vm10, %v6980_v18, %v6939_v16 }
 0x9e0   : > { %v7460_v49 = vsel %vm939_vm12, %v7459_v56, %v7445_v29  ;;  %v6982_v44 = vsel %vm937_vm11, %v6981_v20, %v13010_v15  ;;  %v7717_v29 = vld [vmem:[%s13211_s4] sm:$0x3f] }
 0x9e1   : > { %v7464_v4 = vrot.slane %v7460_v49, 4 }
 0x9e2   : > { %v7409_v37 = vpop.permute.xlu1 %7408 }
 0x9e3   : > { %7468 = vst [vmem:[#allocation5 + $0x38] sm:$0xf0] %v7464_v4  ;;  %v7451_v1 = vsel %vm935_vm10, %v7450_v46, %v7409_v37  ;;  %v7417_v32 = vpop.permute.xlu0 %7416 }
 0x9e4   : > { %v7452_v13 = vsel %vm937_vm11, %v7451_v1, %v13020_v12 }
 0x9e5   : > { %v7453_v33 = vsel %vm939_vm12, %v7452_v13, %v7417_v32 }
 0x9e6   : > { %v7463_v25 = vrot.slane %v7453_v33, 4  ;;  %v6691_v50 = vpop.permute.xlu1 %6690 }
 0x9e7   : > { %v6727_v40 = vpop.permute.xlu0 %6726  ;;  %v6733_v63 = vsel %vm935_vm10, %v6732_v36, %v6691_v50 }
 0x9e8   : > { %7467 = vst [vmem:[#allocation5 + $0x30] sm:$0xf0] %v7463_v25  ;;  %v6742_v12 = vsel %vm939_vm12, %v6741_v60, %v6727_v40  ;;  %v6734_v11 = vsel %vm937_vm11, %v6733_v63, %v13033_v62 }
 0x9e9   : > { %6744 = vst [vmem:[#allocation5 + $0x28] sm:$0xf] %v6742_v12 }
 0x9ea   : > { %v6947_v34 = vpop.permute.xlu1 %6946  ;;  %v7725_v28 = vld [vmem:[#allocation5 + $0x38] sm:$0xff] }
 0x9eb   : > { %v6983_v54 = vsel %vm939_vm12, %v6982_v44, %v6947_v34  ;;  %v6699_v45 = vpop.permute.xlu0 %6698 }
 0x9ec   : > { %v6993_v42 = vrot.slane %v6983_v54, 4  ;;  %v6735_v51 = vsel %vm939_vm12, %v6734_v11, %v6699_v45 }
 0x9ed   : > { %6743 = vst [vmem:[#allocation5 + $0x20] sm:$0xf] %v6735_v51 }
 0x9ee   : > { %6997 = vst [vmem:[#allocation5 + $0x20] sm:$0xf0] %v6993_v42  ;;  %v7675_v30 = vpop.permute.xlu1 %7674 }
 0x9ef   : > { %v7708_v61 = vsel %vm927_vm6, %v12976_v14, %v7675_v30  ;;  %v7647_v8 = vpop.permute.xlu0 %7646  ;;  %v7724_v55 = vld [vmem:[#allocation5 + $0x30] sm:$0xff] }
 0x9f0   : > { %v7701_v15 = vsel %vm927_vm6, %v12986_v53, %v7647_v8  ;;  %v7723_v26 = vld [vmem:[#allocation5 + $0x28] sm:$0xff]  ;;  %v7709_v52 = vsel %vm929_vm7, %v7708_v61, %v13037_v10 }
 0x9f1   : > { %v7977_v38 = vpack.c.bf16 %v7725_v28, %v7723_v26  ;;  %v7702_v35 = vsel %vm929_vm7, %v7701_v15, %v13047_v57 }
 0x9f2   : > { %v7683_v62 = vpop.permute.xlu1 %7682 }
 0x9f3   : > { %v7710_v19 = vsel %vm931_vm8, %v7709_v52, %v7683_v62  ;;  %v7655_v27 = vpop.permute.xlu0 %7654  ;;  %7978 = vmatprep.subr.bf16.mxu1 %v7977_v38 }
 0x9f4   : > { %v7703_v14 = vsel %vm931_vm8, %v7702_v35, %v7655_v27  ;;  %v7711_v53 = vsel %vm933_vm9, %v7710_v19, %v13041_v23 }
 0x9f5   : > { %v7722_v24 = vld [vmem:[#allocation5 + $0x20] sm:$0xff]  ;;  %v7704_v10 = vsel %vm933_vm9, %v7703_v14, %v13049_v21 }
 0x9f6   : > { %v7691_v39 = vpop.permute.xlu1 %7690  ;;  %v7979_v2 = vpack.c.bf16 %v7724_v55, %v7722_v24 }
 0x9f7   : > { %v7712_v5 = vsel %vm935_vm10, %v7711_v53, %v7691_v39  ;;  %v7663_v3 = vpop.permute.xlu0 %7662 }
 0x9f8   : > { %v7705_v16 = vsel %vm935_vm10, %v7704_v10, %v7663_v3  ;;  %7980 = vmatpush1.bf16.msra.mxu1 %v7979_v2  ;;  %v7713_v57 = vsel %vm937_vm11, %v7712_v5, %v13045_v22 }
 0x9f9   : > { %v7706_v23 = vsel %vm937_vm11, %v7705_v16, %v13051_v48 }
 0x9fa   : > { %v7699_v6 = vpop.permute.xlu1 %7698 }
 0x9fb   : > { %v7714_v7 = vsel %vm939_vm12, %v7713_v57, %v7699_v6  ;;  %v7671_v58 = vpop.permute.xlu0 %7670 }
 0x9fc   : > { %7716 = vst [vmem:[#allocation5 + $0x48] sm:$0xf] %v7714_v7  ;;  %v7707_v56 = vsel %vm939_vm12, %v7706_v23, %v7671_v58 }
 0x9fd   : > { %7715 = vst [vmem:[#allocation5 + $0x40] sm:$0xf] %v7707_v56 }
 0xa03   : > { %v7727_v21 = vld [vmem:[#allocation5 + $0x48] sm:$0xf] }
 0xa04   : > { %7955 = vmatprep.subr.msk.mxu1 %vm336_vm0, %v7727_v21  ;;  %v7726_v22 = vld [vmem:[#allocation5 + $0x40] sm:$0xf] }
 0xa05   : > { %7956 = vmatpush1.msk.msra.mxu1 %vm336_vm0, %v7726_v22 }
 0xa06   : > { %7957 = vmatmul.mubr.msk.f32.vlgmr.msra.gmra.mrb[2].mxu1 %vm7734_vm15, %v7717_v29 }
 0xa0b   : > { %v7732_v43 = vpop.permute.xlu1 %7731 }
 0xad9   : > { %v7810_v48 = vpop.f32.mrb[2].mxu1 }
 0xada   : > { %v7811_v31 = vadd.f32 %v7810_v48, %v7732_v43  ;;  %v7812_v49 = vpop.f32.mrb[3].mxu1 }
 0xadb   : > { %v7813_v4 = vadd.f32 %v7812_v49, %v7732_v43 }
 0xadc   : > { %7815 = vst [vmem:[%s331_s28] sm:$0x3f] %v7811_v31 }
 0xadd   : > { %7816 = vst [vmem:[%s331_s28 + $0x8] sm:$0x3f] %v7813_v4 }
 0xade PF: > { %p16_p7 = scmp.ge.s32.totalorder %s8191_s26, 4   ;;  %s14032_s21 = smov %s8105_s22 }
 0xadf   : > { %s14033_s22 = smov %s8109_s23  ;;  %s14034_s23 = smov %s8201_s29 }
 0xae0   : > { %s14035_s24 = smov %s8191_s26  ;;  %18 = sbr.rel (!%p16_p7) target bundleno = 3 (0x3), region = 98 }
 0xae7   :  { %7838 = vsyncpa [#allocation7], 1 }
 0xae8   :  { %7840 = vsyncpa [#allocation7 + $0x1], 1 }

</bundles_post_ra>
